<compile_context>
chip_gen: v6e
topology: v6e:2x2x1
jax: 0.10.0
libtpu: 0.0.40
codegen_flags: <defaults>
</compile_context>

<pallas_src>
import jax
import jax.numpy as jnp
from jax.experimental import pallas as pl
from jax.experimental.pallas import tpu as pltpu

_EPS = 1e-5


def _elu(z):
    # ELU(alpha=1); clamp the exp argument so the unused branch stays finite.
    return jnp.where(z > 0, z, jnp.exp(jnp.minimum(z, 0.0)) - 1.0)


def _bn_rows(z, gamma, beta):
    # BatchNorm2d train-mode forward in (channel, pixel) layout: per-channel stats
    # over the pixel axis (= N * Hout * Wout elements), biased variance, eps=1e-5.
    mu = jnp.mean(z, axis=-1, keepdims=True)
    d = z - mu
    var = jnp.mean(d * d, axis=-1, keepdims=True)
    return d * jax.lax.rsqrt(var + _EPS) * gamma + beta


def _upsample_kernel(x_ref, m_ref, wmix_ref, bt_ref,
                     g1a_ref, b1a_ref, g1b_ref, b1b_ref,
                     w1a_ref, w1b_ref, g2_ref, b2_ref,
                     o_ref, up1_scr, up2_scr):
    hw = m_ref.shape[0]            # input pixels per sample  (H*W)
    p4 = m_ref.shape[1]            # output pixels per sample (4*H*W)
    n = x_ref.shape[1] // hw       # batch
    n_taps = wmix_ref.shape[0]     # 4 taps of the 2x2 transposed-conv kernel

    m = m_ref[...]                 # (HW, 4HW) bilinear operator (tap-major columns)
    wm = wmix_ref[...]             # (4, C, C) channel-mix matrices
    bt = bt_ref[...]               # (C, 1)    ConvTranspose2d bias

    for s in range(n):             # static loop; aligned lane-axis slices
        x_s = x_ref[:, s * hw:(s + 1) * hw]                           # (C, HW)

        # ---- bilinear x2, align_corners=True: one wide MXU matmul per sample ----
        up1_scr[:, s * p4:(s + 1) * p4] = jnp.dot(
            x_s, m, preferred_element_type=jnp.float32)               # (C, 4HW)

        # ---- ConvTranspose2d(k=2, s=2): channel mix per tap; the stride-2 scatter
        #      is a pure column permutation absorbed by the tap-major layout. ------
        for k in range(n_taps):
            col = s * p4 + k * hw
            up2_scr[:, col:col + hw] = (
                jnp.dot(wm[k], x_s, preferred_element_type=jnp.float32) + bt)

    # ---- Transition BatchNorm2d(2C) -> ELU, applied per concat-half (no concat) --
    a1 = _elu(_bn_rows(up1_scr[...], g1a_ref[...], b1a_ref[...]))
    a2 = _elu(_bn_rows(up2_scr[...], g1b_ref[...], b1b_ref[...]))

    # ---- Transition 1x1 conv (bias=False), weight split over the two halves ------
    y = (jnp.dot(w1a_ref[...], a1, preferred_element_type=jnp.float32)
         + jnp.dot(w1b_ref[...], a2, preferred_element_type=jnp.float32))

    # ---- final BatchNorm2d(Cout) -> ELU -------------------------------------------
    # TODO(synk): BatchNorm2d running_mean/running_var buffer updates (module state)
    # are not materialized; only the train-mode forward normalization is reproduced.
    o_ref[...] = _elu(_bn_rows(y, g2_ref[...], b2_ref[...]))


def _interp_matrix(n_in, n_out):
    # Interpolation matrix (n_out, n_in) for bilinear x2 with align_corners=True.
    o = jnp.arange(n_out, dtype=jnp.float32)
    src = o * (n_in - 1) / (n_out - 1)
    i0 = jnp.clip(jnp.floor(src).astype(jnp.int32), 0, n_in - 2)
    frac = src - i0.astype(jnp.float32)
    rows = jnp.arange(n_out)
    a = jnp.zeros((n_out, n_in), jnp.float32)
    a = a.at[rows, i0].add(1.0 - frac)
    a = a.at[rows, i0 + 1].add(frac)
    return a


def upsample_forward(x, wt, bt, gamma1, beta1, w1, gamma2, beta2):
    """UpSample forward.

    x: (N, C, H, W); wt: (C, C, 2, 2) ConvTranspose2d weight; bt: (C,) its bias;
    gamma1/beta1: (2C,) Transition BatchNorm2d params; w1: (Cout, 2C, 1, 1) 1x1 conv
    weight (bias=False); gamma2/beta2: (Cout,) final BatchNorm2d params.
    Returns (N, Cout, 2H, 2W).
    """
    n, c, h, w = x.shape
    cout = w1.shape[0]
    hw = h * w
    p4 = 4 * hw
    p_out = n * p4
    f32 = jnp.float32

    # Channel-major, lane-dense input layout: pixel = s*H*W + i*W + j.
    x_cm = jnp.transpose(x, (1, 0, 2, 3)).reshape(c, n * hw).astype(f32)

    # Bilinear x2 (align_corners=True) as a per-sample pixel operator with tap-major
    # (di, dj, i, j) output column ordering (constant plumbing done once, outside).
    a_h = _interp_matrix(h, 2 * h).reshape(h, 2, h)   # [i, di, h_src]
    a_w = _interp_matrix(w, 2 * w).reshape(w, 2, w)   # [j, dj, w_src]
    m_perm = jnp.einsum('idh,jew->hwdeij', a_h, a_w).reshape(hw, p4).astype(f32)

    # Channel-mix matrices of the transposed conv, one per (di, dj) tap.
    wmix = jnp.stack([wt[:, :, di, dj].T
                      for di in (0, 1) for dj in (0, 1)]).astype(f32)     # (4, C, C)

    bt_col = bt.reshape(c, 1).astype(f32)
    g1a = gamma1[:c].reshape(c, 1).astype(f32)
    g1b = gamma1[c:].reshape(c, 1).astype(f32)
    b1a = beta1[:c].reshape(c, 1).astype(f32)
    b1b = beta1[c:].reshape(c, 1).astype(f32)
    w1f = w1.reshape(cout, 2 * c).astype(f32)
    w1a, w1b = w1f[:, :c], w1f[:, c:]
    g2 = gamma2.reshape(cout, 1).astype(f32)
    b2 = beta2.reshape(cout, 1).astype(f32)

    vmem = pl.BlockSpec(memory_space=pltpu.MemorySpace.VMEM)
    out = pl.pallas_call(
        _upsample_kernel,
        out_shape=jax.ShapeDtypeStruct((cout, p_out), f32),
        in_specs=[vmem] * 12,
        out_specs=vmem,
        scratch_shapes=[pltpu.VMEM((c, p_out), f32),   # up1 (tap-major pixel order)
                        pltpu.VMEM((c, p_out), f32)],  # up2 (tap-major pixel order)
    )(x_cm, m_perm, wmix, bt_col, g1a, b1a, g1b, b1b, w1a, w1b, g2, b2)

    # Undo the tap-major pixel permutation:
    # (Cout, s, di, dj, i, j) -> (s, Cout, i, di, j, dj) -> (N, Cout, 2H, 2W)
    out6 = out.reshape(cout, n, 2, 2, h, w)
    return jnp.transpose(out6, (1, 0, 4, 2, 5, 3)).reshape(n, cout, 2 * h, 2 * w)


if __name__ == "__main__":
    key = jax.random.PRNGKey(0)
    ks = jax.random.split(key, 8)

    N, C, COUT, H, W = 2, 4, 8, 16, 16
    x = jax.random.normal(ks[0], (N, C, H, W), dtype=jnp.float32)

    # Deterministic synthetic parameters (shapes from the module __init__):
    wt = 0.1 * jax.random.normal(ks[1], (C, C, 2, 2), dtype=jnp.float32)   # ConvT weight
    bt = 0.1 * jax.random.normal(ks[2], (C,), dtype=jnp.float32)           # ConvT bias
    gamma1 = 1.0 + 0.1 * jax.random.normal(ks[3], (2 * C,), dtype=jnp.float32)
    beta1 = 0.1 * jax.random.normal(ks[4], (2 * C,), dtype=jnp.float32)
    w1 = 0.1 * jax.random.normal(ks[5], (COUT, 2 * C, 1, 1), dtype=jnp.float32)  # 1x1, no bias
    gamma2 = 1.0 + 0.1 * jax.random.normal(ks[6], (COUT,), dtype=jnp.float32)
    beta2 = 0.1 * jax.random.normal(ks[7], (COUT,), dtype=jnp.float32)

    out = upsample_forward(x, wt, bt, gamma1, beta1, w1, gamma2, beta2)
    jax.block_until_ready(out)
    assert out.shape == (N, COUT, 2 * H, 2 * W)
    assert bool(jnp.all(jnp.isfinite(out)))
    print("KERNEL_OK")
</pallas_src>

<mosaic_0001>
module attributes {stable_mosaic.version = 11 : i64} {
  func.func @_upsample_kernel(%arg0: memref<4x512xf32, #tpu.memory_space<vmem>>, %arg1: memref<256x1024xf32, #tpu.memory_space<vmem>>, %arg2: memref<4x4x4xf32, #tpu.memory_space<vmem>>, %arg3: memref<4x1xf32, #tpu.memory_space<vmem>>, %arg4: memref<4x1xf32, #tpu.memory_space<vmem>>, %arg5: memref<4x1xf32, #tpu.memory_space<vmem>>, %arg6: memref<4x1xf32, #tpu.memory_space<vmem>>, %arg7: memref<4x1xf32, #tpu.memory_space<vmem>>, %arg8: memref<8x4xf32, #tpu.memory_space<vmem>>, %arg9: memref<8x4xf32, #tpu.memory_space<vmem>>, %arg10: memref<8x1xf32, #tpu.memory_space<vmem>>, %arg11: memref<8x1xf32, #tpu.memory_space<vmem>>, %arg12: memref<8x2048xf32, #tpu.memory_space<vmem>>, %arg13: memref<4x2048xf32, #tpu.memory_space<vmem>>, %arg14: memref<4x2048xf32, #tpu.memory_space<vmem>>) attributes {dimension_semantics = [], scalar_prefetch = 0 : i64, scratch_operands = 2 : i64, tpu.core_type = #tpu.core_type<tc>} {
    %c0 = arith.constant 0 : index
    %c0_0 = arith.constant 0 : index
    %0 = vector.load %arg1[%c0, %c0_0] : memref<256x1024xf32, #tpu.memory_space<vmem>>, vector<256x1024xf32>
    %c0_1 = arith.constant 0 : index
    %c0_2 = arith.constant 0 : index
    %c0_3 = arith.constant 0 : index
    %1 = vector.load %arg2[%c0_1, %c0_2, %c0_3] : memref<4x4x4xf32, #tpu.memory_space<vmem>>, vector<4x4x4xf32>
    %c0_4 = arith.constant 0 : index
    %c0_5 = arith.constant 0 : index
    %2 = vector.load %arg3[%c0_4, %c0_5] : memref<4x1xf32, #tpu.memory_space<vmem>>, vector<4x1xf32>
    %c0_6 = arith.constant 0 : index
    %c0_7 = arith.constant 0 : index
    %3 = vector.load %arg0[%c0_6, %c0_7] : memref<4x512xf32, #tpu.memory_space<vmem>>, vector<4x256xf32>
    %cst = arith.constant dense<0.000000e+00> : vector<4x1024xf32>
    %4 = tpu.matmul %3, %0, %cst {dimension_numbers = #tpu.dot_dimension_numbers<[1], [0], [0], [1], [0, 0, 1, 1], [], []>} : vector<4x256xf32>, vector<256x1024xf32>, vector<4x1024xf32> -> vector<4x1024xf32>
    %c0_8 = arith.constant 0 : index
    %c0_9 = arith.constant 0 : index
    %5 = vector.load %arg13[%c0_8, %c0_9] : memref<4x2048xf32, #tpu.memory_space<vmem>>, vector<4x1024xf32>
    tpu.vector_store %arg13[%c0_8, %c0_9], %4 {strides = array<i32>} : memref<4x2048xf32, #tpu.memory_space<vmem>>, vector<4x1024xf32>,
    %6 = vector.extract_strided_slice %1 {offsets = [0, 0, 0], sizes = [1, 4, 4], strides = [1, 1, 1]} : vector<4x4x4xf32> to vector<1x4x4xf32>
    %7 = vector.shape_cast %6 : vector<1x4x4xf32> to vector<4x4xf32>
    %cst_10 = arith.constant dense<0.000000e+00> : vector<4x256xf32>
    %8 = tpu.matmul %7, %3, %cst_10 {dimension_numbers = #tpu.dot_dimension_numbers<[1], [0], [0], [1], [0, 0, 1, 1], [], []>} : vector<4x4xf32>, vector<4x256xf32>, vector<4x256xf32> -> vector<4x256xf32>
    %9 = vector.broadcast %2 : vector<4x1xf32> to vector<4x256xf32>
    %10 = arith.addf %8, %9 : vector<4x256xf32>
    %c0_11 = arith.constant 0 : index
    %c0_12 = arith.constant 0 : index
    %11 = vector.load %arg14[%c0_11, %c0_12] : memref<4x2048xf32, #tpu.memory_space<vmem>>, vector<4x256xf32>
    tpu.vector_store %arg14[%c0_11, %c0_12], %10 {strides = array<i32>} : memref<4x2048xf32, #tpu.memory_space<vmem>>, vector<4x256xf32>,
    %12 = vector.extract_strided_slice %1 {offsets = [1, 0, 0], sizes = [1, 4, 4], strides = [1, 1, 1]} : vector<4x4x4xf32> to vector<1x4x4xf32>
    %13 = vector.shape_cast %12 : vector<1x4x4xf32> to vector<4x4xf32>
    %cst_13 = arith.constant dense<0.000000e+00> : vector<4x256xf32>
    %14 = tpu.matmul %13, %3, %cst_13 {dimension_numbers = #tpu.dot_dimension_numbers<[1], [0], [0], [1], [0, 0, 1, 1], [], []>} : vector<4x4xf32>, vector<4x256xf32>, vector<4x256xf32> -> vector<4x256xf32>
    %15 = vector.broadcast %2 : vector<4x1xf32> to vector<4x256xf32>
    %16 = arith.addf %14, %15 : vector<4x256xf32>
    %c0_14 = arith.constant 0 : index
    %c256 = arith.constant 256 : index
    %17 = vector.load %arg14[%c0_14, %c256] : memref<4x2048xf32, #tpu.memory_space<vmem>>, vector<4x256xf32>
    tpu.vector_store %arg14[%c0_14, %c256], %16 {strides = array<i32>} : memref<4x2048xf32, #tpu.memory_space<vmem>>, vector<4x256xf32>,
    %18 = vector.extract_strided_slice %1 {offsets = [2, 0, 0], sizes = [1, 4, 4], strides = [1, 1, 1]} : vector<4x4x4xf32> to vector<1x4x4xf32>
    %19 = vector.shape_cast %18 : vector<1x4x4xf32> to vector<4x4xf32>
    %cst_15 = arith.constant dense<0.000000e+00> : vector<4x256xf32>
    %20 = tpu.matmul %19, %3, %cst_15 {dimension_numbers = #tpu.dot_dimension_numbers<[1], [0], [0], [1], [0, 0, 1, 1], [], []>} : vector<4x4xf32>, vector<4x256xf32>, vector<4x256xf32> -> vector<4x256xf32>
    %21 = vector.broadcast %2 : vector<4x1xf32> to vector<4x256xf32>
    %22 = arith.addf %20, %21 : vector<4x256xf32>
    %c0_16 = arith.constant 0 : index
    %c512 = arith.constant 512 : index
    %23 = vector.load %arg14[%c0_16, %c512] : memref<4x2048xf32, #tpu.memory_space<vmem>>, vector<4x256xf32>
    tpu.vector_store %arg14[%c0_16, %c512], %22 {strides = array<i32>} : memref<4x2048xf32, #tpu.memory_space<vmem>>, vector<4x256xf32>,
    %24 = vector.extract_strided_slice %1 {offsets = [3, 0, 0], sizes = [1, 4, 4], strides = [1, 1, 1]} : vector<4x4x4xf32> to vector<1x4x4xf32>
    %25 = vector.shape_cast %24 : vector<1x4x4xf32> to vector<4x4xf32>
    %cst_17 = arith.constant dense<0.000000e+00> : vector<4x256xf32>
    %26 = tpu.matmul %25, %3, %cst_17 {dimension_numbers = #tpu.dot_dimension_numbers<[1], [0], [0], [1], [0, 0, 1, 1], [], []>} : vector<4x4xf32>, vector<4x256xf32>, vector<4x256xf32> -> vector<4x256xf32>
    %27 = vector.broadcast %2 : vector<4x1xf32> to vector<4x256xf32>
    %28 = arith.addf %26, %27 : vector<4x256xf32>
    %c0_18 = arith.constant 0 : index
    %c768 = arith.constant 768 : index
    %29 = vector.load %arg14[%c0_18, %c768] : memref<4x2048xf32, #tpu.memory_space<vmem>>, vector<4x256xf32>
    tpu.vector_store %arg14[%c0_18, %c768], %28 {strides = array<i32>} : memref<4x2048xf32, #tpu.memory_space<vmem>>, vector<4x256xf32>,
    %c0_19 = arith.constant 0 : index
    %c256_20 = arith.constant 256 : index
    %30 = vector.load %arg0[%c0_19, %c256_20] : memref<4x512xf32, #tpu.memory_space<vmem>>, vector<4x256xf32>
    %cst_21 = arith.constant dense<0.000000e+00> : vector<4x1024xf32>
    %31 = tpu.matmul %30, %0, %cst_21 {dimension_numbers = #tpu.dot_dimension_numbers<[1], [0], [0], [1], [0, 0, 1, 1], [], []>} : vector<4x256xf32>, vector<256x1024xf32>, vector<4x1024xf32> -> vector<4x1024xf32>
    %c0_22 = arith.constant 0 : index
    %c1024 = arith.constant 1024 : index
    %32 = vector.load %arg13[%c0_22, %c1024] : memref<4x2048xf32, #tpu.memory_space<vmem>>, vector<4x1024xf32>
    tpu.vector_store %arg13[%c0_22, %c1024], %31 {strides = array<i32>} : memref<4x2048xf32, #tpu.memory_space<vmem>>, vector<4x1024xf32>,
    %33 = vector.extract_strided_slice %1 {offsets = [0, 0, 0], sizes = [1, 4, 4], strides = [1, 1, 1]} : vector<4x4x4xf32> to vector<1x4x4xf32>
    %34 = vector.shape_cast %33 : vector<1x4x4xf32> to vector<4x4xf32>
    %cst_23 = arith.constant dense<0.000000e+00> : vector<4x256xf32>
    %35 = tpu.matmul %34, %30, %cst_23 {dimension_numbers = #tpu.dot_dimension_numbers<[1], [0], [0], [1], [0, 0, 1, 1], [], []>} : vector<4x4xf32>, vector<4x256xf32>, vector<4x256xf32> -> vector<4x256xf32>
    %36 = vector.broadcast %2 : vector<4x1xf32> to vector<4x256xf32>
    %37 = arith.addf %35, %36 : vector<4x256xf32>
    %c0_24 = arith.constant 0 : index
    %c1024_25 = arith.constant 1024 : index
    %38 = vector.load %arg14[%c0_24, %c1024_25] : memref<4x2048xf32, #tpu.memory_space<vmem>>, vector<4x256xf32>
    tpu.vector_store %arg14[%c0_24, %c1024_25], %37 {strides = array<i32>} : memref<4x2048xf32, #tpu.memory_space<vmem>>, vector<4x256xf32>,
    %39 = vector.extract_strided_slice %1 {offsets = [1, 0, 0], sizes = [1, 4, 4], strides = [1, 1, 1]} : vector<4x4x4xf32> to vector<1x4x4xf32>
    %40 = vector.shape_cast %39 : vector<1x4x4xf32> to vector<4x4xf32>
    %cst_26 = arith.constant dense<0.000000e+00> : vector<4x256xf32>
    %41 = tpu.matmul %40, %30, %cst_26 {dimension_numbers = #tpu.dot_dimension_numbers<[1], [0], [0], [1], [0, 0, 1, 1], [], []>} : vector<4x4xf32>, vector<4x256xf32>, vector<4x256xf32> -> vector<4x256xf32>
    %42 = vector.broadcast %2 : vector<4x1xf32> to vector<4x256xf32>
    %43 = arith.addf %41, %42 : vector<4x256xf32>
    %c0_27 = arith.constant 0 : index
    %c1280 = arith.constant 1280 : index
    %44 = vector.load %arg14[%c0_27, %c1280] : memref<4x2048xf32, #tpu.memory_space<vmem>>, vector<4x256xf32>
    tpu.vector_store %arg14[%c0_27, %c1280], %43 {strides = array<i32>} : memref<4x2048xf32, #tpu.memory_space<vmem>>, vector<4x256xf32>,
    %45 = vector.extract_strided_slice %1 {offsets = [2, 0, 0], sizes = [1, 4, 4], strides = [1, 1, 1]} : vector<4x4x4xf32> to vector<1x4x4xf32>
    %46 = vector.shape_cast %45 : vector<1x4x4xf32> to vector<4x4xf32>
    %cst_28 = arith.constant dense<0.000000e+00> : vector<4x256xf32>
    %47 = tpu.matmul %46, %30, %cst_28 {dimension_numbers = #tpu.dot_dimension_numbers<[1], [0], [0], [1], [0, 0, 1, 1], [], []>} : vector<4x4xf32>, vector<4x256xf32>, vector<4x256xf32> -> vector<4x256xf32>
    %48 = vector.broadcast %2 : vector<4x1xf32> to vector<4x256xf32>
    %49 = arith.addf %47, %48 : vector<4x256xf32>
    %c0_29 = arith.constant 0 : index
    %c1536 = arith.constant 1536 : index
    %50 = vector.load %arg14[%c0_29, %c1536] : memref<4x2048xf32, #tpu.memory_space<vmem>>, vector<4x256xf32>
    tpu.vector_store %arg14[%c0_29, %c1536], %49 {strides = array<i32>} : memref<4x2048xf32, #tpu.memory_space<vmem>>, vector<4x256xf32>,
    %51 = vector.extract_strided_slice %1 {offsets = [3, 0, 0], sizes = [1, 4, 4], strides = [1, 1, 1]} : vector<4x4x4xf32> to vector<1x4x4xf32>
    %52 = vector.shape_cast %51 : vector<1x4x4xf32> to vector<4x4xf32>
    %cst_30 = arith.constant dense<0.000000e+00> : vector<4x256xf32>
    %53 = tpu.matmul %52, %30, %cst_30 {dimension_numbers = #tpu.dot_dimension_numbers<[1], [0], [0], [1], [0, 0, 1, 1], [], []>} : vector<4x4xf32>, vector<4x256xf32>, vector<4x256xf32> -> vector<4x256xf32>
    %54 = vector.broadcast %2 : vector<4x1xf32> to vector<4x256xf32>
    %55 = arith.addf %53, %54 : vector<4x256xf32>
    %c0_31 = arith.constant 0 : index
    %c1792 = arith.constant 1792 : index
    %56 = vector.load %arg14[%c0_31, %c1792] : memref<4x2048xf32, #tpu.memory_space<vmem>>, vector<4x256xf32>
    tpu.vector_store %arg14[%c0_31, %c1792], %55 {strides = array<i32>} : memref<4x2048xf32, #tpu.memory_space<vmem>>, vector<4x256xf32>,
    %c0_32 = arith.constant 0 : index
    %c0_33 = arith.constant 0 : index
    %57 = vector.load %arg13[%c0_32, %c0_33] : memref<4x2048xf32, #tpu.memory_space<vmem>>, vector<4x2048xf32>
    %c0_34 = arith.constant 0 : index
    %c0_35 = arith.constant 0 : index
    %58 = vector.load %arg4[%c0_34, %c0_35] : memref<4x1xf32, #tpu.memory_space<vmem>>, vector<4x1xf32>
    %c0_36 = arith.constant 0 : index
    %c0_37 = arith.constant 0 : index
    %59 = vector.load %arg5[%c0_36, %c0_37] : memref<4x1xf32, #tpu.memory_space<vmem>>, vector<4x1xf32>
    %cst_38 = arith.constant dense<0.000000e+00> : vector<4xf32>
    %60 = vector.multi_reduction <add>, %57, %cst_38 [1] : vector<4x2048xf32> to vector<4xf32>
    %61 = vector.shape_cast %60 : vector<4xf32> to vector<4x1xf32>
    %cst_39 = arith.constant 2.048000e+03 : f32
    %62 = vector.broadcast %cst_39 : f32 to vector<4x1xf32>
    %63 = arith.divf %61, %62 : vector<4x1xf32>
    %64 = vector.broadcast %63 : vector<4x1xf32> to vector<4x2048xf32>
    %65 = arith.subf %57, %64 : vector<4x2048xf32>
    %66 = arith.mulf %65, %65 : vector<4x2048xf32>
    %cst_40 = arith.constant dense<0.000000e+00> : vector<4xf32>
    %67 = vector.multi_reduction <add>, %66, %cst_40 [1] : vector<4x2048xf32> to vector<4xf32>
    %68 = vector.shape_cast %67 : vector<4xf32> to vector<4x1xf32>
    %cst_41 = arith.constant 2.048000e+03 : f32
    %69 = vector.broadcast %cst_41 : f32 to vector<4x1xf32>
    %70 = arith.divf %68, %69 : vector<4x1xf32>
    %cst_42 = arith.constant 9.99999974E-6 : f32
    %71 = vector.broadcast %cst_42 : f32 to vector<4x1xf32>
    %72 = arith.addf %70, %71 : vector<4x1xf32>
    %73 = math.rsqrt %72 : vector<4x1xf32>
    %74 = vector.broadcast %73 : vector<4x1xf32> to vector<4x2048xf32>
    %75 = arith.mulf %65, %74 : vector<4x2048xf32>
    %76 = vector.broadcast %58 : vector<4x1xf32> to vector<4x2048xf32>
    %77 = arith.mulf %75, %76 : vector<4x2048xf32>
    %78 = vector.broadcast %59 : vector<4x1xf32> to vector<4x2048xf32>
    %79 = arith.addf %77, %78 : vector<4x2048xf32>
    %cst_43 = arith.constant 0.000000e+00 : f32
    %80 = vector.broadcast %cst_43 : f32 to vector<4x2048xf32>
    %81 = arith.cmpf ogt, %79, %80 : vector<4x2048xf32>
    %cst_44 = arith.constant 0.000000e+00 : f32
    %82 = vector.broadcast %cst_44 : f32 to vector<4x2048xf32>
    %83 = arith.minimumf %79, %82 : vector<4x2048xf32>
    %84 = math.exp %83 : vector<4x2048xf32>
    %cst_45 = arith.constant 1.000000e+00 : f32
    %85 = vector.broadcast %cst_45 : f32 to vector<4x2048xf32>
    %86 = arith.subf %84, %85 : vector<4x2048xf32>
    %87 = arith.select %81, %79, %86 : vector<4x2048xi1>, vector<4x2048xf32>
    %c0_46 = arith.constant 0 : index
    %c0_47 = arith.constant 0 : index
    %88 = vector.load %arg14[%c0_46, %c0_47] : memref<4x2048xf32, #tpu.memory_space<vmem>>, vector<4x2048xf32>
    %c0_48 = arith.constant 0 : index
    %c0_49 = arith.constant 0 : index
    %89 = vector.load %arg6[%c0_48, %c0_49] : memref<4x1xf32, #tpu.memory_space<vmem>>, vector<4x1xf32>
    %c0_50 = arith.constant 0 : index
    %c0_51 = arith.constant 0 : index
    %90 = vector.load %arg7[%c0_50, %c0_51] : memref<4x1xf32, #tpu.memory_space<vmem>>, vector<4x1xf32>
    %cst_52 = arith.constant dense<0.000000e+00> : vector<4xf32>
    %91 = vector.multi_reduction <add>, %88, %cst_52 [1] : vector<4x2048xf32> to vector<4xf32>
    %92 = vector.shape_cast %91 : vector<4xf32> to vector<4x1xf32>
    %cst_53 = arith.constant 2.048000e+03 : f32
    %93 = vector.broadcast %cst_53 : f32 to vector<4x1xf32>
    %94 = arith.divf %92, %93 : vector<4x1xf32>
    %95 = vector.broadcast %94 : vector<4x1xf32> to vector<4x2048xf32>
    %96 = arith.subf %88, %95 : vector<4x2048xf32>
    %97 = arith.mulf %96, %96 : vector<4x2048xf32>
    %cst_54 = arith.constant dense<0.000000e+00> : vector<4xf32>
    %98 = vector.multi_reduction <add>, %97, %cst_54 [1] : vector<4x2048xf32> to vector<4xf32>
    %99 = vector.shape_cast %98 : vector<4xf32> to vector<4x1xf32>
    %cst_55 = arith.constant 2.048000e+03 : f32
    %100 = vector.broadcast %cst_55 : f32 to vector<4x1xf32>
    %101 = arith.divf %99, %100 : vector<4x1xf32>
    %cst_56 = arith.constant 9.99999974E-6 : f32
    %102 = vector.broadcast %cst_56 : f32 to vector<4x1xf32>
    %103 = arith.addf %101, %102 : vector<4x1xf32>
    %104 = math.rsqrt %103 : vector<4x1xf32>
    %105 = vector.broadcast %104 : vector<4x1xf32> to vector<4x2048xf32>
    %106 = arith.mulf %96, %105 : vector<4x2048xf32>
    %107 = vector.broadcast %89 : vector<4x1xf32> to vector<4x2048xf32>
    %108 = arith.mulf %106, %107 : vector<4x2048xf32>
    %109 = vector.broadcast %90 : vector<4x1xf32> to vector<4x2048xf32>
    %110 = arith.addf %108, %109 : vector<4x2048xf32>
    %cst_57 = arith.constant 0.000000e+00 : f32
    %111 = vector.broadcast %cst_57 : f32 to vector<4x2048xf32>
    %112 = arith.cmpf ogt, %110, %111 : vector<4x2048xf32>
    %cst_58 = arith.constant 0.000000e+00 : f32
    %113 = vector.broadcast %cst_58 : f32 to vector<4x2048xf32>
    %114 = arith.minimumf %110, %113 : vector<4x2048xf32>
    %115 = math.exp %114 : vector<4x2048xf32>
    %cst_59 = arith.constant 1.000000e+00 : f32
    %116 = vector.broadcast %cst_59 : f32 to vector<4x2048xf32>
    %117 = arith.subf %115, %116 : vector<4x2048xf32>
    %118 = arith.select %112, %110, %117 : vector<4x2048xi1>, vector<4x2048xf32>
    %c0_60 = arith.constant 0 : index
    %c0_61 = arith.constant 0 : index
    %119 = vector.load %arg8[%c0_60, %c0_61] : memref<8x4xf32, #tpu.memory_space<vmem>>, vector<8x4xf32>
    %cst_62 = arith.constant dense<0.000000e+00> : vector<8x2048xf32>
    %120 = tpu.matmul %119, %87, %cst_62 {dimension_numbers = #tpu.dot_dimension_numbers<[1], [0], [0], [1], [0, 0, 1, 1], [], []>} : vector<8x4xf32>, vector<4x2048xf32>, vector<8x2048xf32> -> vector<8x2048xf32>
    %c0_63 = arith.constant 0 : index
    %c0_64 = arith.constant 0 : index
    %121 = vector.load %arg9[%c0_63, %c0_64] : memref<8x4xf32, #tpu.memory_space<vmem>>, vector<8x4xf32>
    %cst_65 = arith.constant dense<0.000000e+00> : vector<8x2048xf32>
    %122 = tpu.matmul %121, %118, %cst_65 {dimension_numbers = #tpu.dot_dimension_numbers<[1], [0], [0], [1], [0, 0, 1, 1], [], []>} : vector<8x4xf32>, vector<4x2048xf32>, vector<8x2048xf32> -> vector<8x2048xf32>
    %123 = arith.addf %120, %122 : vector<8x2048xf32>
    %c0_66 = arith.constant 0 : index
    %c0_67 = arith.constant 0 : index
    %124 = vector.load %arg10[%c0_66, %c0_67] : memref<8x1xf32, #tpu.memory_space<vmem>>, vector<8x1xf32>
    %c0_68 = arith.constant 0 : index
    %c0_69 = arith.constant 0 : index
    %125 = vector.load %arg11[%c0_68, %c0_69] : memref<8x1xf32, #tpu.memory_space<vmem>>, vector<8x1xf32>
    %cst_70 = arith.constant dense<0.000000e+00> : vector<8xf32>
    %126 = vector.multi_reduction <add>, %123, %cst_70 [1] : vector<8x2048xf32> to vector<8xf32>
    %127 = vector.shape_cast %126 : vector<8xf32> to vector<8x1xf32>
    %cst_71 = arith.constant 2.048000e+03 : f32
    %128 = vector.broadcast %cst_71 : f32 to vector<8x1xf32>
    %129 = arith.divf %127, %128 : vector<8x1xf32>
    %130 = vector.broadcast %129 : vector<8x1xf32> to vector<8x2048xf32>
    %131 = arith.subf %123, %130 : vector<8x2048xf32>
    %132 = arith.mulf %131, %131 : vector<8x2048xf32>
    %cst_72 = arith.constant dense<0.000000e+00> : vector<8xf32>
    %133 = vector.multi_reduction <add>, %132, %cst_72 [1] : vector<8x2048xf32> to vector<8xf32>
    %134 = vector.shape_cast %133 : vector<8xf32> to vector<8x1xf32>
    %cst_73 = arith.constant 2.048000e+03 : f32
    %135 = vector.broadcast %cst_73 : f32 to vector<8x1xf32>
    %136 = arith.divf %134, %135 : vector<8x1xf32>
    %cst_74 = arith.constant 9.99999974E-6 : f32
    %137 = vector.broadcast %cst_74 : f32 to vector<8x1xf32>
    %138 = arith.addf %136, %137 : vector<8x1xf32>
    %139 = math.rsqrt %138 : vector<8x1xf32>
    %140 = vector.broadcast %139 : vector<8x1xf32> to vector<8x2048xf32>
    %141 = arith.mulf %131, %140 : vector<8x2048xf32>
    %142 = vector.broadcast %124 : vector<8x1xf32> to vector<8x2048xf32>
    %143 = arith.mulf %141, %142 : vector<8x2048xf32>
    %144 = vector.broadcast %125 : vector<8x1xf32> to vector<8x2048xf32>
    %145 = arith.addf %143, %144 : vector<8x2048xf32>
    %cst_75 = arith.constant 0.000000e+00 : f32
    %146 = vector.broadcast %cst_75 : f32 to vector<8x2048xf32>
    %147 = arith.cmpf ogt, %145, %146 : vector<8x2048xf32>
    %cst_76 = arith.constant 0.000000e+00 : f32
    %148 = vector.broadcast %cst_76 : f32 to vector<8x2048xf32>
    %149 = arith.minimumf %145, %148 : vector<8x2048xf32>
    %150 = math.exp %149 : vector<8x2048xf32>
    %cst_77 = arith.constant 1.000000e+00 : f32
    %151 = vector.broadcast %cst_77 : f32 to vector<8x2048xf32>
    %152 = arith.subf %150, %151 : vector<8x2048xf32>
    %153 = arith.select %147, %145, %152 : vector<8x2048xi1>, vector<8x2048xf32>
    %c0_78 = arith.constant 0 : index
    %c0_79 = arith.constant 0 : index
    %154 = vector.load %arg12[%c0_78, %c0_79] : memref<8x2048xf32, #tpu.memory_space<vmem>>, vector<8x2048xf32>
    tpu.vector_store %arg12[%c0_78, %c0_79], %153 {strides = array<i32>} : memref<8x2048xf32, #tpu.memory_space<vmem>>, vector<8x2048xf32>,
    return
  }
}

</mosaic_0001>

<bundles_post_ra>
// kernel: tpu_custom_call.1
= control target key start
LH: loop header
LB: loop body
LE: loop exit
PB: predicated region body
PF: predicated region fallthrough
CT: control target
= control target key end

     0   :  { %17 = vsyncpa [#allocation5], 0  ;;  %s5456_s0 = inlined_call_operand.vmem [shape: f32[4,512], index: 0, kind: input, shape index: {}]   ;;  %s5457_s1 = inlined_call_operand.hbm [shape: f32[256,1024], index: 1, kind: input, shape index: {}]   ;;  %s5458_s2 = inlined_call_operand.vmem [shape: f32[4,4,4], index: 2, kind: input, shape index: {}]   ;;  %s5459_s3 = inlined_call_operand.vmem [shape: f32[4,1], index: 3, kind: input, shape index: {}]   ;;  %s5460_s4 = inlined_call_operand.vmem [shape: f32[4,1], index: 4, kind: input, shape index: {}]   ;;  %s5461_s5 = inlined_call_operand.vmem [shape: f32[4,1], index: 5, kind: input, shape index: {}]   ;;  %s5462_s6 = inlined_call_operand.vmem [shape: f32[4,1], index: 6, kind: input, shape index: {}]   ;;  %s5463_s7 = inlined_call_operand.vmem [shape: f32[4,1], index: 7, kind: input, shape index: {}]   ;;  %s5464_s8 = inlined_call_operand.vmem [shape: f32[8,4], index: 8, kind: input, shape index: {}]   ;;  %s5465_s9 = inlined_call_operand.vmem [shape: f32[8,4], index: 9, kind: input, shape index: {}]   ;;  %s5466_s10 = inlined_call_operand.vmem [shape: f32[8,1], index: 10, kind: input, shape index: {}]   ;;  %s5467_s11 = inlined_call_operand.vmem [shape: f32[8,1], index: 11, kind: input, shape index: {}]   ;;  %s5468_s12 = inlined_call_operand.hbm [shape: f32[8,2048], index: 12, kind: output, shape index: {}]  }
   0x1   :  { %18 = vsyncpa [#allocation6], 0  ;;  %s3865_s21 = smov [#allocation4]  }
   0x2   :  { %s26_s22 = sshll.u32 %s3865_s21, 4  ;;  %s27_s22 = int_to_ptr.vmem [resolvable:$true] %s26_s22 }
   0x3   :  { %s3829_s23 = scalar_lea.vmem %s27_s22, 32768  ;;  %p3834_p1 = scmp.lt.s32.totalorder %s27_s22, %s27_s22 }
   0x4   :  { %p3830_p0 = scmp.ne.s32.totalorder %s27_s22, %s3829_s23  ;;  %p3835_p2 = scmp.lt.s32.totalorder %s3829_s23, %s3829_s23 }
   0x6   :  { %p3836_p3 = por %p3835_p2, %p3834_p1 }
   0x8   :  { %p3837_p4 = pnand %p3836_p3, %p3830_p0 }
   0xa   :  { %3840 = shalt.err (!%p3837_p4)
}
   0xb   :  { %s3866_s24 = smov 1024   ;;  %s3867_s25 = smov 64  }
   0xc   :  { %32 = dma.hbm_to_vmem [thread:$0]  %s5457_s1, 32768, %s27_s22, [#allocation5], %s3866_s24, %s3866_s24, %s3867_s25  }
   0xd   :  { %3861 = dma.done.wait [#allocation5], 32768  }
   0xe   :  { %3862 = vsyncadd [#allocation5], 4294934528  ;;  %v177_v0 = vld [vmem:[#allocation4 + $0x3c8] sm:$0xff]  ;;  %v179_v1 = vld [vmem:[#allocation4 + $0x3d8] sm:$0xff]  ;;  %vm634_vm0 = vcmask 1043456   ;;  %vm630_vm1 = vcmask 31744  }
   0xf   :  { %v176_v2 = vld [vmem:[#allocation4 + $0x3c0] sm:$0xff]  ;;  %321 = vmatprep.subr.mxu0 %v177_v0  ;;  %392 = vmatprep.subr.mxu1 %v179_v1  ;;  %v178_v3 = vld [vmem:[#allocation4 + $0x3d0] sm:$0xff]  ;;  %v169_v4 = vld [vmem:[#allocation4 + $0x388] sm:$0xff] }
  0x10   :  { %v171_v5 = vld [vmem:[#allocation4 + $0x398] sm:$0xff]  ;;  %322 = vmatpush1.msra.mxu0 %v176_v2  ;;  %393 = vmatpush1.msra.mxu1 %v178_v3  ;;  %v168_v6 = vld [vmem:[#allocation4 + $0x380] sm:$0xff]  ;;  %v170_v7 = vld [vmem:[#allocation4 + $0x390] sm:$0xff] }
  0x11   :  { %v161_v8 = vld [vmem:[#allocation4 + $0x348] sm:$0xff]  ;;  %323 = vmatprep.subr.mxu0 %v169_v4  ;;  %394 = vmatprep.subr.mxu1 %v171_v5  ;;  %v163_v9 = vld [vmem:[#allocation4 + $0x358] sm:$0xff]  ;;  %v160_v10 = vld [vmem:[#allocation4 + $0x340] sm:$0xff] }
  0x12   :  { %v162_v11 = vld [vmem:[#allocation4 + $0x350] sm:$0xff]  ;;  %324 = vmatpush1.msra.mxu0 %v168_v6  ;;  %395 = vmatpush1.msra.mxu1 %v170_v7  ;;  %v153_v12 = vld [vmem:[#allocation4 + $0x308] sm:$0xff]  ;;  %v155_v13 = vld [vmem:[#allocation4 + $0x318] sm:$0xff] }
  0x13   :  { %325 = vmatprep.subr.mxu0 %v161_v8  ;;  %396 = vmatprep.subr.mxu1 %v163_v9  ;;  %v152_v14 = vld [vmem:[#allocation4 + $0x300] sm:$0xff]  ;;  %v154_v15 = vld [vmem:[#allocation4 + $0x310] sm:$0xff]  ;;  %v145_v16 = vld [vmem:[#allocation4 + $0x2c8] sm:$0xff] }
  0x14   :  { %326 = vmatpush1.msra.mxu0 %v160_v10  ;;  %397 = vmatpush1.msra.mxu1 %v162_v11  ;;  %v147_v17 = vld [vmem:[#allocation4 + $0x2d8] sm:$0xff]  ;;  %v144_v18 = vld [vmem:[#allocation4 + $0x2c0] sm:$0xff]  ;;  %v146_v19 = vld [vmem:[#allocation4 + $0x2d0] sm:$0xff] }
  0x15   :  { %327 = vmatprep.subr.mxu0 %v153_v12  ;;  %398 = vmatprep.subr.mxu1 %v155_v13  ;;  %v137_v20 = vld [vmem:[#allocation4 + $0x288] sm:$0xff]  ;;  %v139_v21 = vld [vmem:[#allocation4 + $0x298] sm:$0xff]  ;;  %v136_v22 = vld [vmem:[#allocation4 + $0x280] sm:$0xff] }
  0x16   :  { %328 = vmatpush1.msra.mxu0 %v152_v14  ;;  %399 = vmatpush1.msra.mxu1 %v154_v15  ;;  %v138_v23 = vld [vmem:[#allocation4 + $0x290] sm:$0xff]  ;;  %v129_v24 = vld [vmem:[#allocation4 + $0x248] sm:$0xff]  ;;  %v131_v25 = vld [vmem:[#allocation4 + $0x258] sm:$0xff] }
  0x17   :  { %329 = vmatprep.subr.mxu0 %v145_v16  ;;  %400 = vmatprep.subr.mxu1 %v147_v17  ;;  %v128_v26 = vld [vmem:[#allocation4 + $0x240] sm:$0xff]  ;;  %v130_v27 = vld [vmem:[#allocation4 + $0x250] sm:$0xff]  ;;  %v121_v28 = vld [vmem:[#allocation4 + $0x208] sm:$0xff] }
  0x18   :  { %330 = vmatpush1.msra.mxu0 %v144_v18  ;;  %401 = vmatpush1.msra.mxu1 %v146_v19  ;;  %v123_v29 = vld [vmem:[#allocation4 + $0x218] sm:$0xff]  ;;  %v120_v30 = vld [vmem:[#allocation4 + $0x200] sm:$0xff]  ;;  %v122_v31 = vld [vmem:[#allocation4 + $0x210] sm:$0xff] }
  0x19   :  { %331 = vmatprep.subr.mxu0 %v137_v20  ;;  %402 = vmatprep.subr.mxu1 %v139_v21  ;;  %v113_v32 = vld [vmem:[#allocation4 + $0x1c8] sm:$0xff]  ;;  %v115_v33 = vld [vmem:[#allocation4 + $0x1d8] sm:$0xff]  ;;  %v112_v34 = vld [vmem:[#allocation4 + $0x1c0] sm:$0xff] }
  0x1a   :  { %332 = vmatpush1.msra.mxu0 %v136_v22  ;;  %403 = vmatpush1.msra.mxu1 %v138_v23  ;;  %v114_v35 = vld [vmem:[#allocation4 + $0x1d0] sm:$0xff]  ;;  %v105_v36 = vld [vmem:[#allocation4 + $0x188] sm:$0xff]  ;;  %v107_v37 = vld [vmem:[#allocation4 + $0x198] sm:$0xff] }
  0x1b   :  { %333 = vmatprep.subr.mxu0 %v129_v24  ;;  %404 = vmatprep.subr.mxu1 %v131_v25  ;;  %v3940_v38 = vld [vmem:[#allocation4 + $0x180] sm:$0xff]  ;;  %v3942_v39 = vld [vmem:[#allocation4 + $0x190] sm:$0xff]  ;;  %v3944_v40 = vld [vmem:[#allocation4 + $0x148] sm:$0xff] }
  0x1c   :  { %334 = vmatpush1.msra.mxu0 %v128_v26  ;;  %405 = vmatpush1.msra.mxu1 %v130_v27  ;;  %v3946_v41 = vld [vmem:[#allocation4 + $0x158] sm:$0xff]  ;;  %v3948_v42 = vld [vmem:[#allocation4 + $0x140] sm:$0xff]  ;;  %v3950_v43 = vld [vmem:[#allocation4 + $0x150] sm:$0xff] }
  0x1d   :  { %335 = vmatprep.subr.mxu0 %v121_v28  ;;  %406 = vmatprep.subr.mxu1 %v123_v29  ;;  %v3954_v44 = vld [vmem:[#allocation4 + $0x108] sm:$0xff]  ;;  %v3956_v45 = vld [vmem:[#allocation4 + $0x118] sm:$0xff]  ;;  %v3960_v46 = vld [vmem:[#allocation4 + $0x100] sm:$0xff] }
  0x1e   :  { %336 = vmatpush1.msra.mxu0 %v120_v30  ;;  %407 = vmatpush1.msra.mxu1 %v122_v31  ;;  %v3962_v47 = vld [vmem:[#allocation4 + $0x110] sm:$0xff]  ;;  %v3966_v48 = vld [vmem:[#allocation4 + $0xc8] sm:$0xff]  ;;  %v3968_v49 = vld [vmem:[#allocation4 + $0xd8] sm:$0xff] }
  0x1f   :  { %337 = vmatprep.subr.mxu0 %v113_v32  ;;  %408 = vmatprep.subr.mxu1 %v115_v33  ;;  %v3972_v50 = vld [vmem:[#allocation4 + $0xc0] sm:$0xff]  ;;  %v3974_v51 = vld [vmem:[#allocation4 + $0xd0] sm:$0xff]  ;;  %v3978_v52 = vld [vmem:[#allocation4 + $0x88] sm:$0xff] }
  0x20   :  { %338 = vmatpush1.msra.mxu0 %v112_v34  ;;  %409 = vmatpush1.msra.mxu1 %v114_v35  ;;  %v3980_v53 = vld [vmem:[#allocation4 + $0x98] sm:$0xff]  ;;  %v3984_v54 = vld [vmem:[#allocation4 + $0x80] sm:$0xff]  ;;  %v3986_v55 = vld [vmem:[#allocation4 + $0x90] sm:$0xff] }
  0x21   :  { %339 = vmatprep.subr.mxu0 %v105_v36  ;;  %410 = vmatprep.subr.mxu1 %v107_v37  ;;  %v3990_v56 = vld [vmem:[#allocation4 + $0x48] sm:$0xff]  ;;  %v3992_v57 = vld [vmem:[#allocation4 + $0x58] sm:$0xff]  ;;  %v3996_v58 = vld [vmem:[#allocation4 + $0x40] sm:$0xff] }
  0x22   :  { %340 = vmatpush1.msra.mxu0 %v3940_v38  ;;  %411 = vmatpush1.msra.mxu1 %v3942_v39  ;;  %v3998_v59 = vld [vmem:[#allocation4 + $0x50] sm:$0xff]  ;;  %v4002_v60 = vld [vmem:[#allocation4 + $0x8] sm:$0xff]  ;;  %v4004_v61 = vld [vmem:[#allocation4 + $0x18] sm:$0xff] }
  0x23   :  { %341 = vmatprep.subr.mxu0 %v3944_v40  ;;  %412 = vmatprep.subr.mxu1 %v3946_v41  ;;  %v4008_v62 = vld [vmem:[#allocation4] sm:$0xff]  ;;  %v4010_v63 = vld [vmem:[#allocation4 + $0x10] sm:$0xff]  ;;  %v4014_v0 = vld [vmem:[#allocation4 + $0x7c8] sm:$0xff] }
  0x24   :  { %342 = vmatpush1.msra.mxu0 %v3948_v42  ;;  %413 = vmatpush1.msra.mxu1 %v3950_v43  ;;  %v4016_v1 = vld [vmem:[#allocation4 + $0x7d8] sm:$0xff]  ;;  %v4020_v2 = vld [vmem:[#allocation4 + $0x7c0] sm:$0xff]  ;;  %v4022_v3 = vld [vmem:[#allocation4 + $0x7d0] sm:$0xff] }
  0x25   :  { %343 = vmatprep.subr.mxu0 %v3954_v44  ;;  %414 = vmatprep.subr.mxu1 %v3956_v45  ;;  %v4026_v4 = vld [vmem:[#allocation4 + $0x788] sm:$0xff]  ;;  %v4028_v5 = vld [vmem:[#allocation4 + $0x798] sm:$0xff]  ;;  %v4032_v6 = vld [vmem:[#allocation4 + $0x780] sm:$0xff] }
  0x26   :  { %344 = vmatpush1.msra.mxu0 %v3960_v46  ;;  %415 = vmatpush1.msra.mxu1 %v3962_v47  ;;  %v4034_v7 = vld [vmem:[#allocation4 + $0x790] sm:$0xff]  ;;  %v4038_v8 = vld [vmem:[#allocation4 + $0x748] sm:$0xff]  ;;  %v4040_v9 = vld [vmem:[#allocation4 + $0x758] sm:$0xff] }
  0x27   :  { %345 = vmatprep.subr.mxu0 %v3966_v48  ;;  %416 = vmatprep.subr.mxu1 %v3968_v49  ;;  %v4044_v10 = vld [vmem:[#allocation4 + $0x740] sm:$0xff]  ;;  %v4046_v11 = vld [vmem:[#allocation4 + $0x750] sm:$0xff]  ;;  %v4050_v12 = vld [vmem:[#allocation4 + $0x708] sm:$0xff] }
  0x28   :  { %346 = vmatpush1.msra.mxu0 %v3972_v50  ;;  %417 = vmatpush1.msra.mxu1 %v3974_v51  ;;  %v4052_v13 = vld [vmem:[#allocation4 + $0x718] sm:$0xff]  ;;  %v4056_v14 = vld [vmem:[#allocation4 + $0x700] sm:$0xff]  ;;  %v4058_v15 = vld [vmem:[#allocation4 + $0x710] sm:$0xff] }
  0x29   :  { %347 = vmatprep.subr.mxu0 %v3978_v52  ;;  %418 = vmatprep.subr.mxu1 %v3980_v53  ;;  %v4062_v16 = vld [vmem:[#allocation4 + $0x6c8] sm:$0xff]  ;;  %v4064_v17 = vld [vmem:[#allocation4 + $0x6d8] sm:$0xff]  ;;  %v4068_v18 = vld [vmem:[#allocation4 + $0x6c0] sm:$0xff] }
  0x2a   :  { %348 = vmatpush1.msra.mxu0 %v3984_v54  ;;  %419 = vmatpush1.msra.mxu1 %v3986_v55  ;;  %v4070_v19 = vld [vmem:[#allocation4 + $0x6d0] sm:$0xff]  ;;  %v4074_v20 = vld [vmem:[#allocation4 + $0x688] sm:$0xff]  ;;  %v4076_v21 = vld [vmem:[#allocation4 + $0x698] sm:$0xff] }
  0x2b   :  { %349 = vmatprep.subr.mxu0 %v3990_v56  ;;  %420 = vmatprep.subr.mxu1 %v3992_v57  ;;  %v4080_v22 = vld [vmem:[#allocation4 + $0x680] sm:$0xff]  ;;  %v4082_v23 = vld [vmem:[#allocation4 + $0x690] sm:$0xff]  ;;  %v4086_v24 = vld [vmem:[#allocation4 + $0x648] sm:$0xff] }
  0x2c   :  { %350 = vmatpush1.msra.mxu0 %v3996_v58  ;;  %421 = vmatpush1.msra.mxu1 %v3998_v59  ;;  %v4088_v25 = vld [vmem:[#allocation4 + $0x658] sm:$0xff]  ;;  %v4092_v26 = vld [vmem:[#allocation4 + $0x640] sm:$0xff]  ;;  %v4094_v27 = vld [vmem:[#allocation4 + $0x650] sm:$0xff] }
  0x2d   :  { %351 = vmatprep.subr.mxu0 %v4002_v60  ;;  %422 = vmatprep.subr.mxu1 %v4004_v61  ;;  %5641 = vst [vmem:[#allocation10_spill] sm:$0xff] %v4088_v25  ;;  %5642 = vst [vmem:[#allocation11_spill] sm:$0xff] %v4092_v26  ;;  %v4098_v28 = vld [vmem:[#allocation4 + $0x608] sm:$0xff]  ;;  %v4100_v29 = vld [vmem:[#allocation4 + $0x618] sm:$0xff] }
  0x2e   :  { %352 = vmatpush1.msra.mxu0 %v4008_v62  ;;  %423 = vmatpush1.msra.mxu1 %v4010_v63  ;;  %5643 = vst [vmem:[#allocation12_spill] sm:$0xff] %v4094_v27  ;;  %5644 = vst [vmem:[#allocation13_spill] sm:$0xff] %v4098_v28  ;;  %v4104_v30 = vld [vmem:[#allocation4 + $0x600] sm:$0xff]  ;;  %v4106_v31 = vld [vmem:[#allocation4 + $0x610] sm:$0xff] }
  0x2f   :  { %353 = vmatprep.subr.mxu0 %v4014_v0  ;;  %424 = vmatprep.subr.mxu1 %v4016_v1  ;;  %5645 = vst [vmem:[#allocation14_spill] sm:$0xff] %v4100_v29  ;;  %5646 = vst [vmem:[#allocation15_spill] sm:$0xff] %v4104_v30  ;;  %v4110_v32 = vld [vmem:[#allocation4 + $0x5c8] sm:$0xff]  ;;  %v4112_v33 = vld [vmem:[#allocation4 + $0x5d8] sm:$0xff] }
  0x30   :  { %354 = vmatpush2.msra.mxu0 %v4020_v2  ;;  %425 = vmatpush2.msra.mxu1 %v4022_v3  ;;  %5647 = vst [vmem:[#allocation16_spill] sm:$0xff] %v4106_v31  ;;  %5648 = vst [vmem:[#allocation17_spill] sm:$0xff] %v4110_v32  ;;  %v4116_v34 = vld [vmem:[#allocation4 + $0x5c0] sm:$0xff]  ;;  %v4118_v35 = vld [vmem:[#allocation4 + $0x5d0] sm:$0xff] }
  0x31   :  { %355 = vmatprep.subr.mxu0 %v4026_v4  ;;  %426 = vmatprep.subr.mxu1 %v4028_v5  ;;  %5649 = vst [vmem:[#allocation18_spill] sm:$0xff] %v4112_v33  ;;  %5650 = vst [vmem:[#allocation19_spill] sm:$0xff] %v4116_v34  ;;  %v4122_v36 = vld [vmem:[#allocation4 + $0x588] sm:$0xff]  ;;  %v4124_v37 = vld [vmem:[#allocation4 + $0x598] sm:$0xff] }
  0x32   :  { %356 = vmatpush2.msra.mxu0 %v4032_v6  ;;  %427 = vmatpush2.msra.mxu1 %v4034_v7  ;;  %5651 = vst [vmem:[#allocation20_spill] sm:$0xff] %v4118_v35  ;;  %5652 = vst [vmem:[#allocation21_spill] sm:$0xff] %v4122_v36 }
  0x33   :  { %357 = vmatprep.subr.mxu0 %v4038_v8  ;;  %428 = vmatprep.subr.mxu1 %v4040_v9  ;;  %5653 = vst [vmem:[#allocation22_spill] sm:$0xff] %v4124_v37 }
  0x34   :  { %358 = vmatpush2.msra.mxu0 %v4044_v10  ;;  %429 = vmatpush2.msra.mxu1 %v4046_v11 }
  0x35   :  { %359 = vmatprep.subr.mxu0 %v4050_v12  ;;  %430 = vmatprep.subr.mxu1 %v4052_v13 }
  0x36   :  { %360 = vmatpush2.msra.mxu0 %v4056_v14  ;;  %431 = vmatpush2.msra.mxu1 %v4058_v15 }
  0x37   :  { %361 = vmatprep.subr.mxu0 %v4062_v16  ;;  %432 = vmatprep.subr.mxu1 %v4064_v17 }
  0x38   :  { %362 = vmatpush2.msra.mxu0 %v4068_v18  ;;  %433 = vmatpush2.msra.mxu1 %v4070_v19 }
  0x39   :  { %363 = vmatprep.subr.mxu0 %v4074_v20  ;;  %434 = vmatprep.subr.mxu1 %v4076_v21 }
  0x3a   :  { %364 = vmatpush2.msra.mxu0 %v4080_v22  ;;  %435 = vmatpush2.msra.mxu1 %v4082_v23 }
  0x3b   :  { %365 = vmatprep.subr.mxu0 %v4086_v24  ;;  %436 = vmatprep.subr.mxu1 %v4088_v25  ;;  %v4255_v25 = vld [vmem:[#allocation4 + $0x328] sm:$0xff] }
  0x3c   :  { %366 = vmatpush2.msra.mxu0 %v4092_v26  ;;  %437 = vmatpush2.msra.mxu1 %v4094_v27  ;;  %v4128_v27 = vld [vmem:[#allocation4 + $0x580] sm:$0xff]  ;;  %v4199_v26 = vld [vmem:[#allocation4 + $0x408] sm:$0xff]  ;;  %5692 = vst [vmem:[#allocation61_spill] sm:$0xff] %v4255_v25 }
  0x3d   :  { %367 = vmatprep.subr.mxu0 %v4098_v28  ;;  %438 = vmatprep.subr.mxu1 %v4100_v29  ;;  %5654 = vst [vmem:[#allocation23_spill] sm:$0xff] %v4128_v27  ;;  %v4130_v28 = vld [vmem:[#allocation4 + $0x590] sm:$0xff]  ;;  %v4134_v29 = vld [vmem:[#allocation4 + $0x548] sm:$0xff]  ;;  %5676 = vst [vmem:[#allocation45_spill] sm:$0xff] %v4199_v26 }
  0x3e   :  { %368 = vmatpush2.msra.mxu0 %v4104_v30  ;;  %439 = vmatpush2.msra.mxu1 %v4106_v31  ;;  %5655 = vst [vmem:[#allocation24_spill] sm:$0xff] %v4130_v28  ;;  %5656 = vst [vmem:[#allocation25_spill] sm:$0xff] %v4134_v29  ;;  %v4136_v30 = vld [vmem:[#allocation4 + $0x558] sm:$0xff]  ;;  %v4140_v31 = vld [vmem:[#allocation4 + $0x540] sm:$0xff] }
  0x3f   :  { %369 = vmatprep.subr.mxu0 %v4110_v32  ;;  %440 = vmatprep.subr.mxu1 %v4112_v33  ;;  %5657 = vst [vmem:[#allocation26_spill] sm:$0xff] %v4136_v30  ;;  %5658 = vst [vmem:[#allocation27_spill] sm:$0xff] %v4140_v31  ;;  %v4142_v32 = vld [vmem:[#allocation4 + $0x550] sm:$0xff]  ;;  %v4146_v33 = vld [vmem:[#allocation4 + $0x508] sm:$0xff] }
  0x40   :  { %370 = vmatpush2.msra.mxu0 %v4116_v34  ;;  %441 = vmatpush2.msra.mxu1 %v4118_v35  ;;  %5659 = vst [vmem:[#allocation28_spill] sm:$0xff] %v4142_v32  ;;  %5660 = vst [vmem:[#allocation29_spill] sm:$0xff] %v4146_v33  ;;  %v4148_v34 = vld [vmem:[#allocation4 + $0x518] sm:$0xff]  ;;  %v4152_v35 = vld [vmem:[#allocation4 + $0x500] sm:$0xff] }
  0x41   :  { %371 = vmatprep.subr.mxu0 %v4122_v36  ;;  %442 = vmatprep.subr.mxu1 %v4124_v37  ;;  %5661 = vst [vmem:[#allocation30_spill] sm:$0xff] %v4148_v34  ;;  %5662 = vst [vmem:[#allocation31_spill] sm:$0xff] %v4152_v35  ;;  %v4154_v36 = vld [vmem:[#allocation4 + $0x510] sm:$0xff]  ;;  %v4158_v37 = vld [vmem:[#allocation4 + $0x4c8] sm:$0xff] }
  0x42   :  { %372 = vmatpush2.msra.mxu0 %v4128_v27  ;;  %443 = vmatpush2.msra.mxu1 %v4130_v28  ;;  %5663 = vst [vmem:[#allocation32_spill] sm:$0xff] %v4154_v36  ;;  %5664 = vst [vmem:[#allocation33_spill] sm:$0xff] %v4158_v37  ;;  %v4160_v27 = vld [vmem:[#allocation4 + $0x4d8] sm:$0xff]  ;;  %v4164_v28 = vld [vmem:[#allocation4 + $0x4c0] sm:$0xff] }
  0x43   :  { %373 = vmatprep.subr.mxu0 %v4134_v29  ;;  %444 = vmatprep.subr.mxu1 %v4136_v30  ;;  %5665 = vst [vmem:[#allocation34_spill] sm:$0xff] %v4160_v27  ;;  %5666 = vst [vmem:[#allocation35_spill] sm:$0xff] %v4164_v28  ;;  %v4166_v29 = vld [vmem:[#allocation4 + $0x4d0] sm:$0xff]  ;;  %v4170_v30 = vld [vmem:[#allocation4 + $0x488] sm:$0xff] }
  0x44   :  { %374 = vmatpush2.msra.mxu0 %v4140_v31  ;;  %445 = vmatpush2.msra.mxu1 %v4142_v32  ;;  %5667 = vst [vmem:[#allocation36_spill] sm:$0xff] %v4166_v29  ;;  %5668 = vst [vmem:[#allocation37_spill] sm:$0xff] %v4170_v30  ;;  %v4172_v31 = vld [vmem:[#allocation4 + $0x498] sm:$0xff]  ;;  %v4176_v32 = vld [vmem:[#allocation4 + $0x480] sm:$0xff] }
  0x45   :  { %375 = vmatprep.subr.mxu0 %v4146_v33  ;;  %446 = vmatprep.subr.mxu1 %v4148_v34  ;;  %5669 = vst [vmem:[#allocation38_spill] sm:$0xff] %v4172_v31  ;;  %5670 = vst [vmem:[#allocation39_spill] sm:$0xff] %v4176_v32  ;;  %v4178_v33 = vld [vmem:[#allocation4 + $0x490] sm:$0xff]  ;;  %v4183_v34 = vld [vmem:[%s5456_s0] sm:$0xff] }
  0x46   :  { %376 = vmatpush2.msra.mxu0 %v4152_v35  ;;  %447 = vmatpush2.msra.mxu1 %v4154_v36  ;;  %5671 = vst [vmem:[#allocation40_spill] sm:$0xff] %v4178_v33  ;;  %v4187_v36 = vld [vmem:[#allocation4 + $0x448] sm:$0xff]  ;;  %v4189_v35 = vld [vmem:[#allocation4 + $0x458] sm:$0xff] }
  0x47   :  { %377 = vmatprep.subr.mxu0 %v4158_v37  ;;  %448 = vmatprep.subr.mxu1 %v4160_v27  ;;  %5672 = vst [vmem:[#allocation41_spill] sm:$0xff] %v4187_v36  ;;  %5673 = vst [vmem:[#allocation42_spill] sm:$0xff] %v4189_v35  ;;  %v4193_v27 = vld [vmem:[#allocation4 + $0x440] sm:$0xff]  ;;  %v4195_v37 = vld [vmem:[#allocation4 + $0x450] sm:$0xff] }
  0x48   :  { %378 = vmatpush2.msra.mxu0 %v4164_v28  ;;  %449 = vmatpush2.msra.mxu1 %v4166_v29  ;;  %5674 = vst [vmem:[#allocation43_spill] sm:$0xff] %v4193_v27  ;;  %5675 = vst [vmem:[#allocation44_spill] sm:$0xff] %v4195_v37  ;;  %v4201_v28 = vld [vmem:[#allocation4 + $0x418] sm:$0xff]  ;;  %v4205_v29 = vcombine.high %v4183_v34, %v4183_v34 }
  0x49   :  { %379 = vmatprep.subr.mxu0 %v4170_v30  ;;  %450 = vmatprep.subr.mxu1 %v4172_v31  ;;  %5677 = vst [vmem:[#allocation46_spill] sm:$0xff] %v4201_v28  ;;  %v4209_v31 = vld [vmem:[#allocation4 + $0x400] sm:$0xff]  ;;  %v4245_v30 = vld [vmem:[#allocation4 + $0x378] sm:$0xff] }
  0x4a   :  { %380 = vmatpush2.msra.mxu0 %v4176_v32  ;;  %451 = vmatpush2.msra.mxu1 %v4178_v33  ;;  %5678 = vst [vmem:[#allocation47_spill] sm:$0xff] %v4209_v31  ;;  %v4213_v32 = vld [vmem:[#allocation4 + $0x410] sm:$0xff]  ;;  %v4217_v33 = vld [vmem:[#allocation4 + $0x3e8] sm:$0xff]  ;;  %5689 = vst [vmem:[#allocation58_spill] sm:$0xff] %v4245_v30 }
  0x4b   :  { %381 = vmatprep.subr.mxu0 %v4187_v36  ;;  %452 = vmatprep.subr.mxu1 %v4189_v35  ;;  %5679 = vst [vmem:[#allocation48_spill] sm:$0xff] %v4213_v32  ;;  %5680 = vst [vmem:[#allocation49_spill] sm:$0xff] %v4217_v33  ;;  %v4221_v36 = vld [vmem:[#allocation4 + $0x3f8] sm:$0xff]  ;;  %v4243_v35 = vld [vmem:[#allocation4 + $0x368] sm:$0xff] }
  0x4c   :  { %382 = vmatpush2.msra.mxu0 %v4193_v27  ;;  %453 = vmatpush2.msra.mxu1 %v4195_v37  ;;  %5681 = vst [vmem:[#allocation50_spill] sm:$0xff] %v4221_v36  ;;  %v4225_v27 = vld [vmem:[#allocation4 + $0x3e0] sm:$0xff]  ;;  %v4227_v37 = vld [vmem:[#allocation4 + $0x3f0] sm:$0xff]  ;;  %5688 = vst [vmem:[#allocation57_spill] sm:$0xff] %v4243_v35 }
  0x4d   :  { %383 = vmatprep.subr.mxu0 %v4199_v26  ;;  %454 = vmatprep.subr.mxu1 %v4201_v28  ;;  %5682 = vst [vmem:[#allocation51_spill] sm:$0xff] %v4225_v27  ;;  %5683 = vst [vmem:[#allocation52_spill] sm:$0xff] %v4227_v37  ;;  %v4231_v28 = vld [vmem:[#allocation4 + $0x3a8] sm:$0xff]  ;;  %v4233_v26 = vld [vmem:[#allocation4 + $0x3b8] sm:$0xff] }
  0x4e   :  { %384 = vmatpush2.msra.mxu0 %v4209_v31  ;;  %385 = vmatprep.mubr.f32.mxu0 %v4205_v29  ;;  %5684 = vst [vmem:[#allocation53_spill] sm:$0xff] %v4231_v28  ;;  %5685 = vst [vmem:[#allocation54_spill] sm:$0xff] %v4233_v26  ;;  %v4237_v31 = vld [vmem:[#allocation4 + $0x3a0] sm:$0xff] }
  0x4f   :  { %455 = vmatpush2.msra.mxu1 %v4213_v32  ;;  %386 = vmatmul.mubr.f32.vlgmr.msra.gmra.mxu0 %v4183_v34  ;;  %5686 = vst [vmem:[#allocation55_spill] sm:$0xff] %v4237_v31  ;;  %v4239_v32 = vld [vmem:[#allocation4 + $0x3b0] sm:$0xff] }
  0x50   :  { %456 = vmatprep.mubr.f32.mxu1 %v4205_v29  ;;  %463 = vmatprep.subr.mxu0 %v4217_v33  ;;  %5687 = vst [vmem:[#allocation56_spill] sm:$0xff] %v4239_v32  ;;  %v4249_v33 = vld [vmem:[#allocation4 + $0x360] sm:$0xff] }
  0x51   :  { %534 = vmatprep.subr.mxu1 %v4221_v36  ;;  %457 = vmatmul.mubr.f32.vlgmr.msra.gmra.mxu1 %v4183_v34  ;;  %5690 = vst [vmem:[#allocation59_spill] sm:$0xff] %v4249_v33  ;;  %v4251_v36 = vld [vmem:[#allocation4 + $0x370] sm:$0xff] }
  0x52   :  { %464 = vmatpush1.msra.mxu0 %v4225_v27  ;;  %535 = vmatpush1.msra.mxu1 %v4227_v37  ;;  %5691 = vst [vmem:[#allocation60_spill] sm:$0xff] %v4251_v36  ;;  %v4257_v27 = vld [vmem:[#allocation4 + $0x338] sm:$0xff]  ;;  %v4261_v37 = vld [vmem:[#allocation4 + $0x320] sm:$0xff] }
  0x53   :  { %465 = vmatprep.subr.mxu0 %v4231_v28  ;;  %536 = vmatprep.subr.mxu1 %v4233_v26  ;;  %5693 = vst [vmem:[#allocation62_spill] sm:$0xff] %v4257_v27  ;;  %5694 = vst [vmem:[#allocation63_spill] sm:$0xff] %v4261_v37  ;;  %v4263_v28 = vld [vmem:[#allocation4 + $0x330] sm:$0xff]  ;;  %v4267_v26 = vld [vmem:[#allocation4 + $0x2e8] sm:$0xff] }
  0x54   :  { %466 = vmatpush1.msra.mxu0 %v4237_v31  ;;  %537 = vmatpush1.msra.mxu1 %v4239_v32  ;;  %5695 = vst [vmem:[#allocation64_spill] sm:$0xff] %v4263_v28  ;;  %5696 = vst [vmem:[#allocation65_spill] sm:$0xff] %v4267_v26  ;;  %v4269_v31 = vld [vmem:[#allocation4 + $0x2f8] sm:$0xff]  ;;  %v4273_v32 = vld [vmem:[#allocation4 + $0x2e0] sm:$0xff] }
  0x55   :  { %467 = vmatprep.subr.mxu0 %v4243_v35  ;;  %538 = vmatprep.subr.mxu1 %v4245_v30  ;;  %5697 = vst [vmem:[#allocation66_spill] sm:$0xff] %v4269_v31  ;;  %5698 = vst [vmem:[#allocation67_spill] sm:$0xff] %v4273_v32  ;;  %v4275_v35 = vld [vmem:[#allocation4 + $0x2f0] sm:$0xff]  ;;  %v4279_v30 = vld [vmem:[#allocation4 + $0x2a8] sm:$0xff] }
  0x56   :  { %468 = vmatpush1.msra.mxu0 %v4249_v33  ;;  %539 = vmatpush1.msra.mxu1 %v4251_v36  ;;  %5699 = vst [vmem:[#allocation68_spill] sm:$0xff] %v4275_v35  ;;  %5700 = vst [vmem:[#allocation69_spill] sm:$0xff] %v4279_v30  ;;  %v4281_v33 = vld [vmem:[#allocation4 + $0x2b8] sm:$0xff]  ;;  %v4285_v36 = vld [vmem:[#allocation4 + $0x2a0] sm:$0xff] }
  0x57   :  { %469 = vmatprep.subr.mxu0 %v4255_v25  ;;  %540 = vmatprep.subr.mxu1 %v4257_v27  ;;  %5701 = vst [vmem:[#allocation70_spill] sm:$0xff] %v4281_v33  ;;  %5702 = vst [vmem:[#allocation71_spill] sm:$0xff] %v4285_v36  ;;  %v4287_v25 = vld [vmem:[#allocation4 + $0x2b0] sm:$0xff]  ;;  %v4291_v27 = vld [vmem:[#allocation4 + $0x268] sm:$0xff] }
  0x58   :  { %470 = vmatpush1.msra.mxu0 %v4261_v37  ;;  %541 = vmatpush1.msra.mxu1 %v4263_v28  ;;  %5703 = vst [vmem:[#allocation72_spill] sm:$0xff] %v4287_v25  ;;  %5704 = vst [vmem:[#allocation73_spill] sm:$0xff] %v4291_v27  ;;  %v4293_v37 = vld [vmem:[#allocation4 + $0x278] sm:$0xff]  ;;  %v4297_v28 = vld [vmem:[#allocation4 + $0x260] sm:$0xff] }
  0x59   :  { %471 = vmatprep.subr.mxu0 %v4267_v26  ;;  %542 = vmatprep.subr.mxu1 %v4269_v31  ;;  %5705 = vst [vmem:[#allocation74_spill] sm:$0xff] %v4293_v37  ;;  %5706 = vst [vmem:[#allocation75_spill] sm:$0xff] %v4297_v28  ;;  %v4299_v26 = vld [vmem:[#allocation4 + $0x270] sm:$0xff]  ;;  %v4303_v31 = vld [vmem:[#allocation4 + $0x228] sm:$0xff] }
  0x5a   :  { %472 = vmatpush1.msra.mxu0 %v4273_v32  ;;  %543 = vmatpush1.msra.mxu1 %v4275_v35  ;;  %5707 = vst [vmem:[#allocation76_spill] sm:$0xff] %v4299_v26  ;;  %5708 = vst [vmem:[#allocation77_spill] sm:$0xff] %v4303_v31  ;;  %v4305_v32 = vld [vmem:[#allocation4 + $0x238] sm:$0xff]  ;;  %v4309_v35 = vld [vmem:[#allocation4 + $0x220] sm:$0xff] }
  0x5b   :  { %473 = vmatprep.subr.mxu0 %v4279_v30  ;;  %544 = vmatprep.subr.mxu1 %v4281_v33  ;;  %5709 = vst [vmem:[#allocation78_spill] sm:$0xff] %v4305_v32  ;;  %5710 = vst [vmem:[#allocation79_spill] sm:$0xff] %v4309_v35  ;;  %v4311_v30 = vld [vmem:[#allocation4 + $0x230] sm:$0xff]  ;;  %v4315_v33 = vld [vmem:[#allocation4 + $0x1e8] sm:$0xff] }
  0x5c   :  { %474 = vmatpush1.msra.mxu0 %v4285_v36  ;;  %545 = vmatpush1.msra.mxu1 %v4287_v25  ;;  %5711 = vst [vmem:[#allocation80_spill] sm:$0xff] %v4311_v30  ;;  %5712 = vst [vmem:[#allocation81_spill] sm:$0xff] %v4315_v33  ;;  %v4317_v36 = vld [vmem:[#allocation4 + $0x1f8] sm:$0xff]  ;;  %v4321_v25 = vld [vmem:[#allocation4 + $0x1e0] sm:$0xff] }
  0x5d   :  { %475 = vmatprep.subr.mxu0 %v4291_v27  ;;  %546 = vmatprep.subr.mxu1 %v4293_v37  ;;  %5713 = vst [vmem:[#allocation82_spill] sm:$0xff] %v4317_v36  ;;  %5714 = vst [vmem:[#allocation83_spill] sm:$0xff] %v4321_v25  ;;  %v4323_v27 = vld [vmem:[#allocation4 + $0x1f0] sm:$0xff]  ;;  %v4327_v37 = vld [vmem:[#allocation4 + $0x1a8] sm:$0xff] }
  0x5e   :  { %476 = vmatpush1.msra.mxu0 %v4297_v28  ;;  %547 = vmatpush1.msra.mxu1 %v4299_v26  ;;  %5715 = vst [vmem:[#allocation84_spill] sm:$0xff] %v4323_v27  ;;  %5716 = vst [vmem:[#allocation85_spill] sm:$0xff] %v4327_v37  ;;  %v4329_v28 = vld [vmem:[#allocation4 + $0x1b8] sm:$0xff]  ;;  %v4333_v26 = vld [vmem:[#allocation4 + $0x1a0] sm:$0xff] }
  0x5f   :  { %477 = vmatprep.subr.mxu0 %v4303_v31  ;;  %548 = vmatprep.subr.mxu1 %v4305_v32  ;;  %5717 = vst [vmem:[#allocation86_spill] sm:$0xff] %v4329_v28  ;;  %5718 = vst [vmem:[#allocation87_spill] sm:$0xff] %v4333_v26  ;;  %v4335_v31 = vld [vmem:[#allocation4 + $0x1b0] sm:$0xff]  ;;  %v4339_v32 = vld [vmem:[#allocation4 + $0x168] sm:$0xff] }
  0x60   :  { %478 = vmatpush1.msra.mxu0 %v4309_v35  ;;  %549 = vmatpush1.msra.mxu1 %v4311_v30  ;;  %5719 = vst [vmem:[#allocation88_spill] sm:$0xff] %v4335_v31  ;;  %5720 = vst [vmem:[#allocation89_spill] sm:$0xff] %v4339_v32  ;;  %v4341_v35 = vld [vmem:[#allocation4 + $0x178] sm:$0xff]  ;;  %v4345_v30 = vld [vmem:[#allocation4 + $0x160] sm:$0xff] }
  0x61   :  { %479 = vmatprep.subr.mxu0 %v4315_v33  ;;  %550 = vmatprep.subr.mxu1 %v4317_v36  ;;  %5721 = vst [vmem:[#allocation90_spill] sm:$0xff] %v4341_v35  ;;  %5722 = vst [vmem:[#allocation91_spill] sm:$0xff] %v4345_v30  ;;  %v4347_v33 = vld [vmem:[#allocation4 + $0x170] sm:$0xff]  ;;  %v4351_v36 = vld [vmem:[#allocation4 + $0x128] sm:$0xff] }
  0x62   :  { %480 = vmatpush1.msra.mxu0 %v4321_v25  ;;  %551 = vmatpush1.msra.mxu1 %v4323_v27  ;;  %5723 = vst [vmem:[#allocation92_spill] sm:$0xff] %v4347_v33  ;;  %5724 = vst [vmem:[#allocation93_spill] sm:$0xff] %v4351_v36  ;;  %v4353_v25 = vld [vmem:[#allocation4 + $0x138] sm:$0xff]  ;;  %v4357_v27 = vld [vmem:[#allocation4 + $0x120] sm:$0xff] }
  0x63   :  { %481 = vmatprep.subr.mxu0 %v4327_v37  ;;  %552 = vmatprep.subr.mxu1 %v4329_v28  ;;  %5725 = vst [vmem:[#allocation94_spill] sm:$0xff] %v4353_v25  ;;  %5726 = vst [vmem:[#allocation95_spill] sm:$0xff] %v4357_v27  ;;  %v4359_v37 = vld [vmem:[#allocation4 + $0x130] sm:$0xff]  ;;  %v4363_v28 = vld [vmem:[#allocation4 + $0xe8] sm:$0xff] }
  0x64   :  { %482 = vmatpush1.msra.mxu0 %v4333_v26  ;;  %553 = vmatpush1.msra.mxu1 %v4335_v31  ;;  %5727 = vst [vmem:[#allocation96_spill] sm:$0xff] %v4359_v37  ;;  %5728 = vst [vmem:[#allocation97_spill] sm:$0xff] %v4363_v28  ;;  %v4365_v26 = vld [vmem:[#allocation4 + $0xf8] sm:$0xff]  ;;  %v4369_v31 = vld [vmem:[#allocation4 + $0xe0] sm:$0xff] }
  0x65   :  { %483 = vmatprep.subr.mxu0 %v4339_v32  ;;  %554 = vmatprep.subr.mxu1 %v4341_v35  ;;  %5729 = vst [vmem:[#allocation98_spill] sm:$0xff] %v4365_v26  ;;  %5730 = vst [vmem:[#allocation99_spill] sm:$0xff] %v4369_v31  ;;  %v4371_v32 = vld [vmem:[#allocation4 + $0xf0] sm:$0xff]  ;;  %v4375_v35 = vld [vmem:[#allocation4 + $0xa8] sm:$0xff] }
  0x66   :  { %484 = vmatpush1.msra.mxu0 %v4345_v30  ;;  %555 = vmatpush1.msra.mxu1 %v4347_v33  ;;  %5731 = vst [vmem:[#allocation100_spill] sm:$0xff] %v4371_v32  ;;  %5732 = vst [vmem:[#allocation101_spill] sm:$0xff] %v4375_v35  ;;  %v4377_v30 = vld [vmem:[#allocation4 + $0xb8] sm:$0xff]  ;;  %v4381_v33 = vld [vmem:[#allocation4 + $0xa0] sm:$0xff] }
  0x67   :  { %485 = vmatprep.subr.mxu0 %v4351_v36  ;;  %556 = vmatprep.subr.mxu1 %v4353_v25  ;;  %5733 = vst [vmem:[#allocation102_spill] sm:$0xff] %v4377_v30  ;;  %5734 = vst [vmem:[#allocation103_spill] sm:$0xff] %v4381_v33  ;;  %v4383_v36 = vld [vmem:[#allocation4 + $0xb0] sm:$0xff]  ;;  %v4387_v25 = vld [vmem:[#allocation4 + $0x68] sm:$0xff] }
  0x68   :  { %486 = vmatpush1.msra.mxu0 %v4357_v27  ;;  %557 = vmatpush1.msra.mxu1 %v4359_v37  ;;  %5735 = vst [vmem:[#allocation104_spill] sm:$0xff] %v4383_v36  ;;  %5736 = vst [vmem:[#allocation105_spill] sm:$0xff] %v4387_v25  ;;  %v4389_v27 = vld [vmem:[#allocation4 + $0x78] sm:$0xff]  ;;  %v4393_v37 = vld [vmem:[#allocation4 + $0x60] sm:$0xff] }
  0x69   :  { %487 = vmatprep.subr.mxu0 %v4363_v28  ;;  %558 = vmatprep.subr.mxu1 %v4365_v26  ;;  %5737 = vst [vmem:[#allocation106_spill] sm:$0xff] %v4389_v27  ;;  %5738 = vst [vmem:[#allocation107_spill] sm:$0xff] %v4393_v37  ;;  %v4395_v28 = vld [vmem:[#allocation4 + $0x70] sm:$0xff]  ;;  %v4399_v26 = vld [vmem:[#allocation4 + $0x28] sm:$0xff] }
  0x6a   :  { %488 = vmatpush1.msra.mxu0 %v4369_v31  ;;  %559 = vmatpush1.msra.mxu1 %v4371_v32  ;;  %5739 = vst [vmem:[#allocation108_spill] sm:$0xff] %v4395_v28  ;;  %5740 = vst [vmem:[#allocation109_spill] sm:$0xff] %v4399_v26  ;;  %v4401_v31 = vld [vmem:[#allocation4 + $0x38] sm:$0xff]  ;;  %v4405_v32 = vld [vmem:[#allocation4 + $0x20] sm:$0xff] }
  0x6b   :  { %489 = vmatprep.subr.mxu0 %v4375_v35  ;;  %560 = vmatprep.subr.mxu1 %v4377_v30  ;;  %5741 = vst [vmem:[#allocation110_spill] sm:$0xff] %v4401_v31  ;;  %5742 = vst [vmem:[#allocation111_spill] sm:$0xff] %v4405_v32  ;;  %v4407_v35 = vld [vmem:[#allocation4 + $0x30] sm:$0xff]  ;;  %v4411_v30 = vld [vmem:[#allocation4 + $0x7e8] sm:$0xff] }
  0x6c   :  { %490 = vmatpush1.msra.mxu0 %v4381_v33  ;;  %561 = vmatpush1.msra.mxu1 %v4383_v36  ;;  %5743 = vst [vmem:[#allocation112_spill] sm:$0xff] %v4407_v35  ;;  %5744 = vst [vmem:[#allocation113_spill] sm:$0xff] %v4411_v30  ;;  %v4413_v33 = vld [vmem:[#allocation4 + $0x7f8] sm:$0xff]  ;;  %v4417_v36 = vld [vmem:[#allocation4 + $0x7e0] sm:$0xff] }
  0x6d   :  { %491 = vmatprep.subr.mxu0 %v4387_v25  ;;  %562 = vmatprep.subr.mxu1 %v4389_v27  ;;  %5745 = vst [vmem:[#allocation114_spill] sm:$0xff] %v4413_v33  ;;  %5746 = vst [vmem:[#allocation115_spill] sm:$0xff] %v4417_v36  ;;  %v4419_v25 = vld [vmem:[#allocation4 + $0x7f0] sm:$0xff]  ;;  %v4423_v27 = vld [vmem:[#allocation4 + $0x7a8] sm:$0xff] }
  0x6e   :  { %492 = vmatpush1.msra.mxu0 %v4393_v37  ;;  %563 = vmatpush1.msra.mxu1 %v4395_v28  ;;  %5747 = vst [vmem:[#allocation116_spill] sm:$0xff] %v4419_v25  ;;  %5748 = vst [vmem:[#allocation117_spill] sm:$0xff] %v4423_v27  ;;  %v4425_v37 = vld [vmem:[#allocation4 + $0x7b8] sm:$0xff]  ;;  %v4429_v28 = vld [vmem:[#allocation4 + $0x7a0] sm:$0xff] }
  0x6f   :  { %493 = vmatprep.subr.mxu0 %v4399_v26  ;;  %564 = vmatprep.subr.mxu1 %v4401_v31  ;;  %5749 = vst [vmem:[#allocation118_spill] sm:$0xff] %v4425_v37  ;;  %5750 = vst [vmem:[#allocation119_spill] sm:$0xff] %v4429_v28  ;;  %v4431_v26 = vld [vmem:[#allocation4 + $0x7b0] sm:$0xff]  ;;  %v4435_v31 = vld [vmem:[#allocation4 + $0x768] sm:$0xff] }
  0x70   :  { %494 = vmatpush1.msra.mxu0 %v4405_v32  ;;  %565 = vmatpush1.msra.mxu1 %v4407_v35  ;;  %5751 = vst [vmem:[#allocation120_spill] sm:$0xff] %v4431_v26  ;;  %5752 = vst [vmem:[#allocation121_spill] sm:$0xff] %v4435_v31  ;;  %v4437_v32 = vld [vmem:[#allocation4 + $0x778] sm:$0xff]  ;;  %v4441_v35 = vld [vmem:[#allocation4 + $0x760] sm:$0xff] }
  0x71   :  { %495 = vmatprep.subr.mxu0 %v4411_v30  ;;  %566 = vmatprep.subr.mxu1 %v4413_v33  ;;  %5753 = vst [vmem:[#allocation122_spill] sm:$0xff] %v4437_v32  ;;  %5754 = vst [vmem:[#allocation123_spill] sm:$0xff] %v4441_v35  ;;  %v4443_v30 = vld [vmem:[#allocation4 + $0x770] sm:$0xff]  ;;  %v4447_v33 = vld [vmem:[#allocation4 + $0x728] sm:$0xff] }
  0x72   :  { %496 = vmatpush2.msra.mxu0 %v4417_v36  ;;  %567 = vmatpush2.msra.mxu1 %v4419_v25  ;;  %5755 = vst [vmem:[#allocation124_spill] sm:$0xff] %v4443_v30  ;;  %5756 = vst [vmem:[#allocation125_spill] sm:$0xff] %v4447_v33  ;;  %v4449_v36 = vld [vmem:[#allocation4 + $0x738] sm:$0xff]  ;;  %v4453_v25 = vld [vmem:[#allocation4 + $0x720] sm:$0xff] }
  0x73   :  { %497 = vmatprep.subr.mxu0 %v4423_v27  ;;  %568 = vmatprep.subr.mxu1 %v4425_v37  ;;  %5757 = vst [vmem:[#allocation126_spill] sm:$0xff] %v4449_v36  ;;  %5758 = vst [vmem:[#allocation127_spill] sm:$0xff] %v4453_v25  ;;  %v4455_v27 = vld [vmem:[#allocation4 + $0x730] sm:$0xff]  ;;  %v4459_v37 = vld [vmem:[#allocation4 + $0x6e8] sm:$0xff] }
  0x74   :  { %498 = vmatpush2.msra.mxu0 %v4429_v28  ;;  %569 = vmatpush2.msra.mxu1 %v4431_v26  ;;  %5759 = vst [vmem:[#allocation128_spill] sm:$0xff] %v4455_v27  ;;  %5760 = vst [vmem:[#allocation129_spill] sm:$0xff] %v4459_v37  ;;  %v4461_v28 = vld [vmem:[#allocation4 + $0x6f8] sm:$0xff]  ;;  %v4465_v26 = vld [vmem:[#allocation4 + $0x6e0] sm:$0xff] }
  0x75   :  { %499 = vmatprep.subr.mxu0 %v4435_v31  ;;  %570 = vmatprep.subr.mxu1 %v4437_v32  ;;  %5761 = vst [vmem:[#allocation130_spill] sm:$0xff] %v4461_v28  ;;  %5762 = vst [vmem:[#allocation131_spill] sm:$0xff] %v4465_v26  ;;  %v4467_v31 = vld [vmem:[#allocation4 + $0x6f0] sm:$0xff]  ;;  %v4471_v32 = vld [vmem:[#allocation4 + $0x6a8] sm:$0xff] }
  0x76   :  { %500 = vmatpush2.msra.mxu0 %v4441_v35  ;;  %571 = vmatpush2.msra.mxu1 %v4443_v30  ;;  %5763 = vst [vmem:[#allocation132_spill] sm:$0xff] %v4467_v31  ;;  %5764 = vst [vmem:[#allocation133_spill] sm:$0xff] %v4471_v32  ;;  %v4473_v35 = vld [vmem:[#allocation4 + $0x6b8] sm:$0xff]  ;;  %v4477_v30 = vld [vmem:[#allocation4 + $0x6a0] sm:$0xff] }
  0x77   :  { %501 = vmatprep.subr.mxu0 %v4447_v33  ;;  %572 = vmatprep.subr.mxu1 %v4449_v36  ;;  %5765 = vst [vmem:[#allocation134_spill] sm:$0xff] %v4473_v35  ;;  %5766 = vst [vmem:[#allocation135_spill] sm:$0xff] %v4477_v30  ;;  %v4479_v33 = vld [vmem:[#allocation4 + $0x6b0] sm:$0xff]  ;;  %v4483_v36 = vld [vmem:[#allocation4 + $0x668] sm:$0xff] }
  0x78   :  { %502 = vmatpush2.msra.mxu0 %v4453_v25  ;;  %573 = vmatpush2.msra.mxu1 %v4455_v27  ;;  %5767 = vst [vmem:[#allocation136_spill] sm:$0xff] %v4479_v33  ;;  %5768 = vst [vmem:[#allocation137_spill] sm:$0xff] %v4483_v36  ;;  %v4485_v25 = vld [vmem:[#allocation4 + $0x678] sm:$0xff]  ;;  %v4489_v27 = vld [vmem:[#allocation4 + $0x660] sm:$0xff] }
  0x79   :  { %503 = vmatprep.subr.mxu0 %v4459_v37  ;;  %574 = vmatprep.subr.mxu1 %v4461_v28  ;;  %5769 = vst [vmem:[#allocation138_spill] sm:$0xff] %v4485_v25  ;;  %5770 = vst [vmem:[#allocation139_spill] sm:$0xff] %v4489_v27  ;;  %v4491_v37 = vld [vmem:[#allocation4 + $0x670] sm:$0xff]  ;;  %v4495_v28 = vld [vmem:[#allocation4 + $0x628] sm:$0xff] }
  0x7a   :  { %504 = vmatpush2.msra.mxu0 %v4465_v26  ;;  %575 = vmatpush2.msra.mxu1 %v4467_v31  ;;  %5771 = vst [vmem:[#allocation140_spill] sm:$0xff] %v4491_v37  ;;  %5772 = vst [vmem:[#allocation141_spill] sm:$0xff] %v4495_v28  ;;  %v4497_v26 = vld [vmem:[#allocation4 + $0x638] sm:$0xff]  ;;  %v4501_v31 = vld [vmem:[#allocation4 + $0x620] sm:$0xff] }
  0x7b   :  { %505 = vmatprep.subr.mxu0 %v4471_v32  ;;  %576 = vmatprep.subr.mxu1 %v4473_v35  ;;  %5773 = vst [vmem:[#allocation142_spill] sm:$0xff] %v4497_v26  ;;  %5774 = vst [vmem:[#allocation143_spill] sm:$0xff] %v4501_v31  ;;  %v4503_v32 = vld [vmem:[#allocation4 + $0x630] sm:$0xff]  ;;  %v4507_v35 = vld [vmem:[#allocation4 + $0x5e8] sm:$0xff] }
  0x7c   :  { %506 = vmatpush2.msra.mxu0 %v4477_v30  ;;  %577 = vmatpush2.msra.mxu1 %v4479_v33  ;;  %5775 = vst [vmem:[#allocation144_spill] sm:$0xff] %v4503_v32  ;;  %5776 = vst [vmem:[#allocation145_spill] sm:$0xff] %v4507_v35  ;;  %v4509_v30 = vld [vmem:[#allocation4 + $0x5f8] sm:$0xff]  ;;  %v4513_v33 = vld [vmem:[#allocation4 + $0x5e0] sm:$0xff] }
  0x7d   :  { %507 = vmatprep.subr.mxu0 %v4483_v36  ;;  %578 = vmatprep.subr.mxu1 %v4485_v25  ;;  %5777 = vst [vmem:[#allocation146_spill] sm:$0xff] %v4509_v30  ;;  %5778 = vst [vmem:[#allocation147_spill] sm:$0xff] %v4513_v33  ;;  %v4515_v36 = vld [vmem:[#allocation4 + $0x5f0] sm:$0xff]  ;;  %v4519_v25 = vld [vmem:[#allocation4 + $0x5a8] sm:$0xff] }
  0x7e   :  { %508 = vmatpush2.msra.mxu0 %v4489_v27  ;;  %579 = vmatpush2.msra.mxu1 %v4491_v37  ;;  %5779 = vst [vmem:[#allocation148_spill] sm:$0xff] %v4515_v36  ;;  %5780 = vst [vmem:[#allocation149_spill] sm:$0xff] %v4519_v25  ;;  %v4521_v27 = vld [vmem:[#allocation4 + $0x5b8] sm:$0xff]  ;;  %v4525_v37 = vld [vmem:[#allocation4 + $0x5a0] sm:$0xff] }
  0x7f   :  { %509 = vmatprep.subr.mxu0 %v4495_v28  ;;  %580 = vmatprep.subr.mxu1 %v4497_v26  ;;  %5781 = vst [vmem:[#allocation150_spill] sm:$0xff] %v4521_v27  ;;  %5782 = vst [vmem:[#allocation151_spill] sm:$0xff] %v4525_v37  ;;  %v4527_v28 = vld [vmem:[#allocation4 + $0x5b0] sm:$0xff]  ;;  %v4531_v26 = vld [vmem:[#allocation4 + $0x568] sm:$0xff] }
  0x80   :  { %510 = vmatpush2.msra.mxu0 %v4501_v31  ;;  %581 = vmatpush2.msra.mxu1 %v4503_v32  ;;  %5783 = vst [vmem:[#allocation152_spill] sm:$0xff] %v4527_v28  ;;  %5784 = vst [vmem:[#allocation153_spill] sm:$0xff] %v4531_v26  ;;  %v4533_v31 = vld [vmem:[#allocation4 + $0x578] sm:$0xff]  ;;  %v4537_v32 = vld [vmem:[#allocation4 + $0x560] sm:$0xff] }
  0x81   :  { %511 = vmatprep.subr.mxu0 %v4507_v35  ;;  %582 = vmatprep.subr.mxu1 %v4509_v30  ;;  %5785 = vst [vmem:[#allocation154_spill] sm:$0xff] %v4533_v31  ;;  %5786 = vst [vmem:[#allocation155_spill] sm:$0xff] %v4537_v32  ;;  %v4539_v35 = vld [vmem:[#allocation4 + $0x570] sm:$0xff]  ;;  %v4543_v30 = vld [vmem:[#allocation4 + $0x528] sm:$0xff] }
  0x82   :  { %512 = vmatpush2.msra.mxu0 %v4513_v33  ;;  %583 = vmatpush2.msra.mxu1 %v4515_v36  ;;  %5787 = vst [vmem:[#allocation156_spill] sm:$0xff] %v4539_v35  ;;  %5788 = vst [vmem:[#allocation157_spill] sm:$0xff] %v4543_v30  ;;  %v4545_v33 = vld [vmem:[#allocation4 + $0x538] sm:$0xff]  ;;  %v4549_v36 = vld [vmem:[#allocation4 + $0x520] sm:$0xff] }
  0x83   :  { %513 = vmatprep.subr.mxu0 %v4519_v25  ;;  %584 = vmatprep.subr.mxu1 %v4521_v27  ;;  %5789 = vst [vmem:[#allocation158_spill] sm:$0xff] %v4545_v33  ;;  %5790 = vst [vmem:[#allocation159_spill] sm:$0xff] %v4549_v36  ;;  %v4551_v25 = vld [vmem:[#allocation4 + $0x530] sm:$0xff]  ;;  %v4555_v27 = vld [vmem:[#allocation4 + $0x4e8] sm:$0xff] }
  0x84   :  { %514 = vmatpush2.msra.mxu0 %v4525_v37  ;;  %585 = vmatpush2.msra.mxu1 %v4527_v28  ;;  %5791 = vst [vmem:[#allocation160_spill] sm:$0xff] %v4551_v25  ;;  %5792 = vst [vmem:[#allocation161_spill] sm:$0xff] %v4555_v27  ;;  %v4557_v37 = vld [vmem:[#allocation4 + $0x4f8] sm:$0xff]  ;;  %v4561_v28 = vld [vmem:[#allocation4 + $0x4e0] sm:$0xff] }
  0x85   :  { %515 = vmatprep.subr.mxu0 %v4531_v26  ;;  %586 = vmatprep.subr.mxu1 %v4533_v31  ;;  %5793 = vst [vmem:[#allocation162_spill] sm:$0xff] %v4557_v37  ;;  %5794 = vst [vmem:[#allocation163_spill] sm:$0xff] %v4561_v28  ;;  %v4563_v26 = vld [vmem:[#allocation4 + $0x4f0] sm:$0xff]  ;;  %v4567_v31 = vld [vmem:[#allocation4 + $0x4a8] sm:$0xff] }
  0x86   :  { %516 = vmatpush2.msra.mxu0 %v4537_v32  ;;  %587 = vmatpush2.msra.mxu1 %v4539_v35  ;;  %5795 = vst [vmem:[#allocation164_spill] sm:$0xff] %v4563_v26  ;;  %v4569_v32 = vld [vmem:[#allocation4 + $0x4b8] sm:$0xff]  ;;  %v4573_v35 = vld [vmem:[#allocation4 + $0x4a0] sm:$0xff] }
  0x87   :  { %517 = vmatprep.subr.mxu0 %v4543_v30  ;;  %588 = vmatprep.subr.mxu1 %v4545_v33  ;;  %5796 = vst [vmem:[#allocation165_spill] sm:$0xff] %v4569_v32  ;;  %v4575_v30 = vld [vmem:[#allocation4 + $0x4b0] sm:$0xff]  ;;  %v4579_v33 = vld [vmem:[#allocation4 + $0x468] sm:$0xff] }
  0x88   :  { %518 = vmatpush2.msra.mxu0 %v4549_v36  ;;  %589 = vmatpush2.msra.mxu1 %v4551_v25  ;;  %5797 = vst [vmem:[#allocation166_spill] sm:$0xff] %v4575_v30  ;;  %5798 = vst [vmem:[#allocation167_spill] sm:$0xff] %v4579_v33  ;;  %v4581_v36 = vld [vmem:[#allocation4 + $0x478] sm:$0xff]  ;;  %v4585_v25 = vld [vmem:[#allocation4 + $0x460] sm:$0xff] }
  0x89   :  { %519 = vmatprep.subr.mxu0 %v4555_v27  ;;  %590 = vmatprep.subr.mxu1 %v4557_v37  ;;  %5799 = vst [vmem:[#allocation168_spill] sm:$0xff] %v4581_v36  ;;  %5800 = vst [vmem:[#allocation169_spill] sm:$0xff] %v4585_v25  ;;  %v4587_v27 = vld [vmem:[#allocation4 + $0x470] sm:$0xff]  ;;  %v4591_v37 = vld [vmem:[#allocation4 + $0x428] sm:$0xff] }
  0x8a   :  { %520 = vmatpush2.msra.mxu0 %v4561_v28  ;;  %591 = vmatpush2.msra.mxu1 %v4563_v26  ;;  %5801 = vst [vmem:[#allocation170_spill] sm:$0xff] %v4587_v27  ;;  %5802 = vst [vmem:[#allocation171_spill] sm:$0xff] %v4591_v37  ;;  %v4593_v28 = vld [vmem:[#allocation4 + $0x438] sm:$0xff]  ;;  %v4597_v26 = vld [vmem:[#allocation4 + $0x420] sm:$0xff] }
  0x8b   :  { %521 = vmatprep.subr.mxu0 %v4567_v31  ;;  %592 = vmatprep.subr.mxu1 %v4569_v32  ;;  %5803 = vst [vmem:[#allocation172_spill] sm:$0xff] %v4593_v28  ;;  %5804 = vst [vmem:[#allocation173_spill] sm:$0xff] %v4597_v26  ;;  %v4601_v32 = vld [vmem:[#allocation4 + $0x430] sm:$0xff] }
  0x8c   :  { %522 = vmatpush2.msra.mxu0 %v4573_v35  ;;  %593 = vmatpush2.msra.mxu1 %v4575_v30  ;;  %5805 = vst [vmem:[#allocation174_spill] sm:$0xff] %v4601_v32  ;;  %v3794_v30 = vld [vmem:[#allocation4 + $0x350] sm:$0xff] }
  0x8d   :  { %523 = vmatprep.subr.mxu0 %v4579_v33  ;;  %594 = vmatprep.subr.mxu1 %v4581_v36  ;;  %v3788_v36 = vld [vmem:[#allocation4 + $0x398] sm:$0xff]  ;;  %v3789_v33 = vld [vmem:[#allocation4 + $0x380] sm:$0xff] }
  0x8e   :  { %524 = vmatpush2.msra.mxu0 %v4585_v25  ;;  %595 = vmatpush2.msra.mxu1 %v4587_v27  ;;  %v3786_v27 = vld [vmem:[#allocation4 + $0x3d0] sm:$0xff]  ;;  %v3787_v25 = vld [vmem:[#allocation4 + $0x388] sm:$0xff] }
  0x8f   :  { %525 = vmatprep.subr.mxu0 %v4591_v37  ;;  %596 = vmatprep.subr.mxu1 %v4593_v28  ;;  %v5628_v28 = vmov 0.0   ;;  %v3784_v37 = vld [vmem:[#allocation4 + $0x3d8] sm:$0xff] }
  0x90   :  { %526 = vmatpush2.msra.mxu0 %v4597_v26  ;;  %527 = vmatprep.mubr.f32.mxu0 %v4205_v29  ;;  %v4618_v26 = vld [vmem:[%s5458_s2] sm:$0xf] }
  0x91   :  { %597 = vmatpush2.msra.mxu1 %v4601_v32  ;;  %598 = vmatprep.mubr.f32.mxu1 %v4205_v29  ;;  %5806 = vst [vmem:[#allocation175_spill] sm:$0xff] %v4618_v26  ;;  %v4623_v32 = vld [vmem:[%s5458_s2 + $0x4] sm:$0xf] }
  0x92   :  { %528 = vmatmul.mubr.f32.vlgmr.msra.gmra.mxu0 %v4183_v34  ;;  %599 = vmatmul.mubr.f32.vlgmr.msra.gmra.mxu1 %v4183_v34  ;;  %5807 = vst [vmem:[#allocation176_spill] sm:$0xff] %v4623_v32 }
  0x93   :  { %3582 = vmatprep.subr.msk.mxu0 %vm634_vm0, %v4205_v29  ;;  %3585 = vmatprep.subr.msk.mxu1 %vm634_vm0, %v4205_v29 }
  0x94   :  { %3583 = vmatpush1.msk.msra.mxu0 %vm634_vm0, %v4183_v34  ;;  %703 = vmatprep.mubr.f32.mxu0 %v5628_v28 }
  0x95   :  { %3586 = vmatpush1.msk.msra.mxu1 %vm634_vm0, %v4183_v34  ;;  %782 = vmatprep.mubr.f32.mxu1 %v5628_v28  ;;  %v4646_v28 = vld [vmem:[%s5458_s2 + $0x8] sm:$0xf] }
  0x96   :  { %3584 = vmatmul.mubr.msk.f32.vlgmr.msra.gmra.mxu0 %vm630_vm1, %v4618_v26  ;;  %3587 = vmatmul.mubr.msk.f32.vlgmr.msra.gmra.mxu1 %vm630_vm1, %v4623_v32  ;;  %5808 = vst [vmem:[#allocation177_spill] sm:$0xff] %v4646_v28  ;;  %v4651_v32 = vld [vmem:[%s5458_s2 + $0xc] sm:$0xf]  ;;  %v5810_v26 = vmov 0.0  }
  0x97   :  { %3588 = vmatprep.subr.msk.mxu0 %vm634_vm0, %v4205_v29  ;;  %3591 = vmatprep.subr.msk.mxu1 %vm634_vm0, %v4205_v29  ;;  %5809 = vst [vmem:[#allocation178_spill] sm:$0xff] %v4651_v32  ;;  %v3783_v29 = vld [vmem:[#allocation4 + $0x3c8] sm:$0xff] }
  0x98   :  { %3589 = vmatpush1.msk.msra.mxu0 %vm634_vm0, %v4183_v34  ;;  %3592 = vmatpush1.msk.msra.mxu1 %vm634_vm0, %v4183_v34  ;;  %v3785_v34 = vld [vmem:[#allocation4 + $0x3c0] sm:$0xff] }
  0x99   :  { %861 = vmatprep.mubr.f32.mxu0 %v5810_v26  ;;  %940 = vmatprep.mubr.f32.mxu1 %v5810_v26  ;;  %v3790_v26 = vld [vmem:[#allocation4 + $0x390] sm:$0xff] }
  0x9a   :  { %956 = vmatprep.subr.mxu0 %v3783_v29  ;;  %1027 = vmatprep.subr.mxu1 %v3784_v37  ;;  %v3791_v29 = vld [vmem:[#allocation4 + $0x348] sm:$0xff]  ;;  %v3792_v37 = vld [vmem:[#allocation4 + $0x358] sm:$0xff] }
  0x9b   :  { %3590 = vmatmul.mubr.msk.f32.vlgmr.msra.gmra.mxu0 %vm630_vm1, %v4646_v28  ;;  %3593 = vmatmul.mubr.msk.f32.vlgmr.msra.gmra.mxu1 %vm630_vm1, %v4651_v32  ;;  %v3793_v28 = vld [vmem:[#allocation4 + $0x340] sm:$0xff]  ;;  %v3795_v32 = vld [vmem:[#allocation4 + $0x308] sm:$0xff] }
  0x9c   :  { %957 = vmatpush1.msra.mxu0 %v3785_v34  ;;  %1028 = vmatpush1.msra.mxu1 %v3786_v27  ;;  %v3796_v34 = vld [vmem:[#allocation4 + $0x318] sm:$0xff]  ;;  %v3797_v27 = vld [vmem:[#allocation4 + $0x300] sm:$0xff] }
  0x9d   :  { %958 = vmatprep.subr.mxu0 %v3787_v25  ;;  %1029 = vmatprep.subr.mxu1 %v3788_v36  ;;  %v3798_v25 = vld [vmem:[#allocation4 + $0x310] sm:$0xff]  ;;  %v3799_v36 = vld [vmem:[#allocation4 + $0x2c8] sm:$0xff] }
  0x9e   :  { %959 = vmatpush1.msra.mxu0 %v3789_v33  ;;  %1030 = vmatpush1.msra.mxu1 %v3790_v26  ;;  %v3800_v33 = vld [vmem:[#allocation4 + $0x2d8] sm:$0xff]  ;;  %v3801_v26 = vld [vmem:[#allocation4 + $0x2c0] sm:$0xff] }
  0x9f   :  { %960 = vmatprep.subr.mxu0 %v3791_v29  ;;  %1031 = vmatprep.subr.mxu1 %v3792_v37  ;;  %v3802_v29 = vld [vmem:[#allocation4 + $0x2d0] sm:$0xff]  ;;  %v3803_v37 = vld [vmem:[#allocation4 + $0x288] sm:$0xff] }
  0xa0   :  { %961 = vmatpush1.msra.mxu0 %v3793_v28  ;;  %1032 = vmatpush1.msra.mxu1 %v3794_v30  ;;  %v3804_v28 = vld [vmem:[#allocation4 + $0x298] sm:$0xff]  ;;  %v3805_v30 = vld [vmem:[#allocation4 + $0x280] sm:$0xff] }
  0xa1   :  { %962 = vmatprep.subr.mxu0 %v3795_v32  ;;  %1033 = vmatprep.subr.mxu1 %v3796_v34  ;;  %v3806_v32 = vld [vmem:[#allocation4 + $0x290] sm:$0xff]  ;;  %v3807_v34 = vld [vmem:[#allocation4 + $0x248] sm:$0xff] }
  0xa2   :  { %963 = vmatpush1.msra.mxu0 %v3797_v27  ;;  %1034 = vmatpush1.msra.mxu1 %v3798_v25  ;;  %v3808_v27 = vld [vmem:[#allocation4 + $0x258] sm:$0xff]  ;;  %v3809_v25 = vld [vmem:[#allocation4 + $0x240] sm:$0xff] }
  0xa3   :  { %964 = vmatprep.subr.mxu0 %v3799_v36  ;;  %1035 = vmatprep.subr.mxu1 %v3800_v33  ;;  %v3810_v36 = vld [vmem:[#allocation4 + $0x250] sm:$0xff]  ;;  %v3811_v33 = vld [vmem:[#allocation4 + $0x208] sm:$0xff] }
  0xa4   :  { %965 = vmatpush1.msra.mxu0 %v3801_v26  ;;  %1036 = vmatpush1.msra.mxu1 %v3802_v29  ;;  %v3812_v26 = vld [vmem:[#allocation4 + $0x218] sm:$0xff]  ;;  %v3813_v29 = vld [vmem:[#allocation4 + $0x200] sm:$0xff] }
  0xa5   :  { %966 = vmatprep.subr.mxu0 %v3803_v37  ;;  %1037 = vmatprep.subr.mxu1 %v3804_v28  ;;  %v3814_v37 = vld [vmem:[#allocation4 + $0x210] sm:$0xff]  ;;  %v3815_v28 = vld [vmem:[#allocation4 + $0x1c8] sm:$0xff] }
  0xa6   :  { %967 = vmatpush1.msra.mxu0 %v3805_v30  ;;  %1038 = vmatpush1.msra.mxu1 %v3806_v32  ;;  %v3816_v30 = vld [vmem:[#allocation4 + $0x1d8] sm:$0xff]  ;;  %v3817_v32 = vld [vmem:[#allocation4 + $0x1c0] sm:$0xff] }
  0xa7   :  { %968 = vmatprep.subr.mxu0 %v3807_v34  ;;  %1039 = vmatprep.subr.mxu1 %v3808_v27  ;;  %v3818_v34 = vld [vmem:[#allocation4 + $0x1d0] sm:$0xff]  ;;  %v3819_v27 = vld [vmem:[#allocation4 + $0x188] sm:$0xff] }
  0xa8   :  { %969 = vmatpush1.msra.mxu0 %v3809_v25  ;;  %1040 = vmatpush1.msra.mxu1 %v3810_v36  ;;  %v3820_v25 = vld [vmem:[#allocation4 + $0x198] sm:$0xff] }
  0xa9   :  { %970 = vmatprep.subr.mxu0 %v3811_v33  ;;  %1041 = vmatprep.subr.mxu1 %v3812_v26  ;;  %v5858_v36 = vld [vmem:[#allocation57_spill] sm:$0xff]  ;;  %v5859_v33 = vld [vmem:[#allocation58_spill] sm:$0xff]  ;;  %v5860_v26 = vld [vmem:[#allocation59_spill] sm:$0xff] }
  0xaa   :  { %971 = vmatpush1.msra.mxu0 %v3813_v29  ;;  %1042 = vmatpush1.msra.mxu1 %v3814_v37  ;;  %v5861_v29 = vld [vmem:[#allocation60_spill] sm:$0xff]  ;;  %v5862_v37 = vld [vmem:[#allocation61_spill] sm:$0xff] }
  0xab   :  { %972 = vmatprep.subr.mxu0 %v3815_v28  ;;  %1043 = vmatprep.subr.mxu1 %v3816_v30  ;;  %v5863_v28 = vld [vmem:[#allocation62_spill] sm:$0xff]  ;;  %v5864_v30 = vld [vmem:[#allocation63_spill] sm:$0xff] }
  0xac   :  { %973 = vmatpush1.msra.mxu0 %v3817_v32  ;;  %1044 = vmatpush1.msra.mxu1 %v3818_v34  ;;  %v5865_v32 = vld [vmem:[#allocation64_spill] sm:$0xff]  ;;  %v5866_v34 = vld [vmem:[#allocation65_spill] sm:$0xff] }
  0xad   :  { %974 = vmatprep.subr.mxu0 %v3819_v27  ;;  %1045 = vmatprep.subr.mxu1 %v3820_v25  ;;  %v5867_v27 = vld [vmem:[#allocation66_spill] sm:$0xff]  ;;  %v5868_v25 = vld [vmem:[#allocation67_spill] sm:$0xff] }
  0xae   :  { %975 = vmatpush1.msra.mxu0 %v3940_v38  ;;  %1046 = vmatpush1.msra.mxu1 %v3942_v39  ;;  %v5811_v38 = vld [vmem:[#allocation10_spill] sm:$0xff]  ;;  %v5812_v39 = vld [vmem:[#allocation11_spill] sm:$0xff] }
  0xaf   :  { %976 = vmatprep.subr.mxu0 %v3944_v40  ;;  %1047 = vmatprep.subr.mxu1 %v3946_v41  ;;  %v5813_v40 = vld [vmem:[#allocation12_spill] sm:$0xff]  ;;  %v5814_v41 = vld [vmem:[#allocation13_spill] sm:$0xff] }
  0xb0   :  { %977 = vmatpush1.msra.mxu0 %v3948_v42  ;;  %1048 = vmatpush1.msra.mxu1 %v3950_v43  ;;  %v5815_v42 = vld [vmem:[#allocation14_spill] sm:$0xff]  ;;  %v5816_v43 = vld [vmem:[#allocation15_spill] sm:$0xff] }
  0xb1   :  { %978 = vmatprep.subr.mxu0 %v3954_v44  ;;  %1049 = vmatprep.subr.mxu1 %v3956_v45  ;;  %v5817_v44 = vld [vmem:[#allocation16_spill] sm:$0xff]  ;;  %v5818_v45 = vld [vmem:[#allocation17_spill] sm:$0xff] }
  0xb2   :  { %979 = vmatpush1.msra.mxu0 %v3960_v46  ;;  %1050 = vmatpush1.msra.mxu1 %v3962_v47  ;;  %v5819_v46 = vld [vmem:[#allocation18_spill] sm:$0xff]  ;;  %v5820_v47 = vld [vmem:[#allocation19_spill] sm:$0xff] }
  0xb3   :  { %980 = vmatprep.subr.mxu0 %v3966_v48  ;;  %1051 = vmatprep.subr.mxu1 %v3968_v49  ;;  %v5821_v48 = vld [vmem:[#allocation20_spill] sm:$0xff]  ;;  %v5822_v49 = vld [vmem:[#allocation21_spill] sm:$0xff] }
  0xb4   :  { %981 = vmatpush1.msra.mxu0 %v3972_v50  ;;  %1052 = vmatpush1.msra.mxu1 %v3974_v51  ;;  %v5823_v50 = vld [vmem:[#allocation22_spill] sm:$0xff]  ;;  %v5824_v51 = vld [vmem:[#allocation23_spill] sm:$0xff] }
  0xb5   :  { %982 = vmatprep.subr.mxu0 %v3978_v52  ;;  %1053 = vmatprep.subr.mxu1 %v3980_v53  ;;  %v5825_v52 = vld [vmem:[#allocation24_spill] sm:$0xff]  ;;  %v5826_v53 = vld [vmem:[#allocation25_spill] sm:$0xff] }
  0xb6   :  { %983 = vmatpush1.msra.mxu0 %v3984_v54  ;;  %1054 = vmatpush1.msra.mxu1 %v3986_v55  ;;  %v5827_v54 = vld [vmem:[#allocation26_spill] sm:$0xff]  ;;  %v5828_v55 = vld [vmem:[#allocation27_spill] sm:$0xff] }
  0xb7   :  { %984 = vmatprep.subr.mxu0 %v3990_v56  ;;  %1055 = vmatprep.subr.mxu1 %v3992_v57  ;;  %v5829_v56 = vld [vmem:[#allocation28_spill] sm:$0xff]  ;;  %v5830_v57 = vld [vmem:[#allocation29_spill] sm:$0xff] }
  0xb8   :  { %985 = vmatpush1.msra.mxu0 %v3996_v58  ;;  %1056 = vmatpush1.msra.mxu1 %v3998_v59  ;;  %v5831_v58 = vld [vmem:[#allocation30_spill] sm:$0xff]  ;;  %v5832_v59 = vld [vmem:[#allocation31_spill] sm:$0xff] }
  0xb9   :  { %986 = vmatprep.subr.mxu0 %v4002_v60  ;;  %1057 = vmatprep.subr.mxu1 %v4004_v61  ;;  %v5833_v60 = vld [vmem:[#allocation32_spill] sm:$0xff]  ;;  %v5834_v61 = vld [vmem:[#allocation33_spill] sm:$0xff] }
  0xba   :  { %987 = vmatpush1.msra.mxu0 %v4008_v62  ;;  %1058 = vmatpush1.msra.mxu1 %v4010_v63  ;;  %v5835_v62 = vld [vmem:[#allocation34_spill] sm:$0xff]  ;;  %v4738_v63 = vld [vmem:[%s5456_s0 + $0x8] sm:$0xff] }
  0xbb   :  { %988 = vmatprep.subr.mxu0 %v4014_v0  ;;  %1059 = vmatprep.subr.mxu1 %v4016_v1  ;;  %v5836_v0 = vld [vmem:[#allocation35_spill] sm:$0xff]  ;;  %v5837_v1 = vld [vmem:[#allocation36_spill] sm:$0xff] }
  0xbc   :  { %989 = vmatpush2.msra.mxu0 %v4020_v2  ;;  %1060 = vmatpush2.msra.mxu1 %v4022_v3  ;;  %v5838_v2 = vld [vmem:[#allocation37_spill] sm:$0xff]  ;;  %v5839_v3 = vld [vmem:[#allocation38_spill] sm:$0xff] }
  0xbd   :  { %990 = vmatprep.subr.mxu0 %v4026_v4  ;;  %1061 = vmatprep.subr.mxu1 %v4028_v5  ;;  %v5840_v4 = vld [vmem:[#allocation39_spill] sm:$0xff]  ;;  %v5841_v5 = vld [vmem:[#allocation40_spill] sm:$0xff] }
  0xbe   :  { %991 = vmatpush2.msra.mxu0 %v4032_v6  ;;  %1062 = vmatpush2.msra.mxu1 %v4034_v7  ;;  %v4748_v6 = vcombine.high %v4738_v63, %v4738_v63  ;;  %v5842_v7 = vld [vmem:[#allocation41_spill] sm:$0xff] }
  0xbf   :  { %992 = vmatprep.subr.mxu0 %v4038_v8  ;;  %1063 = vmatprep.subr.mxu1 %v4040_v9  ;;  %v5843_v8 = vld [vmem:[#allocation42_spill] sm:$0xff]  ;;  %v5844_v9 = vld [vmem:[#allocation43_spill] sm:$0xff] }
  0xc0   :  { %993 = vmatpush2.msra.mxu0 %v4044_v10  ;;  %1064 = vmatpush2.msra.mxu1 %v4046_v11  ;;  %v5845_v10 = vld [vmem:[#allocation44_spill] sm:$0xff]  ;;  %v5846_v11 = vld [vmem:[#allocation45_spill] sm:$0xff] }
  0xc1   :  { %994 = vmatprep.subr.mxu0 %v4050_v12  ;;  %1065 = vmatprep.subr.mxu1 %v4052_v13  ;;  %v5847_v12 = vld [vmem:[#allocation46_spill] sm:$0xff]  ;;  %v5848_v13 = vld [vmem:[#allocation47_spill] sm:$0xff] }
  0xc2   :  { %995 = vmatpush2.msra.mxu0 %v4056_v14  ;;  %1066 = vmatpush2.msra.mxu1 %v4058_v15  ;;  %v5849_v14 = vld [vmem:[#allocation48_spill] sm:$0xff]  ;;  %v5850_v15 = vld [vmem:[#allocation49_spill] sm:$0xff] }
  0xc3   :  { %996 = vmatprep.subr.mxu0 %v4062_v16  ;;  %1067 = vmatprep.subr.mxu1 %v4064_v17  ;;  %v316_v16 = vld [vmem:[%s5459_s3] sm:$0xf] }
  0xc4   :  { %997 = vmatpush2.msra.mxu0 %v4068_v18  ;;  %1068 = vmatpush2.msra.mxu1 %v4070_v19  ;;  %v5851_v17 = vld [vmem:[#allocation50_spill] sm:$0xff]  ;;  %v3869_v18 = vmov 0   ;;  %v5852_v19 = vld [vmem:[#allocation51_spill] sm:$0xff] }
  0xc5   :  { %998 = vmatprep.subr.mxu0 %v4074_v20  ;;  %1069 = vmatprep.subr.mxu1 %v4076_v21  ;;  %v5853_v20 = vld [vmem:[#allocation52_spill] sm:$0xff]  ;;  %v5854_v21 = vld [vmem:[#allocation53_spill] sm:$0xff] }
  0xc6   :  { %999 = vmatpush2.msra.mxu0 %v4080_v22  ;;  %1070 = vmatpush2.msra.mxu1 %v4082_v23  ;;  %v5855_v22 = vld [vmem:[#allocation54_spill] sm:$0xff]  ;;  %v5856_v23 = vld [vmem:[#allocation55_spill] sm:$0xff] }
  0xc7   :  { %1000 = vmatprep.subr.mxu0 %v4086_v24  ;;  %1071 = vmatprep.subr.mxu1 %v5811_v38  ;;  %v5857_v24 = vld [vmem:[#allocation56_spill] sm:$0xff] }
  0xc8   :  { %1001 = vmatpush2.msra.mxu0 %v5812_v39  ;;  %1072 = vmatpush2.msra.mxu1 %v5813_v40  ;;  %v5869_v38 = vld [vmem:[#allocation68_spill] sm:$0xff]  ;;  %v5870_v39 = vld [vmem:[#allocation69_spill] sm:$0xff]  ;;  %v5871_v40 = vld [vmem:[#allocation70_spill] sm:$0xff] }
  0xc9   :  { %1002 = vmatprep.subr.mxu0 %v5814_v41  ;;  %1073 = vmatprep.subr.mxu1 %v5815_v42  ;;  %v5872_v41 = vld [vmem:[#allocation71_spill] sm:$0xff]  ;;  %v5873_v42 = vld [vmem:[#allocation72_spill] sm:$0xff] }
  0xca   :  { %1003 = vmatpush2.msra.mxu0 %v5816_v43  ;;  %1074 = vmatpush2.msra.mxu1 %v5817_v44  ;;  %v5874_v43 = vld [vmem:[#allocation73_spill] sm:$0xff]  ;;  %v5875_v44 = vld [vmem:[#allocation74_spill] sm:$0xff] }
  0xcb   :  { %1004 = vmatprep.subr.mxu0 %v5818_v45  ;;  %1075 = vmatprep.subr.mxu1 %v5819_v46  ;;  %v5876_v45 = vld [vmem:[#allocation75_spill] sm:$0xff]  ;;  %v5877_v46 = vld [vmem:[#allocation76_spill] sm:$0xff] }
  0xcc   :  { %1005 = vmatpush2.msra.mxu0 %v5820_v47  ;;  %1076 = vmatpush2.msra.mxu1 %v5821_v48  ;;  %v5878_v47 = vld [vmem:[#allocation77_spill] sm:$0xff]  ;;  %v5879_v48 = vld [vmem:[#allocation78_spill] sm:$0xff] }
  0xcd   :  { %1006 = vmatprep.subr.mxu0 %v5822_v49  ;;  %1077 = vmatprep.subr.mxu1 %v5823_v50  ;;  %v5880_v49 = vld [vmem:[#allocation79_spill] sm:$0xff]  ;;  %v5881_v50 = vld [vmem:[#allocation80_spill] sm:$0xff] }
  0xce   :  { %1007 = vmatpush2.msra.mxu0 %v5824_v51  ;;  %1078 = vmatpush2.msra.mxu1 %v5825_v52  ;;  %v5882_v51 = vld [vmem:[#allocation81_spill] sm:$0xff]  ;;  %v5883_v52 = vld [vmem:[#allocation82_spill] sm:$0xff] }
  0xcf   :  { %1008 = vmatprep.subr.mxu0 %v5826_v53  ;;  %1079 = vmatprep.subr.mxu1 %v5827_v54  ;;  %v5884_v53 = vld [vmem:[#allocation83_spill] sm:$0xff]  ;;  %v5885_v54 = vld [vmem:[#allocation84_spill] sm:$0xff] }
  0xd0   :  { %1009 = vmatpush2.msra.mxu0 %v5828_v55  ;;  %1080 = vmatpush2.msra.mxu1 %v5829_v56  ;;  %v5886_v55 = vld [vmem:[#allocation85_spill] sm:$0xff]  ;;  %v5887_v56 = vld [vmem:[#allocation86_spill] sm:$0xff] }
  0xd1   :  { %1010 = vmatprep.subr.mxu0 %v5830_v57  ;;  %1081 = vmatprep.subr.mxu1 %v5831_v58  ;;  %v5888_v57 = vld [vmem:[#allocation87_spill] sm:$0xff]  ;;  %v5889_v58 = vld [vmem:[#allocation88_spill] sm:$0xff] }
  0xd2   :  { %1011 = vmatpush2.msra.mxu0 %v5832_v59  ;;  %1082 = vmatpush2.msra.mxu1 %v5833_v60  ;;  %v5890_v59 = vld [vmem:[#allocation89_spill] sm:$0xff]  ;;  %v5891_v60 = vld [vmem:[#allocation90_spill] sm:$0xff] }
  0xd3   :  { %1012 = vmatprep.subr.mxu0 %v5834_v61  ;;  %1083 = vmatprep.subr.mxu1 %v5835_v62  ;;  %v5892_v61 = vld [vmem:[#allocation91_spill] sm:$0xff]  ;;  %v5893_v62 = vld [vmem:[#allocation92_spill] sm:$0xff] }
  0xd4   :  { %1013 = vmatpush2.msra.mxu0 %v5836_v0  ;;  %1084 = vmatpush2.msra.mxu1 %v5837_v1  ;;  %v5894_v0 = vld [vmem:[#allocation93_spill] sm:$0xff]  ;;  %v5895_v1 = vld [vmem:[#allocation94_spill] sm:$0xff] }
  0xd5   :  { %1014 = vmatprep.subr.mxu0 %v5838_v2  ;;  %1085 = vmatprep.subr.mxu1 %v5839_v3  ;;  %v5896_v2 = vld [vmem:[#allocation95_spill] sm:$0xff]  ;;  %v5897_v3 = vld [vmem:[#allocation96_spill] sm:$0xff] }
  0xd6   :  { %1015 = vmatpush2.msra.mxu0 %v5840_v4  ;;  %1086 = vmatpush2.msra.mxu1 %v5841_v5  ;;  %v5898_v4 = vld [vmem:[#allocation97_spill] sm:$0xff]  ;;  %v5899_v5 = vld [vmem:[#allocation98_spill] sm:$0xff] }
  0xd7   :  { %1016 = vmatprep.subr.mxu0 %v5842_v7  ;;  %1087 = vmatprep.subr.mxu1 %v5843_v8  ;;  %v5900_v7 = vld [vmem:[#allocation99_spill] sm:$0xff]  ;;  %v5901_v8 = vld [vmem:[#allocation100_spill] sm:$0xff] }
  0xd8   :  { %1017 = vmatpush2.msra.mxu0 %v5844_v9  ;;  %1088 = vmatpush2.msra.mxu1 %v5845_v10  ;;  %v5902_v9 = vld [vmem:[#allocation101_spill] sm:$0xff]  ;;  %v5903_v10 = vld [vmem:[#allocation102_spill] sm:$0xff] }
  0xd9   :  { %1018 = vmatprep.subr.mxu0 %v5846_v11  ;;  %1089 = vmatprep.subr.mxu1 %v5847_v12  ;;  %v5904_v11 = vld [vmem:[#allocation103_spill] sm:$0xff]  ;;  %v5905_v12 = vld [vmem:[#allocation104_spill] sm:$0xff] }
  0xda   :  { %1019 = vmatpush2.msra.mxu0 %v5848_v13  ;;  %1020 = vmatprep.mubr.f32.mxu0 %v4748_v6  ;;  %v5906_v13 = vld [vmem:[#allocation105_spill] sm:$0xff] }
  0xdb   :  { %1090 = vmatpush2.msra.mxu1 %v5849_v14  ;;  %1021 = vmatmul.mubr.f32.vlgmr.msra.gmra.mxu0 %v4738_v63  ;;  %v5907_v14 = vld [vmem:[#allocation106_spill] sm:$0xff] }
  0xdc   :  { %1091 = vmatprep.mubr.f32.mxu1 %v4748_v6  ;;  %1098 = vmatprep.subr.mxu0 %v5850_v15  ;;  %v5908_v15 = vld [vmem:[#allocation107_spill] sm:$0xff] }
  0xdd   :  { %1169 = vmatprep.subr.mxu1 %v5851_v17  ;;  %3709 = vset.pattern.permute.xlu0 %v3869_v18  ;;  %v5910_v17 = vld [vmem:[#allocation109_spill] sm:$0xff] }
  0xde   :  { %1092 = vmatmul.mubr.f32.vlgmr.msra.gmra.mxu1 %v4738_v63  ;;  %1099 = vmatpush1.msra.mxu0 %v5852_v19  ;;  %v5911_v19 = vld [vmem:[#allocation110_spill] sm:$0xff] }
  0xdf   :  { %1170 = vmatpush1.msra.mxu1 %v5853_v20  ;;  %627 = vperm.xlu0 %3709, %v316_v16   ;;  %v5909_v16 = vld [vmem:[#allocation108_spill] sm:$0xff]  ;;  %v5912_v20 = vld [vmem:[#allocation111_spill] sm:$0xff] }
  0xe0   :  { %1100 = vmatprep.subr.mxu0 %v5854_v21  ;;  %1171 = vmatprep.subr.mxu1 %v5855_v22  ;;  %v5913_v21 = vld [vmem:[#allocation112_spill] sm:$0xff]  ;;  %v5914_v22 = vld [vmem:[#allocation113_spill] sm:$0xff] }
  0xe1   :  { %1101 = vmatpush1.msra.mxu0 %v5856_v23  ;;  %1172 = vmatpush1.msra.mxu1 %v5857_v24  ;;  %v5915_v23 = vld [vmem:[#allocation114_spill] sm:$0xff]  ;;  %v5916_v24 = vld [vmem:[#allocation115_spill] sm:$0xff] }
  0xe2   :  { %1102 = vmatprep.subr.mxu0 %v5858_v36  ;;  %1173 = vmatprep.subr.mxu1 %v5859_v33  ;;  %v5917_v36 = vld [vmem:[#allocation116_spill] sm:$0xff]  ;;  %v5918_v33 = vld [vmem:[#allocation117_spill] sm:$0xff] }
  0xe3   :  { %1103 = vmatpush1.msra.mxu0 %v5860_v26  ;;  %1174 = vmatpush1.msra.mxu1 %v5861_v29  ;;  %v5919_v26 = vld [vmem:[#allocation118_spill] sm:$0xff]  ;;  %v5920_v29 = vld [vmem:[#allocation119_spill] sm:$0xff] }
  0xe4   :  { %1104 = vmatprep.subr.mxu0 %v5862_v37  ;;  %1175 = vmatprep.subr.mxu1 %v5863_v28  ;;  %v5921_v37 = vld [vmem:[#allocation120_spill] sm:$0xff]  ;;  %v5922_v28 = vld [vmem:[#allocation121_spill] sm:$0xff] }
  0xe5   :  { %1105 = vmatpush1.msra.mxu0 %v5864_v30  ;;  %1176 = vmatpush1.msra.mxu1 %v5865_v32  ;;  %v5923_v30 = vld [vmem:[#allocation122_spill] sm:$0xff]  ;;  %v5924_v32 = vld [vmem:[#allocation123_spill] sm:$0xff] }
  0xe6   :  { %1106 = vmatprep.subr.mxu0 %v5866_v34  ;;  %1177 = vmatprep.subr.mxu1 %v5867_v27  ;;  %v5925_v34 = vld [vmem:[#allocation124_spill] sm:$0xff]  ;;  %v5926_v27 = vld [vmem:[#allocation125_spill] sm:$0xff] }
  0xe7   :  { %1107 = vmatpush1.msra.mxu0 %v5868_v25  ;;  %1178 = vmatpush1.msra.mxu1 %v5869_v38  ;;  %v5927_v25 = vld [vmem:[#allocation126_spill] sm:$0xff]  ;;  %v5928_v38 = vld [vmem:[#allocation127_spill] sm:$0xff] }
  0xe8   :  { %1108 = vmatprep.subr.mxu0 %v5870_v39  ;;  %1179 = vmatprep.subr.mxu1 %v5871_v40  ;;  %v5929_v39 = vld [vmem:[#allocation128_spill] sm:$0xff]  ;;  %v5930_v40 = vld [vmem:[#allocation129_spill] sm:$0xff] }
  0xe9   :  { %1109 = vmatpush1.msra.mxu0 %v5872_v41  ;;  %1180 = vmatpush1.msra.mxu1 %v5873_v42  ;;  %v5931_v41 = vld [vmem:[#allocation130_spill] sm:$0xff]  ;;  %v5932_v42 = vld [vmem:[#allocation131_spill] sm:$0xff] }
  0xea   :  { %1110 = vmatprep.subr.mxu0 %v5874_v43  ;;  %1181 = vmatprep.subr.mxu1 %v5875_v44  ;;  %v5933_v43 = vld [vmem:[#allocation132_spill] sm:$0xff]  ;;  %v5934_v44 = vld [vmem:[#allocation133_spill] sm:$0xff] }
  0xeb   :  { %1111 = vmatpush1.msra.mxu0 %v5876_v45  ;;  %1182 = vmatpush1.msra.mxu1 %v5877_v46  ;;  %v5935_v45 = vld [vmem:[#allocation134_spill] sm:$0xff]  ;;  %v5936_v46 = vld [vmem:[#allocation135_spill] sm:$0xff] }
  0xec   :  { %1112 = vmatprep.subr.mxu0 %v5878_v47  ;;  %1183 = vmatprep.subr.mxu1 %v5879_v48  ;;  %v5937_v47 = vld [vmem:[#allocation136_spill] sm:$0xff]  ;;  %v5938_v48 = vld [vmem:[#allocation137_spill] sm:$0xff] }
  0xed   :  { %1113 = vmatpush1.msra.mxu0 %v5880_v49  ;;  %1184 = vmatpush1.msra.mxu1 %v5881_v50  ;;  %v5939_v49 = vld [vmem:[#allocation138_spill] sm:$0xff]  ;;  %v5940_v50 = vld [vmem:[#allocation139_spill] sm:$0xff] }
  0xee   :  { %1114 = vmatprep.subr.mxu0 %v5882_v51  ;;  %1185 = vmatprep.subr.mxu1 %v5883_v52  ;;  %v5941_v51 = vld [vmem:[#allocation140_spill] sm:$0xff]  ;;  %v5942_v52 = vld [vmem:[#allocation141_spill] sm:$0xff] }
  0xef   :  { %1115 = vmatpush1.msra.mxu0 %v5884_v53  ;;  %1186 = vmatpush1.msra.mxu1 %v5885_v54  ;;  %v5943_v53 = vld [vmem:[#allocation142_spill] sm:$0xff]  ;;  %v5944_v54 = vld [vmem:[#allocation143_spill] sm:$0xff] }
  0xf0   :  { %1116 = vmatprep.subr.mxu0 %v5886_v55  ;;  %1187 = vmatprep.subr.mxu1 %v5887_v56  ;;  %v5945_v55 = vld [vmem:[#allocation144_spill] sm:$0xff]  ;;  %v5946_v56 = vld [vmem:[#allocation145_spill] sm:$0xff] }
  0xf1   :  { %1117 = vmatpush1.msra.mxu0 %v5888_v57  ;;  %1188 = vmatpush1.msra.mxu1 %v5889_v58  ;;  %v5947_v57 = vld [vmem:[#allocation146_spill] sm:$0xff]  ;;  %v5948_v58 = vld [vmem:[#allocation147_spill] sm:$0xff] }
  0xf2   :  { %1118 = vmatprep.subr.mxu0 %v5890_v59  ;;  %1189 = vmatprep.subr.mxu1 %v5891_v60  ;;  %v5949_v59 = vld [vmem:[#allocation148_spill] sm:$0xff]  ;;  %v5950_v60 = vld [vmem:[#allocation149_spill] sm:$0xff] }
  0xf3   :  { %1119 = vmatpush1.msra.mxu0 %v5892_v61  ;;  %1190 = vmatpush1.msra.mxu1 %v5893_v62  ;;  %v5951_v61 = vld [vmem:[#allocation150_spill] sm:$0xff]  ;;  %v5952_v62 = vld [vmem:[#allocation151_spill] sm:$0xff] }
  0xf4   :  { %1120 = vmatprep.subr.mxu0 %v5894_v0  ;;  %1191 = vmatprep.subr.mxu1 %v5895_v1  ;;  %v5953_v0 = vld [vmem:[#allocation152_spill] sm:$0xff]  ;;  %v5954_v1 = vld [vmem:[#allocation153_spill] sm:$0xff] }
  0xf5   :  { %1121 = vmatpush1.msra.mxu0 %v5896_v2  ;;  %1192 = vmatpush1.msra.mxu1 %v5897_v3  ;;  %v5955_v2 = vld [vmem:[#allocation154_spill] sm:$0xff]  ;;  %v5956_v3 = vld [vmem:[#allocation155_spill] sm:$0xff] }
  0xf6   :  { %1122 = vmatprep.subr.mxu0 %v5898_v4  ;;  %1193 = vmatprep.subr.mxu1 %v5899_v5  ;;  %v5957_v4 = vld [vmem:[#allocation156_spill] sm:$0xff]  ;;  %v5958_v5 = vld [vmem:[#allocation157_spill] sm:$0xff] }
  0xf7   :  { %1123 = vmatpush1.msra.mxu0 %v5900_v7  ;;  %1194 = vmatpush1.msra.mxu1 %v5901_v8  ;;  %v5959_v7 = vld [vmem:[#allocation158_spill] sm:$0xff]  ;;  %v5960_v8 = vld [vmem:[#allocation159_spill] sm:$0xff] }
  0xf8   :  { %1124 = vmatprep.subr.mxu0 %v5902_v9  ;;  %1195 = vmatprep.subr.mxu1 %v5903_v10  ;;  %v5961_v9 = vld [vmem:[#allocation160_spill] sm:$0xff]  ;;  %v5962_v10 = vld [vmem:[#allocation161_spill] sm:$0xff] }
  0xf9   :  { %1125 = vmatpush1.msra.mxu0 %v5904_v11  ;;  %1196 = vmatpush1.msra.mxu1 %v5905_v12  ;;  %v5963_v11 = vld [vmem:[#allocation162_spill] sm:$0xff]  ;;  %v5964_v12 = vld [vmem:[#allocation163_spill] sm:$0xff] }
  0xfa   :  { %1126 = vmatprep.subr.mxu0 %v5906_v13  ;;  %1197 = vmatprep.subr.mxu1 %v5907_v14  ;;  %v5965_v13 = vld [vmem:[#allocation164_spill] sm:$0xff]  ;;  %v5966_v14 = vld [vmem:[#allocation165_spill] sm:$0xff] }
  0xfb   :  { %1127 = vmatpush1.msra.mxu0 %v5908_v15  ;;  %1198 = vmatpush1.msra.mxu1 %v5909_v16  ;;  %v5967_v15 = vld [vmem:[#allocation166_spill] sm:$0xff]  ;;  %v5968_v16 = vld [vmem:[#allocation167_spill] sm:$0xff] }
  0xfc   :  { %1128 = vmatprep.subr.mxu0 %v5910_v17  ;;  %1199 = vmatprep.subr.mxu1 %v5911_v19  ;;  %v5969_v17 = vld [vmem:[#allocation168_spill] sm:$0xff]  ;;  %v5970_v19 = vld [vmem:[#allocation169_spill] sm:$0xff] }
  0xfd   :  { %1129 = vmatpush1.msra.mxu0 %v5912_v20  ;;  %1200 = vmatpush1.msra.mxu1 %v5913_v21  ;;  %v5971_v20 = vld [vmem:[#allocation170_spill] sm:$0xff]  ;;  %v5972_v21 = vld [vmem:[#allocation171_spill] sm:$0xff] }
  0xfe   :  { %1130 = vmatprep.subr.mxu0 %v5914_v22  ;;  %1201 = vmatprep.subr.mxu1 %v5915_v23  ;;  %v5973_v22 = vld [vmem:[#allocation172_spill] sm:$0xff]  ;;  %v5974_v23 = vld [vmem:[#allocation173_spill] sm:$0xff] }
  0xff   :  { %1131 = vmatpush2.msra.mxu0 %v5916_v24  ;;  %1202 = vmatpush2.msra.mxu1 %v5917_v36  ;;  %v5977_v24 = vld [vmem:[#allocation175_spill] sm:$0xff]  ;;  %v5978_v36 = vld [vmem:[#allocation176_spill] sm:$0xff] }
 0x100   :  { %1132 = vmatprep.subr.mxu0 %v5918_v33  ;;  %1203 = vmatprep.subr.mxu1 %v5919_v26  ;;  %v5979_v33 = vld [vmem:[#allocation177_spill] sm:$0xff]  ;;  %v5980_v26 = vld [vmem:[#allocation178_spill] sm:$0xff] }
 0x101   :  { %1133 = vmatpush2.msra.mxu0 %v5920_v29  ;;  %1204 = vmatpush2.msra.mxu1 %v5921_v37 }
 0x102   :  { %1134 = vmatprep.subr.mxu0 %v5922_v28  ;;  %1205 = vmatprep.subr.mxu1 %v5923_v30 }
 0x103   :  { %1135 = vmatpush2.msra.mxu0 %v5924_v32  ;;  %1206 = vmatpush2.msra.mxu1 %v5925_v34 }
 0x104   :  { %1136 = vmatprep.subr.mxu0 %v5926_v27  ;;  %1207 = vmatprep.subr.mxu1 %v5927_v25 }
 0x105   :  { %1137 = vmatpush2.msra.mxu0 %v5928_v38  ;;  %1208 = vmatpush2.msra.mxu1 %v5929_v39 }
 0x106   :  { %1138 = vmatprep.subr.mxu0 %v5930_v40  ;;  %1209 = vmatprep.subr.mxu1 %v5931_v41 }
 0x107   :  { %1139 = vmatpush2.msra.mxu0 %v5932_v42  ;;  %1210 = vmatpush2.msra.mxu1 %v5933_v43 }
 0x108   :  { %1140 = vmatprep.subr.mxu0 %v5934_v44  ;;  %1211 = vmatprep.subr.mxu1 %v5935_v45 }
 0x109   :  { %1141 = vmatpush2.msra.mxu0 %v5936_v46  ;;  %1212 = vmatpush2.msra.mxu1 %v5937_v47 }
 0x10a   :  { %1142 = vmatprep.subr.mxu0 %v5938_v48  ;;  %1213 = vmatprep.subr.mxu1 %v5939_v49 }
 0x10b   :  { %1143 = vmatpush2.msra.mxu0 %v5940_v50  ;;  %1214 = vmatpush2.msra.mxu1 %v5941_v51 }
 0x10c   :  { %1144 = vmatprep.subr.mxu0 %v5942_v52  ;;  %1215 = vmatprep.subr.mxu1 %v5943_v53 }
 0x10d   :  { %1145 = vmatpush2.msra.mxu0 %v5944_v54  ;;  %1216 = vmatpush2.msra.mxu1 %v5945_v55 }
 0x10e   :  { %1146 = vmatprep.subr.mxu0 %v5946_v56  ;;  %1217 = vmatprep.subr.mxu1 %v5947_v57 }
 0x10f   :  { %1147 = vmatpush2.msra.mxu0 %v5948_v58  ;;  %1218 = vmatpush2.msra.mxu1 %v5949_v59 }
 0x110   :  { %1148 = vmatprep.subr.mxu0 %v5950_v60  ;;  %1219 = vmatprep.subr.mxu1 %v5951_v61 }
 0x111   :  { %1149 = vmatpush2.msra.mxu0 %v5952_v62  ;;  %1220 = vmatpush2.msra.mxu1 %v5953_v0  ;;  %v458_v28 = vpop.f32.mrf.mxu1 }
 0x112   :  { %1150 = vmatprep.subr.mxu0 %v5954_v1  ;;  %1221 = vmatprep.subr.mxu1 %v5955_v2 }
 0x113   :  { %1151 = vmatpush2.msra.mxu0 %v5956_v3  ;;  %1222 = vmatpush2.msra.mxu1 %v5957_v4  ;;  %v460_v34 = vpop.f32.mrf.mxu1 }
 0x114   :  { %1152 = vmatprep.subr.mxu0 %v5958_v5  ;;  %1223 = vmatprep.subr.mxu1 %v5959_v7  ;;  %v4934_v39 = vcombine.low %v458_v28, %v460_v34  ;;  %v3687_v43 = vcombine.low %v460_v34, %v460_v34 }
 0x115   :  { %1153 = vmatpush2.msra.mxu0 %v5960_v8  ;;  %1224 = vmatpush2.msra.mxu1 %v5961_v9 }
 0x116   :  { %1154 = vmatprep.subr.mxu0 %v5962_v10  ;;  %1225 = vmatprep.subr.mxu1 %v5963_v11  ;;  %v1605_v44 = vsel %vm634_vm0, %v4934_v39, 0.0  ;;  %v1607_v49 = vsel %vm634_vm0, %v3687_v43, 0.0 }
 0x117   :  { %1155 = vmatpush2.msra.mxu0 %v5964_v12  ;;  %1226 = vmatpush2.msra.mxu1 %v5965_v13 }
 0x118   :  { %1156 = vmatprep.subr.mxu0 %v4567_v31  ;;  %1227 = vmatprep.subr.mxu1 %v5966_v14  ;;  %v5975_v31 = vld [vmem:[#allocation174_spill] sm:$0xff] }
 0x119   :  { %1157 = vmatpush2.msra.mxu0 %v4573_v35  ;;  %1228 = vmatpush2.msra.mxu1 %v5967_v15  ;;  %v5976_v35 = vmov 0.0  }
 0x11a   :  { %1158 = vmatprep.subr.mxu0 %v5968_v16  ;;  %1229 = vmatprep.subr.mxu1 %v5969_v17 }
 0x11b   :  { %1159 = vmatpush2.msra.mxu0 %v5970_v19  ;;  %1230 = vmatpush2.msra.mxu1 %v5971_v20 }
 0x11c   :  { %1160 = vmatprep.subr.mxu0 %v5972_v21  ;;  %1231 = vmatprep.subr.mxu1 %v5973_v22 }
 0x11d   :  { %1161 = vmatpush2.msra.mxu0 %v5974_v23  ;;  %1162 = vmatprep.mubr.f32.mxu0 %v4748_v6 }
 0x11e   :  { %1232 = vmatpush2.msra.mxu1 %v5975_v31  ;;  %1233 = vmatprep.mubr.f32.mxu1 %v4748_v6 }
 0x11f   :  { %1163 = vmatmul.mubr.f32.vlgmr.msra.gmra.mxu0 %v4738_v63  ;;  %1234 = vmatmul.mubr.f32.vlgmr.msra.gmra.mxu1 %v4738_v63 }
 0x120   :  { %3594 = vmatprep.subr.msk.mxu0 %vm634_vm0, %v4748_v6  ;;  %3597 = vmatprep.subr.msk.mxu1 %vm634_vm0, %v4748_v6 }
 0x121   :  { %3595 = vmatpush1.msk.msra.mxu0 %vm634_vm0, %v4738_v63  ;;  %1328 = vmatprep.mubr.f32.mxu0 %v5976_v35 }
 0x122   :  { %3598 = vmatpush1.msk.msra.mxu1 %vm634_vm0, %v4738_v63  ;;  %1404 = vmatprep.mubr.f32.mxu1 %v5976_v35 }
 0x123   :  { %3596 = vmatmul.mubr.msk.f32.vlgmr.msra.gmra.mxu0 %vm630_vm1, %v5977_v24  ;;  %3599 = vmatmul.mubr.msk.f32.vlgmr.msra.gmra.mxu1 %vm630_vm1, %v5978_v36 }
 0x124   :  { %3600 = vmatprep.subr.msk.mxu0 %vm634_vm0, %v4748_v6  ;;  %3603 = vmatprep.subr.msk.mxu1 %vm634_vm0, %v4748_v6  ;;  %v387_v6 = vpop.f32.mrf.mxu0 }
 0x125   :  { %3601 = vmatpush1.msk.msra.mxu0 %vm634_vm0, %v4738_v63  ;;  %1480 = vmatprep.mubr.f32.mxu0 %v5976_v35 }
 0x126   :  { %3604 = vmatpush1.msk.msra.mxu1 %vm634_vm0, %v4738_v63  ;;  %1556 = vmatprep.mubr.f32.mxu1 %v5976_v35  ;;  %v389_v29 = vpop.f32.mrf.mxu0 }
 0x127   :  { %3602 = vmatmul.mubr.msk.f32.vlgmr.msra.gmra.mxu0 %vm630_vm1, %v5979_v33  ;;  %3605 = vmatmul.mubr.msk.f32.vlgmr.msra.gmra.mxu1 %vm630_vm1, %v5980_v26  ;;  %v4929_v63 = vcombine.low %v387_v6, %v389_v29  ;;  %v3686_v32 = vcombine.low %v389_v29, %v389_v29 }
 0x128   :  { %3710 = vset.pattern.permute.xlu1 %v3869_v18  ;;  %2202 = vmatprep.mubr.f32.mxu0 %v5976_v35 }
 0x129   :  { %2273 = vmatprep.mubr.f32.mxu1 %v5976_v35  ;;  %v1602_v38 = vsel %vm634_vm0, %v4929_v63, 0.0  ;;  %v1603_v18 = vsel %vm634_vm0, %v3686_v32, 0.0 }
 0x12a   :  { %v1604_v40 = vadd.f32 %v1603_v18, %v1602_v38 }
 0x12c   :  { %v1606_v46 = vadd.f32 %v1605_v44, %v1604_v40 }
 0x12e   :  { %v1608_v53 = vadd.f32 %v1607_v49, %v1606_v46 }
 0x152   :  { %v529_v37 = vpop.f32.mrf.mxu0  ;;  %v600_v27 = vpop.f32.mrf.mxu1 }
 0x154   :  { %v531_v30 = vpop.f32.mrf.mxu0  ;;  %v602_v41 = vpop.f32.mrf.mxu1 }
 0x155   :  { %v4938_v45 = vcombine.low %v529_v37, %v531_v30  ;;  %v3688_v56 = vcombine.low %v531_v30, %v531_v30  ;;  %v4952_v3 = vcombine.low %v600_v27, %v602_v41  ;;  %v3689_v11 = vcombine.low %v602_v41, %v602_v41 }
 0x156   :  { %v705_v25 = vpop.f32.mrf.mxu0  ;;  %v784_v47 = vpop.f32.mrf.mxu1 }
 0x157   :  { %v1609_v51 = vsel %vm634_vm0, %v4938_v45, 0.0  ;;  %v1611_v2 = vsel %vm634_vm0, %v3688_v56, 0.0  ;;  %v1613_v12 = vsel %vm634_vm0, %v4952_v3, 0.0  ;;  %v1615_v19 = vsel %vm634_vm0, %v3689_v11, 0.0 }
 0x158   :  { %v707_v42 = vpop.f32.mrf.mxu0  ;;  %v786_v54 = vpop.f32.mrf.mxu1  ;;  %v1610_v58 = vadd.f32 %v1609_v51, %v1608_v53 }
 0x15a   :  { %v4941_v50 = vpop.permute.xlu0 %627  ;;  %v1612_v4 = vadd.f32 %v1611_v2, %v1610_v58 }
 0x15b   :  { %v863_v48 = vpop.f32.mrf.mxu0  ;;  %v708_v52 = vadd.f32 %v707_v42, %v4941_v50  ;;  %v706_v57 = vadd.f32 %v705_v25, %v4941_v50  ;;  %v785_v62 = vadd.f32 %v784_v47, %v4941_v50  ;;  %v787_v0 = vadd.f32 %v786_v54, %v4941_v50  ;;  %v942_v1 = vpop.f32.mrf.mxu1 }
 0x15c   :  { %v1614_v14 = vadd.f32 %v1613_v12, %v1612_v4  ;;  %v864_v36 = vadd.f32 %v863_v48, %v4941_v50  ;;  %v943_v32 = vadd.f32 %v942_v1, %v4941_v50 }
 0x15d   :  { %v865_v55 = vpop.f32.mrf.mxu0  ;;  %v4947_v60 = vcombine.low %v706_v57, %v708_v52  ;;  %v3694_v61 = vcombine.low %v708_v52, %v708_v52  ;;  %v4957_v9 = vcombine.low %v785_v62, %v787_v0  ;;  %v944_v10 = vpop.f32.mrf.mxu1  ;;  %v3695_v20 = vcombine.low %v787_v0, %v787_v0 }
 0x15e   :  { %v866_v21 = vadd.f32 %v865_v55, %v4941_v50  ;;  %v1616_v23 = vadd.f32 %v1615_v19, %v1614_v14  ;;  %v945_v38 = vadd.f32 %v944_v10, %v4941_v50 }
 0x15f   :  { %v1861_v7 = vsel %vm634_vm0, %v4947_v60, 0.0  ;;  %v1862_v8 = vsel %vm634_vm0, %v3694_v61, 0.0  ;;  %v1864_v17 = vsel %vm634_vm0, %v4957_v9, 0.0  ;;  %v1866_v6 = vsel %vm634_vm0, %v3695_v20, 0.0 }
 0x160   :  { %v1863_v15 = vadd.f32 %v1862_v8, %v1861_v7  ;;  %v4971_v29 = vcombine.low %v864_v36, %v866_v21  ;;  %v3696_v27 = vcombine.low %v866_v21, %v866_v21  ;;  %v4983_v47 = vcombine.low %v943_v32, %v945_v38 }
 0x161   :  { %v3697_v55 = vcombine.low %v945_v38, %v945_v38 }
 0x162   :  { %v1865_v31 = vadd.f32 %v1864_v17, %v1863_v15  ;;  %v1868_v25 = vsel %vm634_vm0, %v4971_v29, 0.0  ;;  %v1870_v46 = vsel %vm634_vm0, %v3696_v27, 0.0 }
 0x163   :  { %v1874_v12 = vsel %vm634_vm0, %v3697_v55, 0.0 }
 0x164   :  { %v1867_v28 = vadd.f32 %v1866_v6, %v1865_v31 }
 0x166   :  { %v1869_v40 = vadd.f32 %v1868_v25, %v1867_v28 }
 0x168   :  { %v1871_v48 = vadd.f32 %v1870_v46, %v1869_v40 }
 0x19b   :  { %v1022_v59 = vpop.f32.mrf.mxu0 }
 0x19d   :  { %v1024_v5 = vpop.f32.mrf.mxu0 }
 0x19e   :  { %v4961_v13 = vcombine.low %v1022_v59, %v1024_v5  ;;  %v1093_v16 = vpop.f32.mrf.mxu1  ;;  %v3690_v33 = vcombine.low %v1024_v5, %v1024_v5  ;;  %v1872_v59 = vsel %vm634_vm0, %v4983_v47, 0.0 }
 0x19f   :  { %v1873_v0 = vadd.f32 %v1872_v59, %v1871_v48 }
 0x1a0   :  { %v1617_v22 = vsel %vm634_vm0, %v4961_v13, 0.0  ;;  %v1095_v24 = vpop.f32.mrf.mxu1  ;;  %v1619_v30 = vsel %vm634_vm0, %v3690_v33, 0.0 }
 0x1a1   :  { %v1618_v26 = vadd.f32 %v1617_v22, %v1616_v23  ;;  %v4973_v37 = vcombine.low %v1093_v16, %v1095_v24  ;;  %v3691_v41 = vcombine.low %v1095_v24, %v1095_v24  ;;  %v1875_v22 = vadd.f32 %v1874_v12, %v1873_v0 }
 0x1a2   :  { %v3870_v0 = vmov 839922192  }
 0x1a3   :  { %v1620_v34 = vadd.f32 %v1619_v30, %v1618_v26  ;;  %v1621_v18 = vsel %vm634_vm0, %v4973_v37, 0.0  ;;  %v1623_v52 = vsel %vm634_vm0, %v3691_v41, 0.0 }
 0x1a5   :  { %v1622_v42 = vadd.f32 %v1621_v18, %v1620_v34 }
 0x1a7   :  { %v1624_v56 = vadd.f32 %v1623_v52, %v1622_v42 }
 0x1df   :  { %v1164_v43 = vpop.f32.mrf.mxu0  ;;  %v1235_v44 = vpop.f32.mrf.mxu1 }
 0x1e1   :  { %v1166_v49 = vpop.f32.mrf.mxu0  ;;  %v1237_v51 = vpop.f32.mrf.mxu1 }
 0x1e2   :  { %v4986_v53 = vcombine.low %v1164_v43, %v1166_v49  ;;  %v3692_v54 = vcombine.low %v1166_v49, %v1166_v49  ;;  %v4992_v62 = vcombine.low %v1235_v44, %v1237_v51  ;;  %v3693_v2 = vcombine.low %v1237_v51, %v1237_v51 }
 0x1e3   :  { %v1330_v57 = vpop.f32.mrf.mxu0  ;;  %v1406_v58 = vpop.f32.mrf.mxu1 }
 0x1e4   :  { %v1625_v61 = vsel %vm634_vm0, %v4986_v53, 0.0  ;;  %v1627_v7 = vsel %vm634_vm0, %v3692_v54, 0.0  ;;  %v1331_v8 = vadd.f32 %v1330_v57, %v4941_v50  ;;  %v1407_v17 = vadd.f32 %v1406_v58, %v4941_v50 }
 0x1e5   :  { %v1626_v1 = vadd.f32 %v1625_v61, %v1624_v56  ;;  %v1332_v4 = vpop.f32.mrf.mxu0  ;;  %v1408_v5 = vpop.f32.mrf.mxu1  ;;  %v1629_v21 = vsel %vm634_vm0, %v4992_v62, 0.0  ;;  %v1631_v33 = vsel %vm634_vm0, %v3693_v2, 0.0  ;;  %v1577_v61 = vld [vmem:[%s5461_s5] sm:$0xf]  ;;  %v1641_v2 = vlaneseq }
 0x1e6   :  { %v1333_v10 = vadd.f32 %v1332_v4, %v4941_v50  ;;  %v1409_v11 = vadd.f32 %v1408_v5, %v4941_v50 }
 0x1e7   :  { %v1482_v14 = vpop.f32.mrf.mxu0  ;;  %v1558_v15 = vpop.f32.mrf.mxu1  ;;  %v1628_v16 = vadd.f32 %v1627_v7, %v1626_v1  ;;  %v1639_v1 = vunpack.c.l.s4 %v3870_v0  ;;  %v1642_v5 = vshrl.u32 %v1641_v2, 7 }
 0x1e8   :  { %v5000_v19 = vcombine.low %v1331_v8, %v1333_v10  ;;  %v3698_v20 = vcombine.low %v1333_v10, %v1333_v10  ;;  %v5006_v36 = vcombine.low %v1407_v17, %v1409_v11  ;;  %v3699_v34 = vcombine.low %v1409_v11, %v1409_v11 }
 0x1e9   :  { %v1484_v23 = vpop.f32.mrf.mxu0  ;;  %v1630_v31 = vadd.f32 %v1629_v21, %v1628_v16  ;;  %v1560_v28 = vpop.f32.mrf.mxu1  ;;  %v1483_v27 = vadd.f32 %v1482_v14, %v4941_v50  ;;  %v1559_v43 = vadd.f32 %v1558_v15, %v4941_v50  ;;  %v1640_v4 = vunpack.c.0.s8 %v1639_v1 }
 0x1ea   :  { %v1876_v24 = vsel %vm634_vm0, %v5000_v19, 0.0  ;;  %v1485_v6 = vadd.f32 %v1484_v23, %v4941_v50  ;;  %v1878_v32 = vsel %vm634_vm0, %v3698_v20, 0.0  ;;  %v1880_v38 = vsel %vm634_vm0, %v5006_v36, 0.0 }
 0x1eb   :  { %v1877_v26 = vadd.f32 %v1876_v24, %v1875_v22  ;;  %v1632_v30 = vadd.f32 %v1631_v33, %v1630_v31  ;;  %v1561_v40 = vadd.f32 %v1560_v28, %v4941_v50  ;;  %v1882_v42 = vsel %vm634_vm0, %v3699_v34, 0.0  ;;  %v1835_v50 = vld [vmem:[%s5462_s6] sm:$0xf] }
 0x1ec   :  { %v5014_v18 = vcombine.low %v1483_v27, %v1485_v6  ;;  %v3700_v44 = vcombine.low %v1485_v6, %v1485_v6  ;;  %v5033_v7 = vsub.s32 %v1640_v4, %v1642_v5 }
 0x1ed   :  { %v1879_v25 = vadd.f32 %v1878_v32, %v1877_v26  ;;  %1633 = vadd.xlane.f32.xlu1 %v1632_v30  ;;  %v5021_v49 = vcombine.low %v1559_v43, %v1561_v40  ;;  %v3701_v54 = vcombine.low %v1561_v40, %v1561_v40 }
 0x1ee   :  { %v1884_v48 = vsel %vm634_vm0, %v5014_v18, 0.0  ;;  %v1886_v52 = vsel %vm634_vm0, %v3700_v44, 0.0 }
 0x1ef   :  { %v1881_v41 = vadd.f32 %v1880_v38, %v1879_v25  ;;  %v1888_v56 = vsel %vm634_vm0, %v5021_v49, 0.0  ;;  %v1890_v58 = vsel %vm634_vm0, %v3701_v54, 0.0 }
 0x1f1   :  { %v1883_v46 = vadd.f32 %v1882_v42, %v1881_v41 }
 0x1f3   :  { %v1885_v51 = vadd.f32 %v1884_v48, %v1883_v46 }
 0x1f5   :  { %v1887_v55 = vadd.f32 %v1886_v52, %v1885_v51 }
 0x1f7   :  { %v1889_v57 = vadd.f32 %v1888_v56, %v1887_v55 }
 0x1f9   :  { %v1891_v59 = vadd.f32 %v1890_v58, %v1889_v57 }
 0x1fb   :  { %1892 = vadd.xlane.f32.xlu0 %v1891_v59 }
 0x1fe   :  { %1999 = vperm.xlu1 %3710, %v1835_v50  }
 0x211   :  { %1761 = vperm.xlu0 %3709, %v1577_v61  }
 0x276   :  { %v1634_v8 = vpop.xlane.xlu1 %1633 }
 0x277   :  { %v1636_v10 = vmul.f32 0.00048828125, %v1634_v8 }
 0x279   :  { %v1644_v11 = vrot.slane %v1636_v10, %v5033_v7 }
 0x27b   :  { %v5037_v12 = vsub.f32 %v4929_v63, %v1644_v11  ;;  %v5040_v14 = vsub.f32 %v4934_v39, %v1644_v11  ;;  %v5043_v15 = vsub.f32 %v4938_v45, %v1644_v11  ;;  %v5050_v21 = vsub.f32 %v4952_v3, %v1644_v11 }
 0x27c   :  { %v5058_v33 = vsub.f32 %v4961_v13, %v1644_v11  ;;  %v5068_v25 = vsub.f32 %v4973_v37, %v1644_v11  ;;  %v5089_v51 = vsub.f32 %v4986_v53, %v1644_v11 }
 0x27d   :  { %v1654_v16 = vmul.f32 %v5037_v12, %v5037_v12  ;;  %v1655_v17 = vmul.f32 %v5040_v14, %v5040_v14  ;;  %v1656_v63 = vmul.f32 %v5043_v15, %v5043_v15  ;;  %v1657_v3 = vmul.f32 %v5050_v21, %v5050_v21 }
 0x27e   :  { %v1658_v13 = vmul.f32 %v5058_v33, %v5058_v33  ;;  %v1660_v2 = vmul.f32 %v5089_v51, %v5089_v51 }
 0x27f   :  { %v1670_v20 = vcombine.high %v1654_v16, %v1654_v16  ;;  %v1671_v22 = vcombine.high %v1655_v17, %v1655_v17  ;;  %v1686_v39 = vsel %vm634_vm0, %v1654_v16, 0.0  ;;  %v1689_v31 = vsel %vm634_vm0, %v1655_v17, 0.0 }
 0x280   :  { %v1672_v28 = vcombine.high %v1656_v63, %v1656_v63  ;;  %v1693_v27 = vsel %vm634_vm0, %v1656_v63, 0.0  ;;  %v1673_v40 = vcombine.high %v1657_v3, %v1657_v3  ;;  %v1697_v46 = vsel %vm634_vm0, %v1657_v3, 0.0 }
 0x281   :  { %v1687_v23 = vsel %vm634_vm0, %v1670_v20, 0.0  ;;  %v1691_v30 = vsel %vm634_vm0, %v1671_v22, 0.0  ;;  %v1674_v54 = vcombine.high %v1658_v13, %v1658_v13  ;;  %v1701_v58 = vsel %vm634_vm0, %v1658_v13, 0.0 }
 0x282   :  { %v1688_v45 = vadd.f32 %v1687_v23, %v1686_v39  ;;  %v1695_v41 = vsel %vm634_vm0, %v1672_v28, 0.0  ;;  %v1699_v55 = vsel %vm634_vm0, %v1673_v40, 0.0  ;;  %v1676_v23 = vcombine.high %v1660_v2, %v1660_v2 }
 0x283   :  { %v1703_v4 = vsel %vm634_vm0, %v1674_v54, 0.0 }
 0x284   :  { %v1893_v24 = vpop.xlane.xlu0 %1892  ;;  %v1690_v26 = vadd.f32 %v1689_v31, %v1688_v45 }
 0x285   :  { %v1894_v6 = vmul.f32 0.00048828125, %v1893_v24 }
 0x286   :  { %v1692_v32 = vadd.f32 %v1691_v30, %v1690_v26 }
 0x287   :  { %v5064_v34 = vrot.slane %v1894_v6, %v5033_v7 }
 0x288   :  { %v1694_v38 = vadd.f32 %v1693_v27, %v1692_v32 }
 0x289   :  { %v5075_v42 = vsub.f32 %v4947_v60, %v5064_v34  ;;  %v5079_v43 = vsub.f32 %v4957_v9, %v5064_v34  ;;  %v5084_v37 = vsub.f32 %v4971_v29, %v5064_v34  ;;  %v1659_v9 = vmul.f32 %v5068_v25, %v5068_v25 }
 0x28a   :  { %v1696_v44 = vadd.f32 %v1695_v41, %v1694_v38  ;;  %v5097_v29 = vsub.f32 %v4992_v62, %v1644_v11  ;;  %v5102_v53 = vsub.f32 %v4983_v47, %v5064_v34  ;;  %v5115_v11 = vsub.f32 %v5000_v19, %v5064_v34 }
 0x28b   :  { %v1912_v48 = vmul.f32 %v5075_v42, %v5075_v42  ;;  %v1913_v60 = vmul.f32 %v5079_v43, %v5079_v43  ;;  %v1914_v59 = vmul.f32 %v5084_v37, %v5084_v37  ;;  %v1675_v62 = vcombine.high %v1659_v9, %v1659_v9 }
 0x28c   :  { %v1698_v52 = vadd.f32 %v1697_v46, %v1696_v44  ;;  %v1705_v10 = vsel %vm634_vm0, %v1659_v9, 0.0  ;;  %v1915_v20 = vmul.f32 %v5102_v53, %v5102_v53  ;;  %v1661_v39 = vmul.f32 %v5097_v29, %v5097_v29 }
 0x28d   :  { %v1928_v56 = vcombine.high %v1912_v48, %v1912_v48  ;;  %v1929_v61 = vcombine.high %v1913_v60, %v1913_v60  ;;  %v1944_v0 = vsel %vm634_vm0, %v1912_v48, 0.0  ;;  %v1947_v47 = vsel %vm634_vm0, %v1913_v60, 0.0 }
 0x28e   :  { %v1700_v57 = vadd.f32 %v1699_v55, %v1698_v52  ;;  %v1930_v63 = vcombine.high %v1914_v59, %v1914_v59  ;;  %v1707_v45 = vsel %vm634_vm0, %v1675_v62, 0.0  ;;  %v1951_v26 = vsel %vm634_vm0, %v1914_v59, 0.0 }
 0x28f   :  { %v1945_v1 = vsel %vm634_vm0, %v1928_v56, 0.0  ;;  %v1949_v22 = vsel %vm634_vm0, %v1929_v61, 0.0  ;;  %v1709_v19 = vsel %vm634_vm0, %v1660_v2, 0.0  ;;  %v5127_v6 = vsub.f32 %v5006_v36, %v5064_v34 }
 0x290   :  { %v1702_v50 = vadd.f32 %v1701_v58, %v1700_v57  ;;  %v1946_v5 = vadd.f32 %v1945_v1, %v1944_v0  ;;  %v1916_v30 = vmul.f32 %v5115_v11, %v5115_v11  ;;  %v1931_v32 = vcombine.high %v1915_v20, %v1915_v20 }
 0x291   :  { %v1953_v27 = vsel %vm634_vm0, %v1930_v63, 0.0  ;;  %v1677_v13 = vcombine.high %v1661_v39, %v1661_v39  ;;  %v1711_v38 = vsel %vm634_vm0, %v1676_v23, 0.0  ;;  %v1955_v44 = vsel %vm634_vm0, %v1915_v20, 0.0  ;;  %v1836_v23 = vld [vmem:[%s5463_s7] sm:$0xf] }
 0x292   :  { %v1704_v8 = vadd.f32 %v1703_v4, %v1702_v50  ;;  %v1948_v16 = vadd.f32 %v1947_v47, %v1946_v5  ;;  %v1713_v46 = vsel %vm634_vm0, %v1661_v39, 0.0  ;;  %v5137_v36 = vsub.f32 %v5014_v18, %v5064_v34 }
 0x293   :  { %v1917_v60 = vmul.f32 %v5127_v6, %v5127_v6  ;;  %v1932_v9 = vcombine.high %v1916_v30, %v1916_v30  ;;  %v1957_v54 = vsel %vm634_vm0, %v1931_v32, 0.0  ;;  %v1715_v55 = vsel %vm634_vm0, %v1677_v13, 0.0 }
 0x294   :  { %v1706_v17 = vadd.f32 %v1705_v10, %v1704_v8  ;;  %v1950_v31 = vadd.f32 %v1949_v22, %v1948_v16  ;;  %v1959_v58 = vsel %vm634_vm0, %v1916_v30, 0.0  ;;  %v5146_v18 = vsub.f32 %v5021_v49, %v5064_v34 }
 0x295   :  { %v1918_v50 = vmul.f32 %v5137_v36, %v5137_v36  ;;  %v1933_v61 = vcombine.high %v1917_v60, %v1917_v60  ;;  %v1961_v0 = vsel %vm634_vm0, %v1932_v9, 0.0  ;;  %v1963_v2 = vsel %vm634_vm0, %v1917_v60, 0.0 }
 0x296   :  { %v1708_v24 = vadd.f32 %v1707_v45, %v1706_v17  ;;  %v1952_v3 = vadd.f32 %v1951_v26, %v1950_v31  ;;  %v1919_v4 = vmul.f32 %v5146_v18, %v5146_v18  ;;  %v1576_v45 = vld [vmem:[%s5460_s4] sm:$0xf]  ;;  %v2000_v31 = vpop.permute.xlu1 %1999 }
 0x297   :  { %v1934_v5 = vcombine.high %v1918_v50, %v1918_v50  ;;  %v1965_v8 = vsel %vm634_vm0, %v1933_v61, 0.0  ;;  %v1967_v49 = vsel %vm634_vm0, %v1918_v50, 0.0  ;;  %v2007_v60 = vrot.slane %v2000_v31, %v5033_v7 }
 0x298   :  { %v1710_v28 = vadd.f32 %v1709_v19, %v1708_v24  ;;  %v1954_v40 = vadd.f32 %v1953_v27, %v1952_v3  ;;  %v1935_v10 = vcombine.high %v1919_v4, %v1919_v4  ;;  %v1971_v20 = vsel %vm634_vm0, %v1919_v4, 0.0 }
 0x299   :  { %v1969_v16 = vsel %vm634_vm0, %v1934_v5, 0.0 }
 0x29a   :  { %v1712_v41 = vadd.f32 %v1711_v38, %v1710_v28  ;;  %v1956_v48 = vadd.f32 %v1955_v44, %v1954_v40  ;;  %v1973_v22 = vsel %vm634_vm0, %v1935_v10, 0.0  ;;  %v1762_v44 = vpop.permute.xlu0 %1761 }
 0x29c   :  { %v1714_v52 = vadd.f32 %v1713_v46, %v1712_v41  ;;  %v1958_v56 = vadd.f32 %v1957_v54, %v1956_v48  ;;  %v5172_v48 = vrot.slane %v1762_v44, %v5033_v7 }
 0x29e   :  { %v1716_v57 = vadd.f32 %v1715_v55, %v1714_v52  ;;  %v1960_v59 = vadd.f32 %v1959_v58, %v1958_v56 }
 0x2a0   :  { %1717 = vadd.xlane.f32.xlu1 %v1716_v57  ;;  %v1962_v1 = vadd.f32 %v1961_v0, %v1960_v59 }
 0x2a2   :  { %v1964_v62 = vadd.f32 %v1963_v2, %v1962_v1 }
 0x2a4   :  { %v1966_v47 = vadd.f32 %v1965_v8, %v1964_v62 }
 0x2a6   :  { %v1968_v34 = vadd.f32 %v1967_v49, %v1966_v47 }
 0x2a8   :  { %v1970_v17 = vadd.f32 %v1969_v16, %v1968_v34 }
 0x2aa   :  { %v1972_v63 = vadd.f32 %v1971_v20, %v1970_v17 }
 0x2ac   :  { %v1974_v39 = vadd.f32 %v1973_v22, %v1972_v63 }
 0x2ae   :  { %1975 = vadd.xlane.f32.xlu1 %v1974_v39 }
 0x2bf   :  { %2019 = vperm.xlu1 %3710, %v1836_v23  }
 0x2c3   :  { %1741 = vperm.xlu1 %3710, %v1576_v45  }
 0x329   :  { %v1718_v24 = vpop.xlane.xlu1 %1717 }
 0x32a   :  { %v1719_v26 = vmul.f32 0.00048828125, %v1718_v24 }
 0x32c   :  { %v1720_v19 = vadd.f32 1e-05, %v1719_v26 }
 0x32e   :  { %3713 = vrsqrt.f32 %v1720_v19 }
 0x337   :  { %v1976_v3 = vpop.xlane.xlu1 %1975 }
 0x338   :  { %v1977_v28 = vmul.f32 0.00048828125, %v1976_v3 }
 0x33a   :  { %v1978_v32 = vadd.f32 1e-05, %v1977_v28 }
 0x33b   :  { %v3714_v30 = vpop.eup %3713  ;;  %v2020_v27 = vpop.permute.xlu1 %2019 }
 0x33c   :  { %3715 = vrsqrt.f32 %v1978_v32  ;;  %v1729_v13 = vrot.slane %v3714_v30, %v5033_v7  ;;  %v2027_v9 = vrot.slane %v2020_v27, %v5033_v7 }
 0x33e   :  { %v1731_v41 = vmul.f32 %v1729_v13, %v5037_v12  ;;  %v1732_v54 = vmul.f32 %v1729_v13, %v5040_v14  ;;  %v1733_v56 = vmul.f32 %v1729_v13, %v5043_v15  ;;  %v1734_v12 = vmul.f32 %v1729_v13, %v5050_v21 }
 0x33f   :  { %v1742_v38 = vpop.permute.xlu1 %1741  ;;  %v1735_v57 = vmul.f32 %v1729_v13, %v5058_v33  ;;  %v1736_v58 = vmul.f32 %v1729_v13, %v5068_v25  ;;  %v1737_v61 = vmul.f32 %v1729_v13, %v5089_v51  ;;  %v1738_v0 = vmul.f32 %v1729_v13, %v5097_v29 }
 0x340   :  { %v5167_v40 = vrot.slane %v1742_v38, %v5033_v7 }
 0x342   :  { %v1751_v46 = vmul.f32 %v5167_v40, %v1731_v41  ;;  %v1752_v50 = vmul.f32 %v5167_v40, %v1732_v54  ;;  %v1753_v14 = vmul.f32 %v5167_v40, %v1733_v56  ;;  %v1754_v15 = vmul.f32 %v5167_v40, %v1734_v12 }
 0x343   :  { %v1755_v21 = vmul.f32 %v5167_v40, %v1735_v57  ;;  %v1756_v17 = vmul.f32 %v5167_v40, %v1736_v58  ;;  %v1758_v54 = vmul.f32 %v5167_v40, %v1738_v0 }
 0x344   :  { %v5175_v52 = vadd.f32 %v5172_v48, %v1751_v46  ;;  %v5218_v39 = vadd.f32 %v5172_v48, %v1752_v50  ;;  %v5225_v24 = vadd.f32 %v5172_v48, %v1753_v14  ;;  %v5229_v28 = vadd.f32 %v5172_v48, %v1754_v15 }
 0x345   :  { %v5239_v12 = vadd.f32 %v5172_v48, %v1755_v21  ;;  %v5251_v14 = vadd.f32 %v5172_v48, %v1758_v54 }
 0x346   :  { %v1787_v1 = vmin.f32 %v5175_v52, 0.0  ;;  %v1788_v41 = vmin.f32 %v5218_v39, 0.0  ;;  %v1789_v56 = vmin.f32 %v5225_v24, 0.0  ;;  %v1790_v58 = vmin.f32 %v5229_v28, 0.0 }
 0x347   :  { %vm1779_vm10 = vcmp.gt.f32.partialorder %v5175_v52, 0.0  ;;  %vm1780_vm11 = vcmp.gt.f32.partialorder %v5218_v39, 0.0  ;;  %vm1781_vm12 = vcmp.gt.f32.partialorder %v5225_v24, 0.0  ;;  %vm1782_vm13 = vcmp.gt.f32.partialorder %v5229_v28, 0.0 }
 0x348   :  { %v1797_v57 = vmul.f32 1.442695, %v1788_v41  ;;  %v1799_v50 = vmul.f32 1.442695, %v1789_v56  ;;  %v1801_v0 = vmul.f32 1.442695, %v1790_v58 }
 0x349   :  { %v3716_v55 = vpop.eup %3715  ;;  %vm1783_vm14 = vcmp.gt.f32.partialorder %v5239_v12, 0.0 }
 0x34a   :  { %v1987_v59 = vrot.slane %v3716_v55, %v5033_v7 }
 0x34c   :  { %v1989_v33 = vmul.f32 %v1987_v59, %v5075_v42  ;;  %v1990_v25 = vmul.f32 %v1987_v59, %v5079_v43  ;;  %v1991_v7 = vmul.f32 %v1987_v59, %v5084_v37  ;;  %v1992_v2 = vmul.f32 %v1987_v59, %v5102_v53 }
 0x34d   :  { %v1993_v51 = vmul.f32 %v1987_v59, %v5115_v11  ;;  %v1994_v29 = vmul.f32 %v1987_v59, %v5127_v6  ;;  %v1995_v62 = vmul.f32 %v1987_v59, %v5137_v36  ;;  %v1996_v4 = vmul.f32 %v1987_v59, %v5146_v18 }
 0x34e   :  { %v2009_v5 = vmul.f32 %v2007_v60, %v1989_v33  ;;  %v2010_v8 = vmul.f32 %v2007_v60, %v1990_v25  ;;  %v2011_v47 = vmul.f32 %v2007_v60, %v1991_v7  ;;  %v2012_v49 = vmul.f32 %v2007_v60, %v1992_v2 }
 0x34f   :  { %v2013_v34 = vmul.f32 %v2007_v60, %v1993_v51  ;;  %v2014_v42 = vmul.f32 %v2007_v60, %v1994_v29  ;;  %v2015_v10 = vmul.f32 %v2007_v60, %v1995_v62  ;;  %v2016_v43 = vmul.f32 %v2007_v60, %v1996_v4 }
 0x350   :  { %v5200_v16 = vadd.f32 %v2027_v9, %v2009_v5  ;;  %v5202_v37 = vadd.f32 %v2027_v9, %v2010_v8  ;;  %v5204_v53 = vadd.f32 %v2027_v9, %v2011_v47  ;;  %v5206_v11 = vadd.f32 %v2027_v9, %v2012_v49 }
 0x351   :  { %v5208_v6 = vadd.f32 %v2027_v9, %v2013_v34  ;;  %v5210_v36 = vadd.f32 %v2027_v9, %v2014_v42  ;;  %v1795_v18 = vmul.f32 1.442695, %v1787_v1  ;;  %v5215_v22 = vadd.f32 %v2027_v9, %v2015_v10 }
 0x352   :  { %v2045_v20 = vmin.f32 %v5200_v16, 0.0  ;;  %v2046_v63 = vmin.f32 %v5202_v37, 0.0  ;;  %v2047_v23 = vmin.f32 %v5204_v53, 0.0  ;;  %v2048_v45 = vmin.f32 %v5206_v11, 0.0 }
 0x353   :  { %v5222_v31 = vadd.f32 %v2027_v9, %v2016_v43  ;;  %v2049_v3 = vmin.f32 %v5208_v6, 0.0  ;;  %v2050_v27 = vmin.f32 %v5210_v36, 0.0  ;;  %3717 = vpow2.f32 %v1795_v18 }
 0x354   :  { %v2053_v26 = vmul.f32 1.442695, %v2045_v20  ;;  %v2055_v19 = vmul.f32 1.442695, %v2046_v63  ;;  %v2057_v30 = vmul.f32 1.442695, %v2047_v23  ;;  %v1757_v9 = vmul.f32 %v5167_v40, %v1737_v61 }
 0x355   :  { %v2059_v32 = vmul.f32 1.442695, %v2048_v45  ;;  %v2061_v13 = vmul.f32 1.442695, %v2049_v3  ;;  %v2051_v38 = vmin.f32 %v5215_v22, 0.0  ;;  %v2052_v46 = vmin.f32 %v5222_v31, 0.0 }
 0x356   :  { %3719 = vpow2.f32 %v2053_v26  ;;  %v2063_v44 = vmul.f32 1.442695, %v2050_v27  ;;  %v5243_v59 = vadd.f32 %v5172_v48, %v1756_v17  ;;  %v1791_v40 = vmin.f32 %v5239_v12, 0.0  ;;  %v5264_v20 = vld [vmem:[%s5465_s9] sm:$0xff] }
 0x357   :  { %3721 = vpow2.f32 %v2055_v19  ;;  %v2065_v60 = vmul.f32 1.442695, %v2051_v38  ;;  %v2067_v55 = vmul.f32 1.442695, %v2052_v46  ;;  %v5247_v61 = vadd.f32 %v5172_v48, %v1757_v9 }
 0x358   :  { %3723 = vpow2.f32 %v2057_v30  ;;  %v1792_v1 = vmin.f32 %v5243_v59, 0.0  ;;  %v1803_v15 = vmul.f32 1.442695, %v1791_v40  ;;  %v1794_v7 = vmin.f32 %v5251_v14, 0.0 }
 0x359   :  { %3725 = vpow2.f32 %v2059_v32  ;;  %v1793_v21 = vmin.f32 %v5247_v61, 0.0  ;;  %vm2037_vm2 = vcmp.gt.f32.partialorder %v5200_v16, 0.0  ;;  %vm2038_vm3 = vcmp.gt.f32.partialorder %v5202_v37, 0.0 }
 0x35a   :  { %3727 = vpow2.f32 %v2061_v13  ;;  %v1805_v25 = vmul.f32 1.442695, %v1792_v1  ;;  %vm2039_vm4 = vcmp.gt.f32.partialorder %v5204_v53, 0.0  ;;  %v1809_v49 = vmul.f32 1.442695, %v1794_v7 }
 0x35b   :  { %3729 = vpow2.f32 %v2063_v44  ;;  %v1807_v48 = vmul.f32 1.442695, %v1793_v21  ;;  %vm2040_vm5 = vcmp.gt.f32.partialorder %v5206_v11, 0.0  ;;  %vm2041_vm6 = vcmp.gt.f32.partialorder %v5208_v6, 0.0 }
 0x35c   :  { %3731 = vpow2.f32 %v2065_v60  ;;  %vm2042_vm7 = vcmp.gt.f32.partialorder %v5210_v36, 0.0  ;;  %vm2043_vm8 = vcmp.gt.f32.partialorder %v5215_v22, 0.0  ;;  %vm2044_vm9 = vcmp.gt.f32.partialorder %v5222_v31, 0.0 }
 0x35d   :  { %3733 = vpow2.f32 %v2067_v55  ;;  %vm1784_vm15 = vcmp.gt.f32.partialorder %v5243_v59, 0.0 }
 0x35e   :  { %3735 = vpow2.f32 %v1797_v57 }
 0x35f   :  { %3737 = vpow2.f32 %v1799_v50 }
 0x360   :  { %v3718_v33 = vpop.eup %3717  ;;  %3739 = vpow2.f32 %v1801_v0 }
 0x361   :  { %3741 = vpow2.f32 %v1803_v15  ;;  %v3606_v41 = vadd.f32 -1.0, %v3718_v33  ;;  %v2085_v33 = vld [vmem:[%s5464_s8] sm:$0xff] }
 0x362   :  { %3743 = vpow2.f32 %v1805_v25 }
 0x363   :  { %v3720_v2 = vpop.eup %3719  ;;  %3745 = vpow2.f32 %v1807_v48  ;;  %v1819_v9 = vsel %vm1779_vm10, %v5175_v52, %v3606_v41 }
 0x364   :  { %v3722_v51 = vpop.eup %3721  ;;  %v3614_v29 = vadd.f32 -1.0, %v3720_v2  ;;  %3747 = vpow2.f32 %v1809_v49  ;;  %v2714_v52 = vcombine.high %v1819_v9, %v1819_v9 }
 0x365   :  { %v3724_v62 = vpop.eup %3723  ;;  %v3615_v4 = vadd.f32 -1.0, %v3722_v51 }
 0x366   :  { %v3726_v5 = vpop.eup %3725  ;;  %v2077_v8 = vsel %vm2037_vm2, %v5200_v16, %v3614_v29  ;;  %v3616_v47 = vadd.f32 -1.0, %v3724_v62  ;;  %vm1785_vm2 = vcmp.gt.f32.partialorder %v5247_v61, 0.0 }
 0x367   :  { %v3728_v34 = vpop.eup %3727  ;;  %v2095_v42 = vcombine.high %v2077_v8, %v2077_v8  ;;  %v2078_v10 = vsel %vm2038_vm3, %v5202_v37, %v3615_v4  ;;  %v3617_v43 = vadd.f32 -1.0, %v3726_v5  ;;  %vm1786_vm3 = vcmp.gt.f32.partialorder %v5251_v14, 0.0 }
 0x368   :  { %v3730_v18 = vpop.eup %3729  ;;  %v2096_v17 = vcombine.high %v2078_v10, %v2078_v10  ;;  %v2079_v16 = vsel %vm2039_vm4, %v5204_v53, %v3616_v47  ;;  %v3618_v63 = vadd.f32 -1.0, %v3728_v34 }
 0x369   :  { %v3732_v23 = vpop.eup %3731  ;;  %3622 = vmatprep.subr.msk.mxu0 %vm634_vm0, %v2095_v42  ;;  %v2080_v37 = vsel %vm2040_vm5, %v5206_v11, %v3617_v43  ;;  %v3619_v45 = vadd.f32 -1.0, %v3730_v18  ;;  %v2097_v19 = vcombine.high %v2079_v16, %v2079_v16 }
 0x36a   :  { %v3734_v26 = vpop.eup %3733  ;;  %3625 = vmatprep.subr.msk.mxu1 %vm634_vm0, %v2096_v17  ;;  %3623 = vmatpush1.msk.msra.mxu0 %vm634_vm0, %v2077_v8  ;;  %v2081_v53 = vsel %vm2041_vm6, %v5208_v6, %v3618_v63  ;;  %v3620_v3 = vadd.f32 -1.0, %v3732_v23  ;;  %v2098_v11 = vcombine.high %v2080_v37, %v2080_v37 }
 0x36b   :  { %v3736_v30 = vpop.eup %3735  ;;  %3626 = vmatpush1.msk.msra.mxu1 %vm634_vm0, %v2078_v10  ;;  %3624 = vmatmul.mubr.msk.f32.vlgmr.msra.gmra.mxu0 %vm630_vm1, %v5264_v20  ;;  %v2082_v32 = vsel %vm2042_vm7, %v5210_v36, %v3619_v45  ;;  %v3621_v27 = vadd.f32 -1.0, %v3734_v26  ;;  %v2099_v13 = vcombine.high %v2081_v53, %v2081_v53 }
 0x36c   :  { %3627 = vmatmul.mubr.msk.f32.vlgmr.msra.gmra.mxu1 %vm630_vm1, %v5264_v20  ;;  %3628 = vmatprep.subr.msk.mxu0 %vm634_vm0, %v2097_v19  ;;  %v2100_v6 = vcombine.high %v2082_v32, %v2082_v32  ;;  %v2083_v38 = vsel %vm2043_vm8, %v5215_v22, %v3620_v3  ;;  %v3738_v36 = vpop.eup %3737  ;;  %v3607_v46 = vadd.f32 -1.0, %v3736_v30 }
 0x36d   :  { %3631 = vmatprep.subr.msk.mxu1 %vm634_vm0, %v2098_v11  ;;  %3629 = vmatpush1.msk.msra.mxu0 %vm634_vm0, %v2079_v16  ;;  %v2084_v44 = vsel %vm2044_vm9, %v5222_v31, %v3621_v27  ;;  %v3740_v60 = vpop.eup %3739  ;;  %v2101_v22 = vcombine.high %v2083_v38, %v2083_v38  ;;  %v3608_v54 = vadd.f32 -1.0, %v3738_v36 }
 0x36e   :  { %3632 = vmatpush1.msk.msra.mxu1 %vm634_vm0, %v2080_v37  ;;  %3634 = vmatprep.subr.msk.mxu0 %vm634_vm0, %v2099_v13  ;;  %v2102_v31 = vcombine.high %v2084_v44, %v2084_v44  ;;  %v3742_v55 = vpop.eup %3741  ;;  %v1820_v56 = vsel %vm1780_vm11, %v5218_v39, %v3607_v46  ;;  %v3609_v57 = vadd.f32 -1.0, %v3740_v60 }
 0x36f   :  { %3637 = vmatprep.subr.msk.mxu1 %vm634_vm0, %v2100_v6  ;;  %2344 = vmatprep.mubr.f32.mxu0 %v5976_v35  ;;  %v3744_v58 = vpop.eup %3743  ;;  %v2715_v39 = vcombine.high %v1820_v56, %v1820_v56  ;;  %v1821_v50 = vsel %vm1781_vm12, %v5225_v24, %v3608_v54  ;;  %v3610_v40 = vadd.f32 -1.0, %v3742_v55 }
 0x370   :  { %2415 = vmatprep.mubr.f32.mxu1 %v5976_v35  ;;  %3630 = vmatmul.mubr.msk.f32.vlgmr.msra.gmra.mxu0 %vm630_vm1, %v5264_v20  ;;  %v3746_v0 = vpop.eup %3745  ;;  %v1822_v1 = vsel %vm1782_vm13, %v5229_v28, %v3609_v57  ;;  %v3611_v15 = vadd.f32 -1.0, %v3744_v58  ;;  %v2716_v24 = vcombine.high %v1821_v50, %v1821_v50 }
 0x371   :  { %3633 = vmatmul.mubr.msk.f32.vlgmr.msra.gmra.mxu1 %vm630_vm1, %v5264_v20  ;;  %3635 = vmatpush1.msk.msra.mxu0 %vm634_vm0, %v2081_v53  ;;  %v3748_v21 = vpop.eup %3747  ;;  %v2717_v28 = vcombine.high %v1822_v1, %v1822_v1  ;;  %v1823_v25 = vsel %vm1783_vm14, %v5239_v12, %v3610_v40  ;;  %v3612_v7 = vadd.f32 -1.0, %v3746_v0 }
 0x372   :  { %3638 = vmatpush1.msk.msra.mxu1 %vm634_vm0, %v2082_v32  ;;  %3640 = vmatprep.subr.msk.mxu0 %vm634_vm0, %v2101_v22  ;;  %v1824_v2 = vsel %vm1784_vm15, %v5243_v59, %v3611_v15  ;;  %v3613_v51 = vadd.f32 -1.0, %v3748_v21  ;;  %v2718_v29 = vcombine.high %v1823_v25, %v1823_v25 }
 0x373   :  { %3643 = vmatprep.subr.msk.mxu1 %vm634_vm0, %v2102_v31  ;;  %2486 = vmatprep.mubr.f32.mxu0 %v5976_v35  ;;  %v2719_v12 = vcombine.high %v1824_v2, %v1824_v2  ;;  %v1825_v62 = vsel %vm1785_vm2, %v5247_v61, %v3612_v7 }
 0x374   :  { %2557 = vmatprep.mubr.f32.mxu1 %v5976_v35  ;;  %3636 = vmatmul.mubr.msk.f32.vlgmr.msra.gmra.mxu0 %vm630_vm1, %v5264_v20  ;;  %v1826_v59 = vsel %vm1786_vm3, %v5251_v14, %v3613_v51  ;;  %v2720_v4 = vcombine.high %v1825_v62, %v1825_v62 }
 0x375   :  { %3639 = vmatmul.mubr.msk.f32.vlgmr.msra.gmra.mxu1 %vm630_vm1, %v5264_v20  ;;  %3641 = vmatpush1.msk.msra.mxu0 %vm634_vm0, %v2083_v38  ;;  %v2721_v61 = vcombine.high %v1826_v59, %v1826_v59 }
 0x376   :  { %3644 = vmatpush1.msk.msra.mxu1 %vm634_vm0, %v2084_v44  ;;  %3646 = vmatprep.subr.msk.mxu0 %vm634_vm0, %v2714_v52 }
 0x377   :  { %3649 = vmatprep.subr.msk.mxu1 %vm634_vm0, %v2715_v39  ;;  %2628 = vmatprep.mubr.f32.mxu0 %v5976_v35 }
 0x378   :  { %2699 = vmatprep.mubr.f32.mxu1 %v5976_v35  ;;  %3642 = vmatmul.mubr.msk.f32.vlgmr.msra.gmra.mxu0 %vm630_vm1, %v5264_v20 }
 0x379   :  { %3645 = vmatmul.mubr.msk.f32.vlgmr.msra.gmra.mxu1 %vm630_vm1, %v5264_v20  ;;  %3647 = vmatpush1.msk.msra.mxu0 %vm634_vm0, %v1819_v9 }
 0x37a   :  { %3650 = vmatpush1.msk.msra.mxu1 %vm634_vm0, %v1820_v56  ;;  %3652 = vmatprep.subr.msk.mxu0 %vm634_vm0, %v2716_v24 }
 0x37b   :  { %3655 = vmatprep.subr.msk.mxu1 %vm634_vm0, %v2717_v28  ;;  %2821 = vmatprep.mubr.f32.mxu0 %v5976_v35 }
 0x37c   :  { %2892 = vmatprep.mubr.f32.mxu1 %v5976_v35  ;;  %3648 = vmatmul.mubr.msk.f32.vlgmr.msra.gmra.mxu0 %vm630_vm1, %v2085_v33 }
 0x37d   :  { %3651 = vmatmul.mubr.msk.f32.vlgmr.msra.gmra.mxu1 %vm630_vm1, %v2085_v33  ;;  %3653 = vmatpush1.msk.msra.mxu0 %vm634_vm0, %v1821_v50 }
 0x37e   :  { %3656 = vmatpush1.msk.msra.mxu1 %vm634_vm0, %v1822_v1  ;;  %3658 = vmatprep.subr.msk.mxu0 %vm634_vm0, %v2718_v29 }
 0x37f   :  { %3661 = vmatprep.subr.msk.mxu1 %vm634_vm0, %v2719_v12  ;;  %2963 = vmatprep.mubr.f32.mxu0 %v5976_v35 }
 0x380   :  { %3034 = vmatprep.mubr.f32.mxu1 %v5976_v35  ;;  %3654 = vmatmul.mubr.msk.f32.vlgmr.msra.gmra.mxu0 %vm630_vm1, %v2085_v33 }
 0x381   :  { %3657 = vmatmul.mubr.msk.f32.vlgmr.msra.gmra.mxu1 %vm630_vm1, %v2085_v33  ;;  %3659 = vmatpush1.msk.msra.mxu0 %vm634_vm0, %v1823_v25 }
 0x382   :  { %3662 = vmatpush1.msk.msra.mxu1 %vm634_vm0, %v1824_v2  ;;  %3664 = vmatprep.subr.msk.mxu0 %vm634_vm0, %v2720_v4 }
 0x383   :  { %3667 = vmatprep.subr.msk.mxu1 %vm634_vm0, %v2721_v61  ;;  %3105 = vmatprep.mubr.f32.mxu0 %v5976_v35  ;;  %v3325_v61 = vld [vmem:[%s5466_s10] sm:$0xff] }
 0x384   :  { %3176 = vmatprep.mubr.f32.mxu1 %v5976_v35  ;;  %3660 = vmatmul.mubr.msk.f32.vlgmr.msra.gmra.mxu0 %vm630_vm1, %v2085_v33 }
 0x385   :  { %3663 = vmatmul.mubr.msk.f32.vlgmr.msra.gmra.mxu1 %vm630_vm1, %v2085_v33  ;;  %3665 = vmatpush1.msk.msra.mxu0 %vm634_vm0, %v1825_v62 }
 0x386   :  { %3668 = vmatpush1.msk.msra.mxu1 %vm634_vm0, %v1826_v59  ;;  %3247 = vmatprep.mubr.f32.mxu0 %v5976_v35 }
 0x387   :  { %3318 = vmatprep.mubr.f32.mxu1 %v5976_v35 }
 0x388   :  { %3666 = vmatmul.mubr.msk.f32.vlgmr.msra.gmra.mxu0 %vm630_vm1, %v2085_v33 }
 0x389   :  { %3669 = vmatmul.mubr.msk.f32.vlgmr.msra.gmra.mxu1 %vm630_vm1, %v2085_v33 }
 0x42b   :  { %v2204_v14 = vpop.f32.mrf.mxu0 }
 0x42c   :  { %v2275_v48 = vpop.f32.mrf.mxu1 }
 0x42d   :  { %v2206_v5 = vpop.f32.mrf.mxu0 }
 0x42e   :  { %v2277_v8 = vpop.f32.mrf.mxu1 }
 0x430   :  { %v2346_v47 = vpop.f32.mrf.mxu0 }
 0x431   :  { %v2417_v49 = vpop.f32.mrf.mxu1 }
 0x432   :  { %v2348_v34 = vpop.f32.mrf.mxu0 }
 0x433   :  { %v2419_v42 = vpop.f32.mrf.mxu1 }
 0x434   :  { %v2488_v10 = vpop.f32.mrf.mxu0 }
 0x435   :  { %v2559_v43 = vpop.f32.mrf.mxu1 }
 0x436   :  { %v2490_v18 = vpop.f32.mrf.mxu0 }
 0x437   :  { %v2561_v17 = vpop.f32.mrf.mxu1 }
 0x438   :  { %v2630_v20 = vpop.f32.mrf.mxu0 }
 0x439   :  { %v2701_v16 = vpop.f32.mrf.mxu1 }
 0x43a   :  { %v2632_v63 = vpop.f32.mrf.mxu0 }
 0x43b   :  { %v2703_v35 = vpop.f32.mrf.mxu1 }
 0x43c   :  { %v2823_v23 = vpop.f32.mrf.mxu0 }
 0x43d   :  { %v2894_v37 = vpop.f32.mrf.mxu1  ;;  %v2824_v26 = vadd.f32 %v2823_v23, %v2204_v14 }
 0x43e   :  { %v2825_v45 = vpop.f32.mrf.mxu0  ;;  %v2895_v30 = vadd.f32 %v2894_v37, %v2275_v48 }
 0x43f   :  { %v2826_v19 = vadd.f32 %v2825_v45, %v2206_v5  ;;  %v2896_v53 = vpop.f32.mrf.mxu1 }
 0x440   :  { %v2965_v3 = vpop.f32.mrf.mxu0  ;;  %v2897_v32 = vadd.f32 %v2896_v53, %v2277_v8 }
 0x441   :  { %v3327_v11 = vadd.f32 %v2826_v19, %v2824_v26  ;;  %v3036_v13 = vpop.f32.mrf.mxu1  ;;  %v2966_v41 = vadd.f32 %v2965_v3, %v2346_v47 }
 0x442   :  { %v2967_v6 = vpop.f32.mrf.mxu0  ;;  %v3037_v22 = vadd.f32 %v3036_v13, %v2417_v49 }
 0x443   :  { %v3328_v27 = vadd.f32 %v3327_v11, %v2895_v30  ;;  %v2968_v44 = vadd.f32 %v2967_v6, %v2348_v34  ;;  %v3038_v46 = vpop.f32.mrf.mxu1 }
 0x444   :  { %v3107_v60 = vpop.f32.mrf.mxu0  ;;  %v3039_v9 = vadd.f32 %v3038_v46, %v2419_v42 }
 0x445   :  { %v3329_v38 = vadd.f32 %v3328_v27, %v2897_v32  ;;  %v3178_v55 = vpop.f32.mrf.mxu1  ;;  %v3108_v58 = vadd.f32 %v3107_v60, %v2488_v10 }
 0x446   :  { %v3109_v56 = vpop.f32.mrf.mxu0  ;;  %v3179_v0 = vadd.f32 %v3178_v55, %v2559_v43 }
 0x447   :  { %v3330_v36 = vadd.f32 %v3329_v38, %v2966_v41  ;;  %v3110_v39 = vadd.f32 %v3109_v56, %v2490_v18  ;;  %v3180_v50 = vpop.f32.mrf.mxu1 }
 0x448   :  { %v3249_v40 = vpop.f32.mrf.mxu0  ;;  %v3181_v15 = vadd.f32 %v3180_v50, %v2561_v17 }
 0x449   :  { %v3331_v31 = vadd.f32 %v3330_v36, %v2968_v44  ;;  %v3320_v24 = vpop.f32.mrf.mxu1  ;;  %v3250_v25 = vadd.f32 %v3249_v40, %v2630_v20 }
 0x44a   :  { %v3251_v28 = vpop.f32.mrf.mxu0  ;;  %v3321_v29 = vadd.f32 %v3320_v24, %v2701_v16 }
 0x44b   :  { %v3332_v54 = vadd.f32 %v3331_v31, %v3037_v22  ;;  %v3252_v2 = vadd.f32 %v3251_v28, %v2632_v63  ;;  %v3322_v51 = vpop.f32.mrf.mxu1 }
 0x44c   :  { %v3323_v62 = vadd.f32 %v3322_v51, %v2703_v35 }
 0x44d   :  { %v3333_v57 = vadd.f32 %v3332_v54, %v3039_v9 }
 0x44f   :  { %v3334_v52 = vadd.f32 %v3333_v57, %v3108_v58 }
 0x451   :  { %v3335_v1 = vadd.f32 %v3334_v52, %v3110_v39 }
 0x453   :  { %v3336_v21 = vadd.f32 %v3335_v1, %v3179_v0 }
 0x455   :  { %v3337_v33 = vadd.f32 %v3336_v21, %v3181_v15 }
 0x457   :  { %v3338_v7 = vadd.f32 %v3337_v33, %v3250_v25 }
 0x459   :  { %v3339_v12 = vadd.f32 %v3338_v7, %v3252_v2 }
 0x45b   :  { %v3340_v59 = vadd.f32 %v3339_v12, %v3321_v29 }
 0x45d   :  { %v3341_v4 = vadd.f32 %v3340_v59, %v3323_v62 }
 0x45f   :  { %3342 = vadd.xlane.f32.xlu1 %v3341_v4 }
 0x470   :  { %3415 = vperm.xlu1 %3710, %v3325_v61  }
 0x4e8   :  { %v3343_v14 = vpop.xlane.xlu1 %3342 }
 0x4e9   :  { %v3344_v48 = vmul.f32 0.00048828125, %v3343_v14 }
 0x4eb   :  { %v3345_v5 = vsub.f32 %v2824_v26, %v3344_v48  ;;  %v3346_v8 = vsub.f32 %v2826_v19, %v3344_v48  ;;  %v3347_v47 = vsub.f32 %v2895_v30, %v3344_v48  ;;  %v3348_v42 = vsub.f32 %v2897_v32, %v3344_v48 }
 0x4ec   :  { %v3349_v10 = vsub.f32 %v2966_v41, %v3344_v48  ;;  %v3350_v17 = vsub.f32 %v2968_v44, %v3344_v48  ;;  %v3351_v63 = vsub.f32 %v3037_v22, %v3344_v48  ;;  %v3352_v37 = vsub.f32 %v3039_v9, %v3344_v48  ;;  %v3416_v12 = vpop.permute.xlu1 %3415 }
 0x4ed   :  { %v3361_v49 = vmul.f32 %v3345_v5, %v3345_v5  ;;  %v3362_v34 = vmul.f32 %v3346_v8, %v3346_v8  ;;  %v3363_v43 = vmul.f32 %v3347_v47, %v3347_v47  ;;  %v3364_v20 = vmul.f32 %v3348_v42, %v3348_v42 }
 0x4ee   :  { %v3365_v35 = vmul.f32 %v3349_v10, %v3349_v10  ;;  %v3366_v45 = vmul.f32 %v3350_v17, %v3350_v17  ;;  %v3353_v3 = vsub.f32 %v3108_v58, %v3344_v48  ;;  %v3367_v11 = vmul.f32 %v3351_v63, %v3351_v63 }
 0x4ef   :  { %v3377_v18 = vadd.f32 %v3362_v34, %v3361_v49  ;;  %v3354_v19 = vsub.f32 %v3110_v39, %v3344_v48  ;;  %v3368_v30 = vmul.f32 %v3352_v37, %v3352_v37  ;;  %v3355_v13 = vsub.f32 %v3179_v0, %v3344_v48 }
 0x4f0   :  { %v3369_v32 = vmul.f32 %v3353_v3, %v3353_v3  ;;  %v3356_v38 = vsub.f32 %v3181_v15, %v3344_v48  ;;  %v3357_v44 = vsub.f32 %v3250_v25, %v3344_v48  ;;  %v3358_v22 = vsub.f32 %v3252_v2, %v3344_v48  ;;  %v3326_v15 = vld [vmem:[%s5467_s11] sm:$0xff]  ;;  %s3871_s11 = smov [#allocation7]  }
 0x4f1   :  { %v3378_v16 = vadd.f32 %v3377_v18, %v3363_v43  ;;  %v3370_v41 = vmul.f32 %v3354_v19, %v3354_v19  ;;  %v3371_v46 = vmul.f32 %v3355_v13, %v3355_v13  ;;  %v3359_v54 = vsub.f32 %v3321_v29, %v3344_v48  ;;  %s3573_s28 = sshll.u32 %s3871_s11, 4  ;;  %s3574_s28 = int_to_ptr.vmem [resolvable:$true] %s3573_s28 }
 0x4f2   :  { %v3372_v31 = vmul.f32 %v3356_v38, %v3356_v38  ;;  %v3373_v55 = vmul.f32 %v3357_v44, %v3357_v44  ;;  %v3360_v57 = vsub.f32 %v3323_v62, %v3344_v48  ;;  %v3374_v58 = vmul.f32 %v3358_v22, %v3358_v22  ;;  %s3841_s29 = scalar_lea.vmem %s3574_s28, 2048  ;;  %p3846_p6 = scmp.lt.s32.totalorder %s3574_s28, %s3574_s28 }
 0x4f3   :  { %v3379_v23 = vadd.f32 %v3378_v16, %v3364_v20  ;;  %v3375_v39 = vmul.f32 %v3359_v54, %v3359_v54  ;;  %p3842_p5 = scmp.ne.s32.totalorder %s3574_s28, %s3841_s29  ;;  %p3847_p7 = scmp.lt.s32.totalorder %s3841_s29, %s3841_s29 }
 0x4f4   :  { %v3376_v40 = vmul.f32 %v3360_v57, %v3360_v57 }
 0x4f5   :  { %v3380_v53 = vadd.f32 %v3379_v23, %v3365_v35  ;;  %p3848_p8 = por %p3847_p7, %p3846_p6 }
 0x4f7   :  { %v3381_v26 = vadd.f32 %v3380_v53, %v3366_v45  ;;  %p3849_p9 = pnand %p3848_p8, %p3842_p5 }
 0x4f9   :  { %v3382_v27 = vadd.f32 %v3381_v26, %v3367_v11 }
 0x4fb   :  { %v3383_v6 = vadd.f32 %v3382_v27, %v3368_v30 }
 0x4fd   :  { %v3384_v36 = vadd.f32 %v3383_v6, %v3369_v32 }
 0x4ff   :  { %v3385_v60 = vadd.f32 %v3384_v36, %v3370_v41 }
 0x501   :  { %v3386_v9 = vadd.f32 %v3385_v60, %v3371_v46 }
 0x503   :  { %v3387_v56 = vadd.f32 %v3386_v9, %v3372_v31 }
 0x505   :  { %v3388_v52 = vadd.f32 %v3387_v56, %v3373_v55 }
 0x507   :  { %v3389_v50 = vadd.f32 %v3388_v52, %v3374_v58 }
 0x509   :  { %v3390_v0 = vadd.f32 %v3389_v50, %v3375_v39 }
 0x50b   :  { %v3391_v1 = vadd.f32 %v3390_v0, %v3376_v40 }
 0x50d   :  { %3392 = vadd.xlane.f32.xlu0 %v3391_v1 }
 0x523   :  { %3436 = vperm.xlu0 %3709, %v3326_v15  }
 0x596   :  { %v3393_v21 = vpop.xlane.xlu0 %3392 }
 0x597   :  { %v3394_v24 = vmul.f32 0.00048828125, %v3393_v21 }
 0x599   :  { %v3395_v28 = vadd.f32 1e-05, %v3394_v24 }
 0x59b   :  { %3749 = vrsqrt.f32 %v3395_v28 }
 0x59e   :  { %v3437_v20 = vpop.permute.xlu0 %3436 }
 0x5a8   :  { %v3750_v33 = vpop.eup %3749 }
 0x5a9   :  { %v3397_v25 = vmul.f32 %v3750_v33, %v3345_v5  ;;  %v3398_v7 = vmul.f32 %v3750_v33, %v3346_v8  ;;  %v3399_v2 = vmul.f32 %v3750_v33, %v3347_v47  ;;  %v3400_v51 = vmul.f32 %v3750_v33, %v3348_v42 }
 0x5aa   :  { %v3401_v29 = vmul.f32 %v3750_v33, %v3349_v10  ;;  %v3402_v62 = vmul.f32 %v3750_v33, %v3350_v17  ;;  %v3403_v59 = vmul.f32 %v3750_v33, %v3351_v63  ;;  %v3404_v48 = vmul.f32 %v3750_v33, %v3352_v37 }
 0x5ab   :  { %v3418_v4 = vmul.f32 %v3416_v12, %v3397_v25  ;;  %v3419_v61 = vmul.f32 %v3416_v12, %v3398_v7  ;;  %v3420_v14 = vmul.f32 %v3416_v12, %v3399_v2  ;;  %v3421_v49 = vmul.f32 %v3416_v12, %v3400_v51 }
 0x5ac   :  { %v3405_v34 = vmul.f32 %v3750_v33, %v3353_v3  ;;  %v3422_v43 = vmul.f32 %v3416_v12, %v3401_v29  ;;  %v3406_v18 = vmul.f32 %v3750_v33, %v3354_v19  ;;  %v3423_v16 = vmul.f32 %v3416_v12, %v3402_v62 }
 0x5ad   :  { %v3424_v35 = vmul.f32 %v3416_v12, %v3403_v59  ;;  %v3407_v23 = vmul.f32 %v3750_v33, %v3355_v13  ;;  %v5373_v5 = vadd.f32 %v3437_v20, %v3418_v4  ;;  %v5375_v8 = vadd.f32 %v3437_v20, %v3419_v61 }
 0x5ae   :  { %v5377_v47 = vadd.f32 %v3437_v20, %v3420_v14  ;;  %v3408_v42 = vmul.f32 %v3750_v33, %v3356_v38  ;;  %v3425_v10 = vmul.f32 %v3416_v12, %v3404_v48  ;;  %v5379_v17 = vadd.f32 %v3437_v20, %v3421_v49 }
 0x5af   :  { %v3409_v63 = vmul.f32 %v3750_v33, %v3357_v44  ;;  %v3410_v37 = vmul.f32 %v3750_v33, %v3358_v22  ;;  %v3426_v45 = vmul.f32 %v3416_v12, %v3405_v34  ;;  %v5381_v53 = vadd.f32 %v3437_v20, %v3422_v43 }
 0x5b0   :  { %v3411_v3 = vmul.f32 %v3750_v33, %v3359_v54  ;;  %v3427_v11 = vmul.f32 %v3416_v12, %v3406_v18  ;;  %v5383_v26 = vadd.f32 %v3437_v20, %v3423_v16  ;;  %v5385_v19 = vadd.f32 %v3437_v20, %v3424_v35 }
 0x5b1   :  { %v3428_v30 = vmul.f32 %v3416_v12, %v3407_v23  ;;  %v3471_v27 = vmin.f32 %v5373_v5, 0.0  ;;  %v3472_v13 = vmin.f32 %v5375_v8, 0.0  ;;  %v3473_v32 = vmin.f32 %v5377_v47, 0.0 }
 0x5b2   :  { %v3412_v6 = vmul.f32 %v3750_v33, %v3360_v57  ;;  %v3429_v38 = vmul.f32 %v3416_v12, %v3408_v42  ;;  %v5390_v41 = vadd.f32 %v3437_v20, %v3425_v10  ;;  %v3474_v36 = vmin.f32 %v5379_v17, 0.0 }
 0x5b3   :  { %v3430_v44 = vmul.f32 %v3416_v12, %v3409_v63  ;;  %v3431_v46 = vmul.f32 %v3416_v12, %v3410_v37  ;;  %v5393_v60 = vadd.f32 %v3437_v20, %v3426_v45  ;;  %v3475_v22 = vmin.f32 %v5381_v53, 0.0 }
 0x5b4   :  { %v3432_v31 = vmul.f32 %v3416_v12, %v3411_v3  ;;  %v5396_v9 = vadd.f32 %v3437_v20, %v3427_v11  ;;  %v3476_v54 = vmin.f32 %v5383_v26, 0.0  ;;  %v3477_v55 = vmin.f32 %v5385_v19, 0.0 }
 0x5b5   :  { %v5400_v56 = vadd.f32 %v3437_v20, %v3428_v30  ;;  %v3487_v57 = vmul.f32 1.442695, %v3471_v27  ;;  %v3489_v58 = vmul.f32 1.442695, %v3472_v13  ;;  %v3491_v52 = vmul.f32 1.442695, %v3473_v32 }
 0x5b6   :  { %v3433_v39 = vmul.f32 %v3416_v12, %v3412_v6  ;;  %v5402_v50 = vadd.f32 %v3437_v20, %v3429_v38  ;;  %v3478_v40 = vmin.f32 %v5390_v41, 0.0  ;;  %v3493_v0 = vmul.f32 1.442695, %v3474_v36 }
 0x5b7   :  { %v5405_v1 = vadd.f32 %v3437_v20, %v3430_v44  ;;  %v3479_v15 = vmin.f32 %v5393_v60, 0.0  ;;  %3751 = vpow2.f32 %v3487_v57  ;;  %v3495_v21 = vmul.f32 1.442695, %v3475_v22 }
 0x5b8   :  { %v5408_v24 = vadd.f32 %v3437_v20, %v3431_v46  ;;  %v3480_v28 = vmin.f32 %v5396_v9, 0.0  ;;  %3753 = vpow2.f32 %v3489_v58  ;;  %v3497_v33 = vmul.f32 1.442695, %v3476_v54 }
 0x5b9   :  { %v5411_v25 = vadd.f32 %v3437_v20, %v3432_v31  ;;  %v3481_v7 = vmin.f32 %v5400_v56, 0.0  ;;  %3755 = vpow2.f32 %v3491_v52  ;;  %v3499_v2 = vmul.f32 1.442695, %v3477_v55 }
 0x5ba   :  { %v5414_v51 = vadd.f32 %v3437_v20, %v3433_v39  ;;  %v3482_v29 = vmin.f32 %v5402_v50, 0.0  ;;  %3757 = vpow2.f32 %v3493_v0  ;;  %v3501_v12 = vmul.f32 1.442695, %v3478_v40 }
 0x5bb   :  { %v3483_v62 = vmin.f32 %v5405_v1, 0.0  ;;  %3759 = vpow2.f32 %v3495_v21  ;;  %v3503_v59 = vmul.f32 1.442695, %v3479_v15  ;;  %v3484_v4 = vmin.f32 %v5408_v24, 0.0 }
 0x5bc   :  { %3761 = vpow2.f32 %v3497_v33  ;;  %v3505_v61 = vmul.f32 1.442695, %v3480_v28  ;;  %v3485_v14 = vmin.f32 %v5411_v25, 0.0  ;;  %v3507_v48 = vmul.f32 1.442695, %v3481_v7 }
 0x5bd   :  { %3763 = vpow2.f32 %v3499_v2  ;;  %v3486_v49 = vmin.f32 %v5414_v51, 0.0  ;;  %v3509_v34 = vmul.f32 1.442695, %v3482_v29  ;;  %v3511_v43 = vmul.f32 1.442695, %v3483_v62 }
 0x5be   :  { %3765 = vpow2.f32 %v3501_v12  ;;  %v3513_v18 = vmul.f32 1.442695, %v3484_v4  ;;  %v3515_v20 = vmul.f32 1.442695, %v3485_v14  ;;  %vm3455_vm0 = vcmp.gt.f32.partialorder %v5373_v5, 0.0 }
 0x5bf   :  { %3767 = vpow2.f32 %v3503_v59  ;;  %v3517_v16 = vmul.f32 1.442695, %v3486_v49  ;;  %vm3456_vm1 = vcmp.gt.f32.partialorder %v5375_v8, 0.0  ;;  %vm3457_vm4 = vcmp.gt.f32.partialorder %v5377_v47, 0.0 }
 0x5c0   :  { %3769 = vpow2.f32 %v3505_v61  ;;  %vm3458_vm5 = vcmp.gt.f32.partialorder %v5379_v17, 0.0  ;;  %vm3459_vm6 = vcmp.gt.f32.partialorder %v5381_v53, 0.0  ;;  %vm3460_vm7 = vcmp.gt.f32.partialorder %v5383_v26, 0.0 }
 0x5c1   :  { %3771 = vpow2.f32 %v3507_v48  ;;  %vm3461_vm8 = vcmp.gt.f32.partialorder %v5385_v19, 0.0  ;;  %vm3462_vm9 = vcmp.gt.f32.partialorder %v5390_v41, 0.0  ;;  %vm3463_vm10 = vcmp.gt.f32.partialorder %v5393_v60, 0.0 }
 0x5c2   :  { %3773 = vpow2.f32 %v3509_v34  ;;  %vm3464_vm11 = vcmp.gt.f32.partialorder %v5396_v9, 0.0  ;;  %vm3465_vm12 = vcmp.gt.f32.partialorder %v5400_v56, 0.0  ;;  %vm3466_vm13 = vcmp.gt.f32.partialorder %v5402_v50, 0.0 }
 0x5c3   :  { %3775 = vpow2.f32 %v3511_v43  ;;  %vm3467_vm14 = vcmp.gt.f32.partialorder %v5405_v1, 0.0  ;;  %vm3468_vm15 = vcmp.gt.f32.partialorder %v5408_v24, 0.0  ;;  %vm3469_vm2 = vcmp.gt.f32.partialorder %v5411_v25, 0.0 }
 0x5c4   :  { %v3752_v35 = vpop.eup %3751  ;;  %3777 = vpow2.f32 %v3513_v18  ;;  %vm3470_vm3 = vcmp.gt.f32.partialorder %v5414_v51, 0.0 }
 0x5c5   :  { %v3754_v23 = vpop.eup %3753  ;;  %3779 = vpow2.f32 %v3515_v20  ;;  %v3670_v42 = vadd.f32 -1.0, %v3752_v35 }
 0x5c6   :  { %v3756_v10 = vpop.eup %3755  ;;  %3781 = vpow2.f32 %v3517_v16  ;;  %v3671_v63 = vadd.f32 -1.0, %v3754_v23 }
 0x5c7   :  { %v3758_v37 = vpop.eup %3757  ;;  %v3672_v45 = vadd.f32 -1.0, %v3756_v10  ;;  %v3535_v3 = vsel %vm3455_vm0, %v5373_v5, %v3670_v42 }
 0x5c8   :  { %v3760_v11 = vpop.eup %3759  ;;  %v3673_v30 = vadd.f32 -1.0, %v3758_v37  ;;  %v3536_v27 = vsel %vm3456_vm1, %v5375_v8, %v3671_v63  ;;  %3551 = vst [vmem:[#allocation7] sm:$0xff] %v3535_v3 }
 0x5c9   :  { %v3762_v13 = vpop.eup %3761  ;;  %v3674_v32 = vadd.f32 -1.0, %v3760_v11  ;;  %v3537_v6 = vsel %vm3457_vm4, %v5377_v47, %v3672_v45  ;;  %3552 = vst [vmem:[#allocation7 + $0x8] sm:$0xff] %v3536_v27 }
 0x5ca   :  { %v3764_v38 = vpop.eup %3763  ;;  %v3675_v36 = vadd.f32 -1.0, %v3762_v13  ;;  %v3538_v5 = vsel %vm3458_vm5, %v5379_v17, %v3673_v30  ;;  %3553 = vst [vmem:[#allocation7 + $0x10] sm:$0xff] %v3537_v6 }
 0x5cb   :  { %v3766_v44 = vpop.eup %3765  ;;  %v3676_v46 = vadd.f32 -1.0, %v3764_v38  ;;  %v3539_v8 = vsel %vm3459_vm6, %v5381_v53, %v3674_v32  ;;  %3554 = vst [vmem:[#allocation7 + $0x18] sm:$0xff] %v3538_v5 }
 0x5cc   :  { %v3768_v22 = vpop.eup %3767  ;;  %v3677_v31 = vadd.f32 -1.0, %v3766_v44  ;;  %v3540_v47 = vsel %vm3460_vm7, %v5383_v26, %v3675_v36  ;;  %3555 = vst [vmem:[#allocation7 + $0x20] sm:$0xff] %v3539_v8 }
 0x5cd   :  { %v3770_v54 = vpop.eup %3769  ;;  %v3678_v55 = vadd.f32 -1.0, %v3768_v22  ;;  %v3541_v17 = vsel %vm3461_vm8, %v5385_v19, %v3676_v46  ;;  %3556 = vst [vmem:[#allocation7 + $0x28] sm:$0xff] %v3540_v47 }
 0x5ce   :  { %v3772_v57 = vpop.eup %3771  ;;  %v3679_v58 = vadd.f32 -1.0, %v3770_v54  ;;  %v3542_v53 = vsel %vm3462_vm9, %v5390_v41, %v3677_v31  ;;  %3557 = vst [vmem:[#allocation7 + $0x30] sm:$0xff] %v3541_v17 }
 0x5cf   :  { %v3774_v52 = vpop.eup %3773  ;;  %v3680_v39 = vadd.f32 -1.0, %v3772_v57  ;;  %v3543_v26 = vsel %vm3463_vm10, %v5393_v60, %v3678_v55  ;;  %3558 = vst [vmem:[#allocation7 + $0x38] sm:$0xff] %v3542_v53 }
 0x5d0   :  { %v3776_v40 = vpop.eup %3775  ;;  %v3681_v0 = vadd.f32 -1.0, %v3774_v52  ;;  %v3544_v19 = vsel %vm3464_vm11, %v5396_v9, %v3679_v58  ;;  %3559 = vst [vmem:[#allocation7 + $0x40] sm:$0xff] %v3543_v26 }
 0x5d1   :  { %v3778_v15 = vpop.eup %3777  ;;  %v3682_v21 = vadd.f32 -1.0, %v3776_v40  ;;  %v3545_v41 = vsel %vm3465_vm12, %v5400_v56, %v3680_v39  ;;  %3560 = vst [vmem:[#allocation7 + $0x48] sm:$0xff] %v3544_v19 }
 0x5d2   :  { %v3780_v28 = vpop.eup %3779  ;;  %v3683_v33 = vadd.f32 -1.0, %v3778_v15  ;;  %v3546_v60 = vsel %vm3466_vm13, %v5402_v50, %v3681_v0  ;;  %3561 = vst [vmem:[#allocation7 + $0x50] sm:$0xff] %v3545_v41 }
 0x5d3   :  { %v3782_v7 = vpop.eup %3781  ;;  %v3684_v9 = vadd.f32 -1.0, %v3780_v28  ;;  %v3547_v2 = vsel %vm3467_vm14, %v5405_v1, %v3682_v21  ;;  %3562 = vst [vmem:[#allocation7 + $0x58] sm:$0xff] %v3546_v60 }
 0x5d4   :  { %v3685_v56 = vadd.f32 -1.0, %v3782_v7  ;;  %v3548_v29 = vsel %vm3468_vm15, %v5408_v24, %v3683_v33  ;;  %3563 = vst [vmem:[#allocation7 + $0x60] sm:$0xff] %v3547_v2 }
 0x5d5   :  { %v3549_v50 = vsel %vm3469_vm2, %v5411_v25, %v3684_v9  ;;  %3564 = vst [vmem:[#allocation7 + $0x68] sm:$0xff] %v3548_v29 }
 0x5d6   :  { %v3550_v12 = vsel %vm3470_vm3, %v5414_v51, %v3685_v56  ;;  %3565 = vst [vmem:[#allocation7 + $0x70] sm:$0xff] %v3549_v50 }
 0x5d7   :  { %3566 = vst [vmem:[#allocation7 + $0x78] sm:$0xff] %v3550_v12 }
 0x5d8   :  { %3852 = shalt.err (!%p3849_p9)
}
 0x5d9   :  { %3576 = dma.vmem_to_hbm [thread:$0]  %s3574_s28, 2048, %s5468_s12, [#allocation6]  }
 0x5da   :  { %3863 = dma.done.wait [#allocation6], 2048  }
 0x5db   :  { %3864 = vsyncadd [#allocation6], 4294965248 }
 0x5dc   :  { %3580 = vsyncpa [#allocation5], 1 }
 0x5dd   :  { %3581 = vsyncpa [#allocation6], 1 }

</bundles_post_ra>
